<compile_context>
chip_gen: v7x
topology: tpu7x:2x2x1
jax: 0.10.0
libtpu: 0.0.40
codegen_flags: <defaults>
</compile_context>

<pallas_src>
import functools
import math

import jax
import jax.numpy as jnp
from jax.experimental import pallas as pl
from jax.experimental.pallas import tpu as pltpu

# ----------------------------- configuration -------------------------------
IMAGE_SIZE = 16
N_CHANNEL = 4
N_PATCH = 4                       # patches per side -> patch size = 4
N_DIM = 32
N_ENCODER_BLOCKS = 2
N_HEADS = 4
N_CLASSES = 10
HEAD_DIM = N_DIM // N_HEADS
PATCH_SIZE = IMAGE_SIZE // N_PATCH
PATCH_FEAT = N_CHANNEL * PATCH_SIZE * PATCH_SIZE
N_TOKENS = N_PATCH * N_PATCH + 1  # +1 for CLS
MLP_DIM = 4 * N_DIM
LN_EPS = 1e-5
N_CLASSES_PAD = 128               # lane-dense final store; sliced outside

# Packed per-block matmul-weight slab: lane offsets are 128-aligned so static
# slices stay vreg-aligned.
QKV_OFF = 0                       # 3*N_DIM = 96 lanes
PROJ_OFF = 128                    # N_DIM   = 32 lanes
FC1_OFF = 256                     # MLP_DIM = 128 lanes
W_IN_LANES = 384


# ----------------------------- in-kernel helpers ----------------------------
def _layernorm(x, g, b):
    mean = jnp.mean(x, axis=-1, keepdims=True)
    var = jnp.mean(jnp.square(x - mean), axis=-1, keepdims=True)
    return (x - mean) * jax.lax.rsqrt(var + LN_EPS) * g + b


def _erf(x):
    # Abramowitz & Stegun 7.1.26, |abs err| < 1.5e-7 (matches torch's erf GELU).
    a1, a2, a3, a4, a5 = 0.254829592, -0.284496736, 1.421413741, -1.453152027, 1.061405429
    p = 0.3275911
    sgn = jnp.where(x < 0.0, -1.0, 1.0)
    ax = jnp.abs(x)
    t = 1.0 / (1.0 + p * ax)
    poly = ((((a5 * t + a4) * t + a3) * t + a2) * t + a1) * t
    return sgn * (1.0 - poly * jnp.exp(-ax * ax))


def _gelu_exact(x):
    # TODO(synk): exact-erf GELU via rational approx (err ~1e-7 vs nn.GELU()).
    return 0.5 * x * (1.0 + _erf(x * (1.0 / math.sqrt(2.0))))


# ------------------------------ fused ViT kernel ----------------------------
def _vit_kernel(patches_ref, tok_add_ref, patch_w_ref, w_in_ref, w_fc2_ref,
                vec_ref, head_w_ref, head_b_ref, out_ref, *, n_images):
    f32 = jnp.float32
    bf16 = jnp.bfloat16
    scale = 1.0 / math.sqrt(HEAD_DIM)
    S, D = N_TOKENS, N_DIM

    # Patch embedding over the whole (G*S, PATCH_FEAT) slab.  CLS rows of
    # `patches` are zero; tok_add supplies cls+pos there and patch_bias+pos
    # elsewhere.
    x = patches_ref[0].astype(bf16)
    h = jnp.dot(x, patch_w_ref[...], preferred_element_type=f32) + tok_add_ref[...]

    for bi in range(N_ENCODER_BLOCKS):
        vec = vec_ref[bi]                                   # (8, 128) f32
        ln1_g, ln1_b = vec[0:1, :D], vec[1:2, :D]
        ln2_g, ln2_b = vec[2:3, :D], vec[3:4, :D]
        qkv_b = vec[4:5, :3 * D]
        proj_b = vec[5:6, :D]
        fc1_b = vec[6:7, :MLP_DIM]
        fc2_b = vec[7:8, :D]

        w_in = w_in_ref[bi]                                 # (D, 384) bf16
        w_qkv = w_in[:, QKV_OFF:QKV_OFF + 3 * D]
        w_proj = w_in[:, PROJ_OFF:PROJ_OFF + D]
        w_fc1 = w_in[:, FC1_OFF:FC1_OFF + MLP_DIM]

        # ---------------- pre-norm multi-head self-attention ----------------
        y = _layernorm(h, ln1_g, ln1_b)                     # (G*S, D) f32
        qkv = jnp.dot(y.astype(bf16), w_qkv,
                      preferred_element_type=f32) + qkv_b   # (G*S, 3D), 1 MXU op
        q = qkv[:, :D].astype(bf16)                         # head h at lanes h*8
        k = qkv[:, D:2 * D].astype(bf16)
        v = qkv[:, 2 * D:].astype(bf16)

        img_outs = []
        for ii in range(n_images):                          # tiny per-image attention
            r0 = ii * S
            head_outs = []
            for hi in range(N_HEADS):
                c0 = hi * HEAD_DIM
                q_h = q[r0:r0 + S, c0:c0 + HEAD_DIM]
                k_h = k[r0:r0 + S, c0:c0 + HEAD_DIM]
                v_h = v[r0:r0 + S, c0:c0 + HEAD_DIM]
                # contract last dims of both -> no k transpose materialized
                s = jax.lax.dot_general(q_h, k_h, (((1,), (1,)), ((), ())),
                                        preferred_element_type=f32) * scale
                m = jnp.max(s, axis=-1, keepdims=True)
                p = jnp.exp(s - m)
                l = jnp.sum(p, axis=-1, keepdims=True)
                p = p * pl.reciprocal(l, approx=False)      # exact softmax denom
                head_outs.append(jnp.dot(p.astype(bf16), v_h,
                                         preferred_element_type=f32))
            img_outs.append(jnp.concatenate(head_outs, axis=-1))   # (S, D)
        o = img_outs[0] if n_images == 1 else jnp.concatenate(img_outs, axis=0)

        # fused head-merge + output projection: one (G*S,32)@(32,32) matmul
        attn = jnp.dot(o.astype(bf16), w_proj, preferred_element_type=f32) + proj_b
        h = h + attn                                        # residual

        # ---------------------------- pre-norm MLP --------------------------
        y = _layernorm(h, ln2_g, ln2_b)
        y = jnp.dot(y.astype(bf16), w_fc1, preferred_element_type=f32) + fc1_b
        y = _gelu_exact(y)
        h = h + (jnp.dot(y.astype(bf16), w_fc2_ref[bi],
                         preferred_element_type=f32) + fc2_b)

    # ------------- classifier on CLS rows only, lane-dense store ------------
    if n_images == 1:
        cls = h[0:1]
    else:
        cls = jnp.concatenate([h[ii * S:ii * S + 1] for ii in range(n_images)],
                              axis=0)                       # (G, D)
    logits = jnp.dot(cls.astype(bf16), head_w_ref[...],
                     preferred_element_type=f32) + head_b_ref[...]
    out_ref[0] = logits                                     # (G, 128)


# ------------------------------ parameter init ------------------------------
def init_params(key):
    """PyTorch-like parameter layout."""
    def dense(k, fan_in, fan_out):
        kw, kb = jax.random.split(k)
        lim = 1.0 / math.sqrt(fan_in)
        w = jax.random.uniform(kw, (fan_in, fan_out), jnp.float32, -lim, lim)
        b = jax.random.uniform(kb, (fan_out,), jnp.float32, -lim, lim)
        return w, b

    keys = jax.random.split(key, 4 + N_ENCODER_BLOCKS)
    params = {}
    params["patch_w"], params["patch_b"] = dense(keys[0], PATCH_FEAT, N_DIM)
    params["cls"] = 0.02 * jax.random.normal(keys[1], (1, N_DIM), jnp.float32)
    params["pos"] = 0.02 * jax.random.normal(keys[2], (N_TOKENS, N_DIM), jnp.float32)
    params["head_w"], params["head_b"] = dense(keys[3], N_DIM, N_CLASSES)

    blocks = []
    for bi in range(N_ENCODER_BLOCKS):
        bk = jax.random.split(keys[4 + bi], 4)
        blk = {
            "ln1_g": jnp.ones((N_DIM,), jnp.float32),
            "ln1_b": jnp.zeros((N_DIM,), jnp.float32),
            "ln2_g": jnp.ones((N_DIM,), jnp.float32),
            "ln2_b": jnp.zeros((N_DIM,), jnp.float32),
        }
        # fused qkv weight: output axis ordered [q | k | v], head h at cols h*8
        blk["qkv_w"], blk["qkv_b"] = dense(bk[0], N_DIM, 3 * N_DIM)
        blk["proj_w"], blk["proj_b"] = dense(bk[1], N_DIM, N_DIM)
        blk["fc1_w"], blk["fc1_b"] = dense(bk[2], N_DIM, MLP_DIM)
        blk["fc2_w"], blk["fc2_b"] = dense(bk[3], MLP_DIM, N_DIM)
        blocks.append(blk)
    params["blocks"] = blocks
    return params


def pack_params(p):
    """Kernel-ready layout (done once, outside the hot path). Matmul weights bf16."""
    D = N_DIM
    packed = {}
    packed["patch_w"] = p["patch_w"].astype(jnp.bfloat16)                    # (64, 32)
    # Additive token term: row 0 = cls + pos[0]; rows 1.. = patch_bias + pos[1..]
    packed["tok_add"] = jnp.concatenate(
        [p["cls"] + p["pos"][0:1], p["pos"][1:] + p["patch_b"][None, :]], axis=0)

    w_in, w_fc2, vec = [], [], []
    for blk in p["blocks"]:
        slab = jnp.zeros((D, W_IN_LANES), jnp.float32)
        slab = slab.at[:, QKV_OFF:QKV_OFF + 3 * D].set(blk["qkv_w"])
        slab = slab.at[:, PROJ_OFF:PROJ_OFF + D].set(blk["proj_w"])
        slab = slab.at[:, FC1_OFF:FC1_OFF + MLP_DIM].set(blk["fc1_w"])
        w_in.append(slab)
        w_fc2.append(blk["fc2_w"])
        row = jnp.zeros((8, 128), jnp.float32)
        row = row.at[0, :D].set(blk["ln1_g"])
        row = row.at[1, :D].set(blk["ln1_b"])
        row = row.at[2, :D].set(blk["ln2_g"])
        row = row.at[3, :D].set(blk["ln2_b"])
        row = row.at[4, :3 * D].set(blk["qkv_b"])
        row = row.at[5, :D].set(blk["proj_b"])
        row = row.at[6, :MLP_DIM].set(blk["fc1_b"])
        row = row.at[7, :D].set(blk["fc2_b"])
        vec.append(row)
    packed["w_in"] = jnp.stack(w_in).astype(jnp.bfloat16)                    # (nb, 32, 384)
    packed["w_fc2"] = jnp.stack(w_fc2).astype(jnp.bfloat16)                  # (nb, 128, 32)
    packed["vec"] = jnp.stack(vec)                                           # (nb, 8, 128) f32
    packed["head_w"] = (jnp.zeros((D, N_CLASSES_PAD), jnp.float32)
                        .at[:, :N_CLASSES].set(p["head_w"])).astype(jnp.bfloat16)
    packed["head_b"] = (jnp.zeros((1, N_CLASSES_PAD), jnp.float32)
                        .at[:, :N_CLASSES].set(p["head_b"]))
    return packed


# ------------------------------ forward pass --------------------------------
def vit_forward(packed, x, group_size=None):
    # x: (B, C, H, W)  (NCHW, as in PyTorch)
    B = x.shape[0]
    ps = PATCH_SIZE
    npatch = N_PATCH * N_PATCH
    S = N_TOKENS

    if group_size is None:
        # Fill the MXU sublane dim (~128 rows) for real batches; keep the grid
        # length >= 2 so both v7x TensorCores get work for small batches.
        group_size = 1 if B < 4 else min(7, B // 2)
    G = group_size
    n_groups = -(-B // G)
    B_pad = n_groups * G

    # Patch extraction (pure layout glue), plus a leading zero row per image
    # that stands in for the CLS token (tok_add supplies its value in-kernel).
    # TODO(synk): if the PyTorch reference uses the CNN embedding path, the conv
    # weight (out, C, kh, kw) must be flattened to match this (C, ph, pw) order.
    patches = x.reshape(B, N_CHANNEL, N_PATCH, ps, N_PATCH, ps)
    patches = patches.transpose(0, 2, 4, 1, 3, 5).reshape(B, npatch, PATCH_FEAT)
    patches = jnp.pad(patches, ((0, 0), (1, 0), (0, 0)))          # (B, S, PF)
    if B_pad != B:
        patches = jnp.pad(patches, ((0, B_pad - B), (0, 0), (0, 0)))
    patches = patches.reshape(n_groups, G * S, PATCH_FEAT)

    tok_add = jnp.tile(packed["tok_add"], (G, 1))                 # (G*S, D) f32

    weights = [tok_add, packed["patch_w"], packed["w_in"], packed["w_fc2"],
               packed["vec"], packed["head_w"], packed["head_b"]]

    def whole(a):  # whole-array block, resident across the grid axis
        return pl.BlockSpec(a.shape, lambda g, _n=a.ndim: (0,) * _n)

    kernel = functools.partial(_vit_kernel, n_images=G)
    out = pl.pallas_call(
        kernel,
        out_shape=jax.ShapeDtypeStruct((n_groups, G, N_CLASSES_PAD), jnp.float32),
        grid=(n_groups,),
        in_specs=[pl.BlockSpec((1, G * S, PATCH_FEAT), lambda g: (g, 0, 0))]
                 + [whole(a) for a in weights],
        out_specs=pl.BlockSpec((1, G, N_CLASSES_PAD), lambda g: (g, 0, 0)),
        compiler_params=pltpu.CompilerParams(dimension_semantics=("parallel",)),
    )(patches, *weights)

    # CLS-token logits, (B, n_classes)
    return out.reshape(B_pad, N_CLASSES_PAD)[:B, :N_CLASSES]


def vit_predict(packed, x):
    return jnp.argmax(vit_forward(packed, x), axis=-1)


# ---------------------------------- main -------------------------------------
if __name__ == "__main__":
    data_key, param_key = jax.random.split(jax.random.PRNGKey(0))
    x = jax.random.normal(data_key, (2, N_CHANNEL, IMAGE_SIZE, IMAGE_SIZE), jnp.float32)
    packed = pack_params(init_params(param_key))

    logits = jax.block_until_ready(jax.jit(vit_forward)(packed, x))
    assert logits.shape == (2, N_CLASSES)
    assert bool(jnp.all(jnp.isfinite(logits)))

    preds = jax.block_until_ready(jax.jit(vit_predict)(packed, x))
    assert preds.shape == (2,)
    print("KERNEL_OK")
</pallas_src>

<mosaic_0001>
module attributes {stable_mosaic.version = 11 : i64} {
  func.func @_vit_kernel(%arg0: i32, %arg1: memref<1x17x64xf32, #tpu.memory_space<vmem>>, %arg2: memref<17x32xf32, #tpu.memory_space<vmem>>, %arg3: memref<64x32xbf16, #tpu.memory_space<vmem>>, %arg4: memref<2x32x384xbf16, #tpu.memory_space<vmem>>, %arg5: memref<2x128x32xbf16, #tpu.memory_space<vmem>>, %arg6: memref<2x8x128xf32, #tpu.memory_space<vmem>>, %arg7: memref<32x128xbf16, #tpu.memory_space<vmem>>, %arg8: memref<1x128xf32, #tpu.memory_space<vmem>>, %arg9: memref<1x1x128xf32, #tpu.memory_space<vmem>>) attributes {dimension_semantics = [#tpu.dimension_semantics<parallel>], iteration_bounds = array<i64: 2>, scalar_prefetch = 0 : i64, scratch_operands = 0 : i64, tpu.core_type = #tpu.core_type<tc>, window_params = [{transform_indices = @transform_0, window_bounds = array<i64: 1, 17, 64>}, {pipeline_mode = #tpu.pipeline_mode<synchronous>, transform_indices = @transform_1, window_bounds = array<i64: 17, 32>}, {pipeline_mode = #tpu.pipeline_mode<synchronous>, transform_indices = @transform_2, window_bounds = array<i64: 64, 32>}, {pipeline_mode = #tpu.pipeline_mode<synchronous>, transform_indices = @transform_3, window_bounds = array<i64: 2, 32, 384>}, {pipeline_mode = #tpu.pipeline_mode<synchronous>, transform_indices = @transform_4, window_bounds = array<i64: 2, 128, 32>}, {pipeline_mode = #tpu.pipeline_mode<synchronous>, transform_indices = @transform_5, window_bounds = array<i64: 2, 8, 128>}, {pipeline_mode = #tpu.pipeline_mode<synchronous>, transform_indices = @transform_6, window_bounds = array<i64: 32, 128>}, {pipeline_mode = #tpu.pipeline_mode<synchronous>, transform_indices = @transform_7, window_bounds = array<i64: 1, 128>}, {transform_indices = @transform_8, window_bounds = array<i64: 1, 1, 128>}]} {
    %c0 = arith.constant 0 : index
    %c0_0 = arith.constant 0 : index
    %c0_1 = arith.constant 0 : index
    %0 = vector.load %arg1[%c0, %c0_0, %c0_1] : memref<1x17x64xf32, #tpu.memory_space<vmem>>, vector<1x17x64xf32>
    %1 = vector.shape_cast %0 : vector<1x17x64xf32> to vector<17x64xf32>
    %2 = arith.truncf %1 : vector<17x64xf32> to vector<17x64xbf16>
    %c0_2 = arith.constant 0 : index
    %c0_3 = arith.constant 0 : index
    %3 = vector.load %arg3[%c0_2, %c0_3] : memref<64x32xbf16, #tpu.memory_space<vmem>>, vector<64x32xbf16>
    %cst = arith.constant dense<0.000000e+00> : vector<17x32xf32>
    %4 = tpu.matmul %2, %3, %cst {dimension_numbers = #tpu.dot_dimension_numbers<[1], [0], [0], [1], [0, 0, 1, 1], [], []>} : vector<17x64xbf16>, vector<64x32xbf16>, vector<17x32xf32> -> vector<17x32xf32>
    %c0_4 = arith.constant 0 : index
    %c0_5 = arith.constant 0 : index
    %5 = vector.load %arg2[%c0_4, %c0_5] : memref<17x32xf32, #tpu.memory_space<vmem>>, vector<17x32xf32>
    %6 = arith.addf %4, %5 : vector<17x32xf32>
    %c0_6 = arith.constant 0 : index
    %c0_7 = arith.constant 0 : index
    %c0_8 = arith.constant 0 : index
    %7 = vector.load %arg6[%c0_6, %c0_7, %c0_8] : memref<2x8x128xf32, #tpu.memory_space<vmem>>, vector<1x8x128xf32>
    %8 = vector.shape_cast %7 : vector<1x8x128xf32> to vector<8x128xf32>
    %9 = vector.extract_strided_slice %8 {offsets = [0, 0], sizes = [1, 32], strides = [1, 1]} : vector<8x128xf32> to vector<1x32xf32>
    %10 = vector.extract_strided_slice %8 {offsets = [1, 0], sizes = [1, 32], strides = [1, 1]} : vector<8x128xf32> to vector<1x32xf32>
    %11 = vector.extract_strided_slice %8 {offsets = [2, 0], sizes = [1, 32], strides = [1, 1]} : vector<8x128xf32> to vector<1x32xf32>
    %12 = vector.extract_strided_slice %8 {offsets = [3, 0], sizes = [1, 32], strides = [1, 1]} : vector<8x128xf32> to vector<1x32xf32>
    %13 = vector.extract_strided_slice %8 {offsets = [4, 0], sizes = [1, 96], strides = [1, 1]} : vector<8x128xf32> to vector<1x96xf32>
    %14 = vector.extract_strided_slice %8 {offsets = [5, 0], sizes = [1, 32], strides = [1, 1]} : vector<8x128xf32> to vector<1x32xf32>
    %15 = vector.extract_strided_slice %8 {offsets = [6, 0], sizes = [1, 128], strides = [1, 1]} : vector<8x128xf32> to vector<1x128xf32>
    %16 = vector.extract_strided_slice %8 {offsets = [7, 0], sizes = [1, 32], strides = [1, 1]} : vector<8x128xf32> to vector<1x32xf32>
    %c0_9 = arith.constant 0 : index
    %c0_10 = arith.constant 0 : index
    %c0_11 = arith.constant 0 : index
    %17 = vector.load %arg4[%c0_9, %c0_10, %c0_11] : memref<2x32x384xbf16, #tpu.memory_space<vmem>>, vector<1x32x384xbf16>
    %18 = vector.shape_cast %17 : vector<1x32x384xbf16> to vector<32x384xbf16>
    %19 = vector.extract_strided_slice %18 {offsets = [0, 0], sizes = [32, 96], strides = [1, 1]} : vector<32x384xbf16> to vector<32x96xbf16>
    %20 = vector.extract_strided_slice %18 {offsets = [0, 128], sizes = [32, 32], strides = [1, 1]} : vector<32x384xbf16> to vector<32x32xbf16>
    %21 = vector.extract_strided_slice %18 {offsets = [0, 256], sizes = [32, 128], strides = [1, 1]} : vector<32x384xbf16> to vector<32x128xbf16>
    %cst_12 = arith.constant dense<0.000000e+00> : vector<17xf32>
    %22 = vector.multi_reduction <add>, %6, %cst_12 [1] : vector<17x32xf32> to vector<17xf32>
    %23 = vector.shape_cast %22 : vector<17xf32> to vector<17x1xf32>
    %cst_13 = arith.constant 3.200000e+01 : f32
    %24 = vector.broadcast %cst_13 : f32 to vector<17x1xf32>
    %25 = arith.divf %23, %24 : vector<17x1xf32>
    %26 = vector.broadcast %25 : vector<17x1xf32> to vector<17x32xf32>
    %27 = arith.subf %6, %26 : vector<17x32xf32>
    %28 = arith.mulf %27, %27 : vector<17x32xf32>
    %cst_14 = arith.constant dense<0.000000e+00> : vector<17xf32>
    %29 = vector.multi_reduction <add>, %28, %cst_14 [1] : vector<17x32xf32> to vector<17xf32>
    %30 = vector.shape_cast %29 : vector<17xf32> to vector<17x1xf32>
    %cst_15 = arith.constant 3.200000e+01 : f32
    %31 = vector.broadcast %cst_15 : f32 to vector<17x1xf32>
    %32 = arith.divf %30, %31 : vector<17x1xf32>
    %33 = vector.broadcast %25 : vector<17x1xf32> to vector<17x32xf32>
    %34 = arith.subf %6, %33 : vector<17x32xf32>
    %cst_16 = arith.constant 9.99999974E-6 : f32
    %35 = vector.broadcast %cst_16 : f32 to vector<17x1xf32>
    %36 = arith.addf %32, %35 : vector<17x1xf32>
    %37 = math.rsqrt %36 : vector<17x1xf32>
    %38 = vector.broadcast %37 : vector<17x1xf32> to vector<17x32xf32>
    %39 = arith.mulf %34, %38 : vector<17x32xf32>
    %40 = vector.broadcast %9 : vector<1x32xf32> to vector<17x32xf32>
    %41 = arith.mulf %39, %40 : vector<17x32xf32>
    %42 = vector.broadcast %10 : vector<1x32xf32> to vector<17x32xf32>
    %43 = arith.addf %41, %42 : vector<17x32xf32>
    %44 = arith.truncf %43 : vector<17x32xf32> to vector<17x32xbf16>
    %cst_17 = arith.constant dense<0.000000e+00> : vector<17x96xf32>
    %45 = tpu.matmul %44, %19, %cst_17 {dimension_numbers = #tpu.dot_dimension_numbers<[1], [0], [0], [1], [0, 0, 1, 1], [], []>} : vector<17x32xbf16>, vector<32x96xbf16>, vector<17x96xf32> -> vector<17x96xf32>
    %46 = vector.broadcast %13 : vector<1x96xf32> to vector<17x96xf32>
    %47 = arith.addf %45, %46 : vector<17x96xf32>
    %48 = vector.extract_strided_slice %47 {offsets = [0, 0], sizes = [17, 32], strides = [1, 1]} : vector<17x96xf32> to vector<17x32xf32>
    %49 = arith.truncf %48 : vector<17x32xf32> to vector<17x32xbf16>
    %50 = vector.extract_strided_slice %47 {offsets = [0, 32], sizes = [17, 32], strides = [1, 1]} : vector<17x96xf32> to vector<17x32xf32>
    %51 = arith.truncf %50 : vector<17x32xf32> to vector<17x32xbf16>
    %52 = vector.extract_strided_slice %47 {offsets = [0, 64], sizes = [17, 32], strides = [1, 1]} : vector<17x96xf32> to vector<17x32xf32>
    %53 = arith.truncf %52 : vector<17x32xf32> to vector<17x32xbf16>
    %54 = vector.extract_strided_slice %49 {offsets = [0, 0], sizes = [17, 8], strides = [1, 1]} : vector<17x32xbf16> to vector<17x8xbf16>
    %55 = vector.extract_strided_slice %51 {offsets = [0, 0], sizes = [17, 8], strides = [1, 1]} : vector<17x32xbf16> to vector<17x8xbf16>
    %56 = vector.extract_strided_slice %53 {offsets = [0, 0], sizes = [17, 8], strides = [1, 1]} : vector<17x32xbf16> to vector<17x8xbf16>
    %cst_18 = arith.constant dense<0.000000e+00> : vector<17x17xf32>
    %57 = tpu.matmul %54, %55, %cst_18 {dimension_numbers = #tpu.dot_dimension_numbers<[1], [1], [0], [0], [0, 0, 1, 0], [], []>} : vector<17x8xbf16>, vector<17x8xbf16>, vector<17x17xf32> -> vector<17x17xf32>
    %cst_19 = arith.constant 0.353553385 : f32
    %58 = vector.broadcast %cst_19 : f32 to vector<17x17xf32>
    %59 = arith.mulf %57, %58 : vector<17x17xf32>
    %cst_20 = arith.constant dense<0xFF800000> : vector<17xf32>
    %60 = vector.multi_reduction <maximumf>, %59, %cst_20 [1] : vector<17x17xf32> to vector<17xf32>
    %61 = vector.shape_cast %60 : vector<17xf32> to vector<17x1xf32>
    %62 = vector.broadcast %61 : vector<17x1xf32> to vector<17x17xf32>
    %63 = arith.subf %59, %62 : vector<17x17xf32>
    %64 = math.exp %63 : vector<17x17xf32>
    %cst_21 = arith.constant dense<0.000000e+00> : vector<17xf32>
    %65 = vector.multi_reduction <add>, %64, %cst_21 [1] : vector<17x17xf32> to vector<17xf32>
    %66 = vector.shape_cast %65 : vector<17xf32> to vector<17x1xf32>
    %67 = tpu.reciprocal %66 : vector<17x1xf32> -> vector<17x1xf32>
    %68 = vector.broadcast %67 : vector<17x1xf32> to vector<17x17xf32>
    %69 = arith.mulf %64, %68 : vector<17x17xf32>
    %70 = arith.truncf %69 : vector<17x17xf32> to vector<17x17xbf16>
    %cst_22 = arith.constant dense<0.000000e+00> : vector<17x8xf32>
    %71 = tpu.matmul %70, %56, %cst_22 {dimension_numbers = #tpu.dot_dimension_numbers<[1], [0], [0], [1], [0, 0, 1, 1], [], []>} : vector<17x17xbf16>, vector<17x8xbf16>, vector<17x8xf32> -> vector<17x8xf32>
    %72 = vector.extract_strided_slice %49 {offsets = [0, 8], sizes = [17, 8], strides = [1, 1]} : vector<17x32xbf16> to vector<17x8xbf16>
    %73 = vector.extract_strided_slice %51 {offsets = [0, 8], sizes = [17, 8], strides = [1, 1]} : vector<17x32xbf16> to vector<17x8xbf16>
    %74 = vector.extract_strided_slice %53 {offsets = [0, 8], sizes = [17, 8], strides = [1, 1]} : vector<17x32xbf16> to vector<17x8xbf16>
    %cst_23 = arith.constant dense<0.000000e+00> : vector<17x17xf32>
    %75 = tpu.matmul %72, %73, %cst_23 {dimension_numbers = #tpu.dot_dimension_numbers<[1], [1], [0], [0], [0, 0, 1, 0], [], []>} : vector<17x8xbf16>, vector<17x8xbf16>, vector<17x17xf32> -> vector<17x17xf32>
    %cst_24 = arith.constant 0.353553385 : f32
    %76 = vector.broadcast %cst_24 : f32 to vector<17x17xf32>
    %77 = arith.mulf %75, %76 : vector<17x17xf32>
    %cst_25 = arith.constant dense<0xFF800000> : vector<17xf32>
    %78 = vector.multi_reduction <maximumf>, %77, %cst_25 [1] : vector<17x17xf32> to vector<17xf32>
    %79 = vector.shape_cast %78 : vector<17xf32> to vector<17x1xf32>
    %80 = vector.broadcast %79 : vector<17x1xf32> to vector<17x17xf32>
    %81 = arith.subf %77, %80 : vector<17x17xf32>
    %82 = math.exp %81 : vector<17x17xf32>
    %cst_26 = arith.constant dense<0.000000e+00> : vector<17xf32>
    %83 = vector.multi_reduction <add>, %82, %cst_26 [1] : vector<17x17xf32> to vector<17xf32>
    %84 = vector.shape_cast %83 : vector<17xf32> to vector<17x1xf32>
    %85 = tpu.reciprocal %84 : vector<17x1xf32> -> vector<17x1xf32>
    %86 = vector.broadcast %85 : vector<17x1xf32> to vector<17x17xf32>
    %87 = arith.mulf %82, %86 : vector<17x17xf32>
    %88 = arith.truncf %87 : vector<17x17xf32> to vector<17x17xbf16>
    %cst_27 = arith.constant dense<0.000000e+00> : vector<17x8xf32>
    %89 = tpu.matmul %88, %74, %cst_27 {dimension_numbers = #tpu.dot_dimension_numbers<[1], [0], [0], [1], [0, 0, 1, 1], [], []>} : vector<17x17xbf16>, vector<17x8xbf16>, vector<17x8xf32> -> vector<17x8xf32>
    %90 = vector.extract_strided_slice %49 {offsets = [0, 16], sizes = [17, 8], strides = [1, 1]} : vector<17x32xbf16> to vector<17x8xbf16>
    %91 = vector.extract_strided_slice %51 {offsets = [0, 16], sizes = [17, 8], strides = [1, 1]} : vector<17x32xbf16> to vector<17x8xbf16>
    %92 = vector.extract_strided_slice %53 {offsets = [0, 16], sizes = [17, 8], strides = [1, 1]} : vector<17x32xbf16> to vector<17x8xbf16>
    %cst_28 = arith.constant dense<0.000000e+00> : vector<17x17xf32>
    %93 = tpu.matmul %90, %91, %cst_28 {dimension_numbers = #tpu.dot_dimension_numbers<[1], [1], [0], [0], [0, 0, 1, 0], [], []>} : vector<17x8xbf16>, vector<17x8xbf16>, vector<17x17xf32> -> vector<17x17xf32>
    %cst_29 = arith.constant 0.353553385 : f32
    %94 = vector.broadcast %cst_29 : f32 to vector<17x17xf32>
    %95 = arith.mulf %93, %94 : vector<17x17xf32>
    %cst_30 = arith.constant dense<0xFF800000> : vector<17xf32>
    %96 = vector.multi_reduction <maximumf>, %95, %cst_30 [1] : vector<17x17xf32> to vector<17xf32>
    %97 = vector.shape_cast %96 : vector<17xf32> to vector<17x1xf32>
    %98 = vector.broadcast %97 : vector<17x1xf32> to vector<17x17xf32>
    %99 = arith.subf %95, %98 : vector<17x17xf32>
    %100 = math.exp %99 : vector<17x17xf32>
    %cst_31 = arith.constant dense<0.000000e+00> : vector<17xf32>
    %101 = vector.multi_reduction <add>, %100, %cst_31 [1] : vector<17x17xf32> to vector<17xf32>
    %102 = vector.shape_cast %101 : vector<17xf32> to vector<17x1xf32>
    %103 = tpu.reciprocal %102 : vector<17x1xf32> -> vector<17x1xf32>
    %104 = vector.broadcast %103 : vector<17x1xf32> to vector<17x17xf32>
    %105 = arith.mulf %100, %104 : vector<17x17xf32>
    %106 = arith.truncf %105 : vector<17x17xf32> to vector<17x17xbf16>
    %cst_32 = arith.constant dense<0.000000e+00> : vector<17x8xf32>
    %107 = tpu.matmul %106, %92, %cst_32 {dimension_numbers = #tpu.dot_dimension_numbers<[1], [0], [0], [1], [0, 0, 1, 1], [], []>} : vector<17x17xbf16>, vector<17x8xbf16>, vector<17x8xf32> -> vector<17x8xf32>
    %108 = vector.extract_strided_slice %49 {offsets = [0, 24], sizes = [17, 8], strides = [1, 1]} : vector<17x32xbf16> to vector<17x8xbf16>
    %109 = vector.extract_strided_slice %51 {offsets = [0, 24], sizes = [17, 8], strides = [1, 1]} : vector<17x32xbf16> to vector<17x8xbf16>
    %110 = vector.extract_strided_slice %53 {offsets = [0, 24], sizes = [17, 8], strides = [1, 1]} : vector<17x32xbf16> to vector<17x8xbf16>
    %cst_33 = arith.constant dense<0.000000e+00> : vector<17x17xf32>
    %111 = tpu.matmul %108, %109, %cst_33 {dimension_numbers = #tpu.dot_dimension_numbers<[1], [1], [0], [0], [0, 0, 1, 0], [], []>} : vector<17x8xbf16>, vector<17x8xbf16>, vector<17x17xf32> -> vector<17x17xf32>
    %cst_34 = arith.constant 0.353553385 : f32
    %112 = vector.broadcast %cst_34 : f32 to vector<17x17xf32>
    %113 = arith.mulf %111, %112 : vector<17x17xf32>
    %cst_35 = arith.constant dense<0xFF800000> : vector<17xf32>
    %114 = vector.multi_reduction <maximumf>, %113, %cst_35 [1] : vector<17x17xf32> to vector<17xf32>
    %115 = vector.shape_cast %114 : vector<17xf32> to vector<17x1xf32>
    %116 = vector.broadcast %115 : vector<17x1xf32> to vector<17x17xf32>
    %117 = arith.subf %113, %116 : vector<17x17xf32>
    %118 = math.exp %117 : vector<17x17xf32>
    %cst_36 = arith.constant dense<0.000000e+00> : vector<17xf32>
    %119 = vector.multi_reduction <add>, %118, %cst_36 [1] : vector<17x17xf32> to vector<17xf32>
    %120 = vector.shape_cast %119 : vector<17xf32> to vector<17x1xf32>
    %121 = tpu.reciprocal %120 : vector<17x1xf32> -> vector<17x1xf32>
    %122 = vector.broadcast %121 : vector<17x1xf32> to vector<17x17xf32>
    %123 = arith.mulf %118, %122 : vector<17x17xf32>
    %124 = arith.truncf %123 : vector<17x17xf32> to vector<17x17xbf16>
    %cst_37 = arith.constant dense<0.000000e+00> : vector<17x8xf32>
    %125 = tpu.matmul %124, %110, %cst_37 {dimension_numbers = #tpu.dot_dimension_numbers<[1], [0], [0], [1], [0, 0, 1, 1], [], []>} : vector<17x17xbf16>, vector<17x8xbf16>, vector<17x8xf32> -> vector<17x8xf32>
    %126 = tpu.concatenate %71, %89, %107, %125 in 1 : vector<17x8xf32>, vector<17x8xf32>, vector<17x8xf32>, vector<17x8xf32> -> vector<17x32xf32>
    %127 = arith.truncf %126 : vector<17x32xf32> to vector<17x32xbf16>
    %cst_38 = arith.constant dense<0.000000e+00> : vector<17x32xf32>
    %128 = tpu.matmul %127, %20, %cst_38 {dimension_numbers = #tpu.dot_dimension_numbers<[1], [0], [0], [1], [0, 0, 1, 1], [], []>} : vector<17x32xbf16>, vector<32x32xbf16>, vector<17x32xf32> -> vector<17x32xf32>
    %129 = vector.broadcast %14 : vector<1x32xf32> to vector<17x32xf32>
    %130 = arith.addf %128, %129 : vector<17x32xf32>
    %131 = arith.addf %6, %130 : vector<17x32xf32>
    %cst_39 = arith.constant dense<0.000000e+00> : vector<17xf32>
    %132 = vector.multi_reduction <add>, %131, %cst_39 [1] : vector<17x32xf32> to vector<17xf32>
    %133 = vector.shape_cast %132 : vector<17xf32> to vector<17x1xf32>
    %cst_40 = arith.constant 3.200000e+01 : f32
    %134 = vector.broadcast %cst_40 : f32 to vector<17x1xf32>
    %135 = arith.divf %133, %134 : vector<17x1xf32>
    %136 = vector.broadcast %135 : vector<17x1xf32> to vector<17x32xf32>
    %137 = arith.subf %131, %136 : vector<17x32xf32>
    %138 = arith.mulf %137, %137 : vector<17x32xf32>
    %cst_41 = arith.constant dense<0.000000e+00> : vector<17xf32>
    %139 = vector.multi_reduction <add>, %138, %cst_41 [1] : vector<17x32xf32> to vector<17xf32>
    %140 = vector.shape_cast %139 : vector<17xf32> to vector<17x1xf32>
    %cst_42 = arith.constant 3.200000e+01 : f32
    %141 = vector.broadcast %cst_42 : f32 to vector<17x1xf32>
    %142 = arith.divf %140, %141 : vector<17x1xf32>
    %143 = vector.broadcast %135 : vector<17x1xf32> to vector<17x32xf32>
    %144 = arith.subf %131, %143 : vector<17x32xf32>
    %cst_43 = arith.constant 9.99999974E-6 : f32
    %145 = vector.broadcast %cst_43 : f32 to vector<17x1xf32>
    %146 = arith.addf %142, %145 : vector<17x1xf32>
    %147 = math.rsqrt %146 : vector<17x1xf32>
    %148 = vector.broadcast %147 : vector<17x1xf32> to vector<17x32xf32>
    %149 = arith.mulf %144, %148 : vector<17x32xf32>
    %150 = vector.broadcast %11 : vector<1x32xf32> to vector<17x32xf32>
    %151 = arith.mulf %149, %150 : vector<17x32xf32>
    %152 = vector.broadcast %12 : vector<1x32xf32> to vector<17x32xf32>
    %153 = arith.addf %151, %152 : vector<17x32xf32>
    %154 = arith.truncf %153 : vector<17x32xf32> to vector<17x32xbf16>
    %cst_44 = arith.constant dense<0.000000e+00> : vector<17x128xf32>
    %155 = tpu.matmul %154, %21, %cst_44 {dimension_numbers = #tpu.dot_dimension_numbers<[1], [0], [0], [1], [0, 0, 1, 1], [], []>} : vector<17x32xbf16>, vector<32x128xbf16>, vector<17x128xf32> -> vector<17x128xf32>
    %156 = vector.broadcast %15 : vector<1x128xf32> to vector<17x128xf32>
    %157 = arith.addf %155, %156 : vector<17x128xf32>
    %cst_45 = arith.constant 5.000000e-01 : f32
    %158 = vector.broadcast %cst_45 : f32 to vector<17x128xf32>
    %159 = arith.mulf %158, %157 : vector<17x128xf32>
    %cst_46 = arith.constant 0.707106769 : f32
    %160 = vector.broadcast %cst_46 : f32 to vector<17x128xf32>
    %161 = arith.mulf %157, %160 : vector<17x128xf32>
    %cst_47 = arith.constant 0.000000e+00 : f32
    %162 = vector.broadcast %cst_47 : f32 to vector<17x128xf32>
    %163 = arith.cmpf olt, %161, %162 : vector<17x128xf32>
    %cst_48 = arith.constant -1.000000e+00 : f32
    %cst_49 = arith.constant 1.000000e+00 : f32
    %164 = vector.broadcast %cst_48 : f32 to vector<17x128xf32>
    %165 = vector.broadcast %cst_49 : f32 to vector<17x128xf32>
    %166 = arith.select %163, %164, %165 : vector<17x128xi1>, vector<17x128xf32>
    %167 = math.absf %161 : vector<17x128xf32>
    %cst_50 = arith.constant 0.327591091 : f32
    %168 = vector.broadcast %cst_50 : f32 to vector<17x128xf32>
    %169 = arith.mulf %168, %167 : vector<17x128xf32>
    %cst_51 = arith.constant 1.000000e+00 : f32
    %170 = vector.broadcast %cst_51 : f32 to vector<17x128xf32>
    %171 = arith.addf %170, %169 : vector<17x128xf32>
    %cst_52 = arith.constant 1.000000e+00 : f32
    %172 = vector.broadcast %cst_52 : f32 to vector<17x128xf32>
    %173 = arith.divf %172, %171 : vector<17x128xf32>
    %cst_53 = arith.constant 1.06140542 : f32
    %174 = vector.broadcast %cst_53 : f32 to vector<17x128xf32>
    %175 = arith.mulf %174, %173 : vector<17x128xf32>
    %cst_54 = arith.constant -1.45315206 : f32
    %176 = vector.broadcast %cst_54 : f32 to vector<17x128xf32>
    %177 = arith.addf %175, %176 : vector<17x128xf32>
    %178 = arith.mulf %177, %173 : vector<17x128xf32>
    %cst_55 = arith.constant 1.42141378 : f32
    %179 = vector.broadcast %cst_55 : f32 to vector<17x128xf32>
    %180 = arith.addf %178, %179 : vector<17x128xf32>
    %181 = arith.mulf %180, %173 : vector<17x128xf32>
    %cst_56 = arith.constant -0.284496725 : f32
    %182 = vector.broadcast %cst_56 : f32 to vector<17x128xf32>
    %183 = arith.addf %181, %182 : vector<17x128xf32>
    %184 = arith.mulf %183, %173 : vector<17x128xf32>
    %cst_57 = arith.constant 0.254829586 : f32
    %185 = vector.broadcast %cst_57 : f32 to vector<17x128xf32>
    %186 = arith.addf %184, %185 : vector<17x128xf32>
    %187 = arith.mulf %186, %173 : vector<17x128xf32>
    %cst_58 = arith.constant 0.000000e+00 : f32
    %188 = vector.broadcast %cst_58 : f32 to vector<17x128xf32>
    %189 = arith.subf %188, %167 : vector<17x128xf32>
    %190 = arith.mulf %189, %167 : vector<17x128xf32>
    %191 = math.exp %190 : vector<17x128xf32>
    %192 = arith.mulf %187, %191 : vector<17x128xf32>
    %cst_59 = arith.constant 1.000000e+00 : f32
    %193 = vector.broadcast %cst_59 : f32 to vector<17x128xf32>
    %194 = arith.subf %193, %192 : vector<17x128xf32>
    %195 = arith.mulf %166, %194 : vector<17x128xf32>
    %cst_60 = arith.constant 1.000000e+00 : f32
    %196 = vector.broadcast %cst_60 : f32 to vector<17x128xf32>
    %197 = arith.addf %196, %195 : vector<17x128xf32>
    %198 = arith.mulf %159, %197 : vector<17x128xf32>
    %199 = arith.truncf %198 : vector<17x128xf32> to vector<17x128xbf16>
    %c0_61 = arith.constant 0 : index
    %c0_62 = arith.constant 0 : index
    %c0_63 = arith.constant 0 : index
    %200 = vector.load %arg5[%c0_61, %c0_62, %c0_63] : memref<2x128x32xbf16, #tpu.memory_space<vmem>>, vector<1x128x32xbf16>
    %201 = vector.shape_cast %200 : vector<1x128x32xbf16> to vector<128x32xbf16>
    %cst_64 = arith.constant dense<0.000000e+00> : vector<17x32xf32>
    %202 = tpu.matmul %199, %201, %cst_64 {dimension_numbers = #tpu.dot_dimension_numbers<[1], [0], [0], [1], [0, 0, 1, 1], [], []>} : vector<17x128xbf16>, vector<128x32xbf16>, vector<17x32xf32> -> vector<17x32xf32>
    %203 = vector.broadcast %16 : vector<1x32xf32> to vector<17x32xf32>
    %204 = arith.addf %202, %203 : vector<17x32xf32>
    %205 = arith.addf %131, %204 : vector<17x32xf32>
    %c1 = arith.constant 1 : index
    %c0_65 = arith.constant 0 : index
    %c0_66 = arith.constant 0 : index
    %206 = vector.load %arg6[%c1, %c0_65, %c0_66] : memref<2x8x128xf32, #tpu.memory_space<vmem>>, vector<1x8x128xf32>
    %207 = vector.shape_cast %206 : vector<1x8x128xf32> to vector<8x128xf32>
    %208 = vector.extract_strided_slice %207 {offsets = [0, 0], sizes = [1, 32], strides = [1, 1]} : vector<8x128xf32> to vector<1x32xf32>
    %209 = vector.extract_strided_slice %207 {offsets = [1, 0], sizes = [1, 32], strides = [1, 1]} : vector<8x128xf32> to vector<1x32xf32>
    %210 = vector.extract_strided_slice %207 {offsets = [2, 0], sizes = [1, 32], strides = [1, 1]} : vector<8x128xf32> to vector<1x32xf32>
    %211 = vector.extract_strided_slice %207 {offsets = [3, 0], sizes = [1, 32], strides = [1, 1]} : vector<8x128xf32> to vector<1x32xf32>
    %212 = vector.extract_strided_slice %207 {offsets = [4, 0], sizes = [1, 96], strides = [1, 1]} : vector<8x128xf32> to vector<1x96xf32>
    %213 = vector.extract_strided_slice %207 {offsets = [5, 0], sizes = [1, 32], strides = [1, 1]} : vector<8x128xf32> to vector<1x32xf32>
    %214 = vector.extract_strided_slice %207 {offsets = [6, 0], sizes = [1, 128], strides = [1, 1]} : vector<8x128xf32> to vector<1x128xf32>
    %215 = vector.extract_strided_slice %207 {offsets = [7, 0], sizes = [1, 32], strides = [1, 1]} : vector<8x128xf32> to vector<1x32xf32>
    %c1_67 = arith.constant 1 : index
    %c0_68 = arith.constant 0 : index
    %c0_69 = arith.constant 0 : index
    %216 = vector.load %arg4[%c1_67, %c0_68, %c0_69] : memref<2x32x384xbf16, #tpu.memory_space<vmem>>, vector<1x32x384xbf16>
    %217 = vector.shape_cast %216 : vector<1x32x384xbf16> to vector<32x384xbf16>
    %218 = vector.extract_strided_slice %217 {offsets = [0, 0], sizes = [32, 96], strides = [1, 1]} : vector<32x384xbf16> to vector<32x96xbf16>
    %219 = vector.extract_strided_slice %217 {offsets = [0, 128], sizes = [32, 32], strides = [1, 1]} : vector<32x384xbf16> to vector<32x32xbf16>
    %220 = vector.extract_strided_slice %217 {offsets = [0, 256], sizes = [32, 128], strides = [1, 1]} : vector<32x384xbf16> to vector<32x128xbf16>
    %cst_70 = arith.constant dense<0.000000e+00> : vector<17xf32>
    %221 = vector.multi_reduction <add>, %205, %cst_70 [1] : vector<17x32xf32> to vector<17xf32>
    %222 = vector.shape_cast %221 : vector<17xf32> to vector<17x1xf32>
    %cst_71 = arith.constant 3.200000e+01 : f32
    %223 = vector.broadcast %cst_71 : f32 to vector<17x1xf32>
    %224 = arith.divf %222, %223 : vector<17x1xf32>
    %225 = vector.broadcast %224 : vector<17x1xf32> to vector<17x32xf32>
    %226 = arith.subf %205, %225 : vector<17x32xf32>
    %227 = arith.mulf %226, %226 : vector<17x32xf32>
    %cst_72 = arith.constant dense<0.000000e+00> : vector<17xf32>
    %228 = vector.multi_reduction <add>, %227, %cst_72 [1] : vector<17x32xf32> to vector<17xf32>
    %229 = vector.shape_cast %228 : vector<17xf32> to vector<17x1xf32>
    %cst_73 = arith.constant 3.200000e+01 : f32
    %230 = vector.broadcast %cst_73 : f32 to vector<17x1xf32>
    %231 = arith.divf %229, %230 : vector<17x1xf32>
    %232 = vector.broadcast %224 : vector<17x1xf32> to vector<17x32xf32>
    %233 = arith.subf %205, %232 : vector<17x32xf32>
    %cst_74 = arith.constant 9.99999974E-6 : f32
    %234 = vector.broadcast %cst_74 : f32 to vector<17x1xf32>
    %235 = arith.addf %231, %234 : vector<17x1xf32>
    %236 = math.rsqrt %235 : vector<17x1xf32>
    %237 = vector.broadcast %236 : vector<17x1xf32> to vector<17x32xf32>
    %238 = arith.mulf %233, %237 : vector<17x32xf32>
    %239 = vector.broadcast %208 : vector<1x32xf32> to vector<17x32xf32>
    %240 = arith.mulf %238, %239 : vector<17x32xf32>
    %241 = vector.broadcast %209 : vector<1x32xf32> to vector<17x32xf32>
    %242 = arith.addf %240, %241 : vector<17x32xf32>
    %243 = arith.truncf %242 : vector<17x32xf32> to vector<17x32xbf16>
    %cst_75 = arith.constant dense<0.000000e+00> : vector<17x96xf32>
    %244 = tpu.matmul %243, %218, %cst_75 {dimension_numbers = #tpu.dot_dimension_numbers<[1], [0], [0], [1], [0, 0, 1, 1], [], []>} : vector<17x32xbf16>, vector<32x96xbf16>, vector<17x96xf32> -> vector<17x96xf32>
    %245 = vector.broadcast %212 : vector<1x96xf32> to vector<17x96xf32>
    %246 = arith.addf %244, %245 : vector<17x96xf32>
    %247 = vector.extract_strided_slice %246 {offsets = [0, 0], sizes = [17, 32], strides = [1, 1]} : vector<17x96xf32> to vector<17x32xf32>
    %248 = arith.truncf %247 : vector<17x32xf32> to vector<17x32xbf16>
    %249 = vector.extract_strided_slice %246 {offsets = [0, 32], sizes = [17, 32], strides = [1, 1]} : vector<17x96xf32> to vector<17x32xf32>
    %250 = arith.truncf %249 : vector<17x32xf32> to vector<17x32xbf16>
    %251 = vector.extract_strided_slice %246 {offsets = [0, 64], sizes = [17, 32], strides = [1, 1]} : vector<17x96xf32> to vector<17x32xf32>
    %252 = arith.truncf %251 : vector<17x32xf32> to vector<17x32xbf16>
    %253 = vector.extract_strided_slice %248 {offsets = [0, 0], sizes = [17, 8], strides = [1, 1]} : vector<17x32xbf16> to vector<17x8xbf16>
    %254 = vector.extract_strided_slice %250 {offsets = [0, 0], sizes = [17, 8], strides = [1, 1]} : vector<17x32xbf16> to vector<17x8xbf16>
    %255 = vector.extract_strided_slice %252 {offsets = [0, 0], sizes = [17, 8], strides = [1, 1]} : vector<17x32xbf16> to vector<17x8xbf16>
    %cst_76 = arith.constant dense<0.000000e+00> : vector<17x17xf32>
    %256 = tpu.matmul %253, %254, %cst_76 {dimension_numbers = #tpu.dot_dimension_numbers<[1], [1], [0], [0], [0, 0, 1, 0], [], []>} : vector<17x8xbf16>, vector<17x8xbf16>, vector<17x17xf32> -> vector<17x17xf32>
    %cst_77 = arith.constant 0.353553385 : f32
    %257 = vector.broadcast %cst_77 : f32 to vector<17x17xf32>
    %258 = arith.mulf %256, %257 : vector<17x17xf32>
    %cst_78 = arith.constant dense<0xFF800000> : vector<17xf32>
    %259 = vector.multi_reduction <maximumf>, %258, %cst_78 [1] : vector<17x17xf32> to vector<17xf32>
    %260 = vector.shape_cast %259 : vector<17xf32> to vector<17x1xf32>
    %261 = vector.broadcast %260 : vector<17x1xf32> to vector<17x17xf32>
    %262 = arith.subf %258, %261 : vector<17x17xf32>
    %263 = math.exp %262 : vector<17x17xf32>
    %cst_79 = arith.constant dense<0.000000e+00> : vector<17xf32>
    %264 = vector.multi_reduction <add>, %263, %cst_79 [1] : vector<17x17xf32> to vector<17xf32>
    %265 = vector.shape_cast %264 : vector<17xf32> to vector<17x1xf32>
    %266 = tpu.reciprocal %265 : vector<17x1xf32> -> vector<17x1xf32>
    %267 = vector.broadcast %266 : vector<17x1xf32> to vector<17x17xf32>
    %268 = arith.mulf %263, %267 : vector<17x17xf32>
    %269 = arith.truncf %268 : vector<17x17xf32> to vector<17x17xbf16>
    %cst_80 = arith.constant dense<0.000000e+00> : vector<17x8xf32>
    %270 = tpu.matmul %269, %255, %cst_80 {dimension_numbers = #tpu.dot_dimension_numbers<[1], [0], [0], [1], [0, 0, 1, 1], [], []>} : vector<17x17xbf16>, vector<17x8xbf16>, vector<17x8xf32> -> vector<17x8xf32>
    %271 = vector.extract_strided_slice %248 {offsets = [0, 8], sizes = [17, 8], strides = [1, 1]} : vector<17x32xbf16> to vector<17x8xbf16>
    %272 = vector.extract_strided_slice %250 {offsets = [0, 8], sizes = [17, 8], strides = [1, 1]} : vector<17x32xbf16> to vector<17x8xbf16>
    %273 = vector.extract_strided_slice %252 {offsets = [0, 8], sizes = [17, 8], strides = [1, 1]} : vector<17x32xbf16> to vector<17x8xbf16>
    %cst_81 = arith.constant dense<0.000000e+00> : vector<17x17xf32>
    %274 = tpu.matmul %271, %272, %cst_81 {dimension_numbers = #tpu.dot_dimension_numbers<[1], [1], [0], [0], [0, 0, 1, 0], [], []>} : vector<17x8xbf16>, vector<17x8xbf16>, vector<17x17xf32> -> vector<17x17xf32>
    %cst_82 = arith.constant 0.353553385 : f32
    %275 = vector.broadcast %cst_82 : f32 to vector<17x17xf32>
    %276 = arith.mulf %274, %275 : vector<17x17xf32>
    %cst_83 = arith.constant dense<0xFF800000> : vector<17xf32>
    %277 = vector.multi_reduction <maximumf>, %276, %cst_83 [1] : vector<17x17xf32> to vector<17xf32>
    %278 = vector.shape_cast %277 : vector<17xf32> to vector<17x1xf32>
    %279 = vector.broadcast %278 : vector<17x1xf32> to vector<17x17xf32>
    %280 = arith.subf %276, %279 : vector<17x17xf32>
    %281 = math.exp %280 : vector<17x17xf32>
    %cst_84 = arith.constant dense<0.000000e+00> : vector<17xf32>
    %282 = vector.multi_reduction <add>, %281, %cst_84 [1] : vector<17x17xf32> to vector<17xf32>
    %283 = vector.shape_cast %282 : vector<17xf32> to vector<17x1xf32>
    %284 = tpu.reciprocal %283 : vector<17x1xf32> -> vector<17x1xf32>
    %285 = vector.broadcast %284 : vector<17x1xf32> to vector<17x17xf32>
    %286 = arith.mulf %281, %285 : vector<17x17xf32>
    %287 = arith.truncf %286 : vector<17x17xf32> to vector<17x17xbf16>
    %cst_85 = arith.constant dense<0.000000e+00> : vector<17x8xf32>
    %288 = tpu.matmul %287, %273, %cst_85 {dimension_numbers = #tpu.dot_dimension_numbers<[1], [0], [0], [1], [0, 0, 1, 1], [], []>} : vector<17x17xbf16>, vector<17x8xbf16>, vector<17x8xf32> -> vector<17x8xf32>
    %289 = vector.extract_strided_slice %248 {offsets = [0, 16], sizes = [17, 8], strides = [1, 1]} : vector<17x32xbf16> to vector<17x8xbf16>
    %290 = vector.extract_strided_slice %250 {offsets = [0, 16], sizes = [17, 8], strides = [1, 1]} : vector<17x32xbf16> to vector<17x8xbf16>
    %291 = vector.extract_strided_slice %252 {offsets = [0, 16], sizes = [17, 8], strides = [1, 1]} : vector<17x32xbf16> to vector<17x8xbf16>
    %cst_86 = arith.constant dense<0.000000e+00> : vector<17x17xf32>
    %292 = tpu.matmul %289, %290, %cst_86 {dimension_numbers = #tpu.dot_dimension_numbers<[1], [1], [0], [0], [0, 0, 1, 0], [], []>} : vector<17x8xbf16>, vector<17x8xbf16>, vector<17x17xf32> -> vector<17x17xf32>
    %cst_87 = arith.constant 0.353553385 : f32
    %293 = vector.broadcast %cst_87 : f32 to vector<17x17xf32>
    %294 = arith.mulf %292, %293 : vector<17x17xf32>
    %cst_88 = arith.constant dense<0xFF800000> : vector<17xf32>
    %295 = vector.multi_reduction <maximumf>, %294, %cst_88 [1] : vector<17x17xf32> to vector<17xf32>
    %296 = vector.shape_cast %295 : vector<17xf32> to vector<17x1xf32>
    %297 = vector.broadcast %296 : vector<17x1xf32> to vector<17x17xf32>
    %298 = arith.subf %294, %297 : vector<17x17xf32>
    %299 = math.exp %298 : vector<17x17xf32>
    %cst_89 = arith.constant dense<0.000000e+00> : vector<17xf32>
    %300 = vector.multi_reduction <add>, %299, %cst_89 [1] : vector<17x17xf32> to vector<17xf32>
    %301 = vector.shape_cast %300 : vector<17xf32> to vector<17x1xf32>
    %302 = tpu.reciprocal %301 : vector<17x1xf32> -> vector<17x1xf32>
    %303 = vector.broadcast %302 : vector<17x1xf32> to vector<17x17xf32>
    %304 = arith.mulf %299, %303 : vector<17x17xf32>
    %305 = arith.truncf %304 : vector<17x17xf32> to vector<17x17xbf16>
    %cst_90 = arith.constant dense<0.000000e+00> : vector<17x8xf32>
    %306 = tpu.matmul %305, %291, %cst_90 {dimension_numbers = #tpu.dot_dimension_numbers<[1], [0], [0], [1], [0, 0, 1, 1], [], []>} : vector<17x17xbf16>, vector<17x8xbf16>, vector<17x8xf32> -> vector<17x8xf32>
    %307 = vector.extract_strided_slice %248 {offsets = [0, 24], sizes = [17, 8], strides = [1, 1]} : vector<17x32xbf16> to vector<17x8xbf16>
    %308 = vector.extract_strided_slice %250 {offsets = [0, 24], sizes = [17, 8], strides = [1, 1]} : vector<17x32xbf16> to vector<17x8xbf16>
    %309 = vector.extract_strided_slice %252 {offsets = [0, 24], sizes = [17, 8], strides = [1, 1]} : vector<17x32xbf16> to vector<17x8xbf16>
    %cst_91 = arith.constant dense<0.000000e+00> : vector<17x17xf32>
    %310 = tpu.matmul %307, %308, %cst_91 {dimension_numbers = #tpu.dot_dimension_numbers<[1], [1], [0], [0], [0, 0, 1, 0], [], []>} : vector<17x8xbf16>, vector<17x8xbf16>, vector<17x17xf32> -> vector<17x17xf32>
    %cst_92 = arith.constant 0.353553385 : f32
    %311 = vector.broadcast %cst_92 : f32 to vector<17x17xf32>
    %312 = arith.mulf %310, %311 : vector<17x17xf32>
    %cst_93 = arith.constant dense<0xFF800000> : vector<17xf32>
    %313 = vector.multi_reduction <maximumf>, %312, %cst_93 [1] : vector<17x17xf32> to vector<17xf32>
    %314 = vector.shape_cast %313 : vector<17xf32> to vector<17x1xf32>
    %315 = vector.broadcast %314 : vector<17x1xf32> to vector<17x17xf32>
    %316 = arith.subf %312, %315 : vector<17x17xf32>
    %317 = math.exp %316 : vector<17x17xf32>
    %cst_94 = arith.constant dense<0.000000e+00> : vector<17xf32>
    %318 = vector.multi_reduction <add>, %317, %cst_94 [1] : vector<17x17xf32> to vector<17xf32>
    %319 = vector.shape_cast %318 : vector<17xf32> to vector<17x1xf32>
    %320 = tpu.reciprocal %319 : vector<17x1xf32> -> vector<17x1xf32>
    %321 = vector.broadcast %320 : vector<17x1xf32> to vector<17x17xf32>
    %322 = arith.mulf %317, %321 : vector<17x17xf32>
    %323 = arith.truncf %322 : vector<17x17xf32> to vector<17x17xbf16>
    %cst_95 = arith.constant dense<0.000000e+00> : vector<17x8xf32>
    %324 = tpu.matmul %323, %309, %cst_95 {dimension_numbers = #tpu.dot_dimension_numbers<[1], [0], [0], [1], [0, 0, 1, 1], [], []>} : vector<17x17xbf16>, vector<17x8xbf16>, vector<17x8xf32> -> vector<17x8xf32>
    %325 = tpu.concatenate %270, %288, %306, %324 in 1 : vector<17x8xf32>, vector<17x8xf32>, vector<17x8xf32>, vector<17x8xf32> -> vector<17x32xf32>
    %326 = arith.truncf %325 : vector<17x32xf32> to vector<17x32xbf16>
    %cst_96 = arith.constant dense<0.000000e+00> : vector<17x32xf32>
    %327 = tpu.matmul %326, %219, %cst_96 {dimension_numbers = #tpu.dot_dimension_numbers<[1], [0], [0], [1], [0, 0, 1, 1], [], []>} : vector<17x32xbf16>, vector<32x32xbf16>, vector<17x32xf32> -> vector<17x32xf32>
    %328 = vector.broadcast %213 : vector<1x32xf32> to vector<17x32xf32>
    %329 = arith.addf %327, %328 : vector<17x32xf32>
    %330 = arith.addf %205, %329 : vector<17x32xf32>
    %cst_97 = arith.constant dense<0.000000e+00> : vector<17xf32>
    %331 = vector.multi_reduction <add>, %330, %cst_97 [1] : vector<17x32xf32> to vector<17xf32>
    %332 = vector.shape_cast %331 : vector<17xf32> to vector<17x1xf32>
    %cst_98 = arith.constant 3.200000e+01 : f32
    %333 = vector.broadcast %cst_98 : f32 to vector<17x1xf32>
    %334 = arith.divf %332, %333 : vector<17x1xf32>
    %335 = vector.broadcast %334 : vector<17x1xf32> to vector<17x32xf32>
    %336 = arith.subf %330, %335 : vector<17x32xf32>
    %337 = arith.mulf %336, %336 : vector<17x32xf32>
    %cst_99 = arith.constant dense<0.000000e+00> : vector<17xf32>
    %338 = vector.multi_reduction <add>, %337, %cst_99 [1] : vector<17x32xf32> to vector<17xf32>
    %339 = vector.shape_cast %338 : vector<17xf32> to vector<17x1xf32>
    %cst_100 = arith.constant 3.200000e+01 : f32
    %340 = vector.broadcast %cst_100 : f32 to vector<17x1xf32>
    %341 = arith.divf %339, %340 : vector<17x1xf32>
    %342 = vector.broadcast %334 : vector<17x1xf32> to vector<17x32xf32>
    %343 = arith.subf %330, %342 : vector<17x32xf32>
    %cst_101 = arith.constant 9.99999974E-6 : f32
    %344 = vector.broadcast %cst_101 : f32 to vector<17x1xf32>
    %345 = arith.addf %341, %344 : vector<17x1xf32>
    %346 = math.rsqrt %345 : vector<17x1xf32>
    %347 = vector.broadcast %346 : vector<17x1xf32> to vector<17x32xf32>
    %348 = arith.mulf %343, %347 : vector<17x32xf32>
    %349 = vector.broadcast %210 : vector<1x32xf32> to vector<17x32xf32>
    %350 = arith.mulf %348, %349 : vector<17x32xf32>
    %351 = vector.broadcast %211 : vector<1x32xf32> to vector<17x32xf32>
    %352 = arith.addf %350, %351 : vector<17x32xf32>
    %353 = arith.truncf %352 : vector<17x32xf32> to vector<17x32xbf16>
    %cst_102 = arith.constant dense<0.000000e+00> : vector<17x128xf32>
    %354 = tpu.matmul %353, %220, %cst_102 {dimension_numbers = #tpu.dot_dimension_numbers<[1], [0], [0], [1], [0, 0, 1, 1], [], []>} : vector<17x32xbf16>, vector<32x128xbf16>, vector<17x128xf32> -> vector<17x128xf32>
    %355 = vector.broadcast %214 : vector<1x128xf32> to vector<17x128xf32>
    %356 = arith.addf %354, %355 : vector<17x128xf32>
    %cst_103 = arith.constant 5.000000e-01 : f32
    %357 = vector.broadcast %cst_103 : f32 to vector<17x128xf32>
    %358 = arith.mulf %357, %356 : vector<17x128xf32>
    %cst_104 = arith.constant 0.707106769 : f32
    %359 = vector.broadcast %cst_104 : f32 to vector<17x128xf32>
    %360 = arith.mulf %356, %359 : vector<17x128xf32>
    %cst_105 = arith.constant 0.000000e+00 : f32
    %361 = vector.broadcast %cst_105 : f32 to vector<17x128xf32>
    %362 = arith.cmpf olt, %360, %361 : vector<17x128xf32>
    %cst_106 = arith.constant -1.000000e+00 : f32
    %cst_107 = arith.constant 1.000000e+00 : f32
    %363 = vector.broadcast %cst_106 : f32 to vector<17x128xf32>
    %364 = vector.broadcast %cst_107 : f32 to vector<17x128xf32>
    %365 = arith.select %362, %363, %364 : vector<17x128xi1>, vector<17x128xf32>
    %366 = math.absf %360 : vector<17x128xf32>
    %cst_108 = arith.constant 0.327591091 : f32
    %367 = vector.broadcast %cst_108 : f32 to vector<17x128xf32>
    %368 = arith.mulf %367, %366 : vector<17x128xf32>
    %cst_109 = arith.constant 1.000000e+00 : f32
    %369 = vector.broadcast %cst_109 : f32 to vector<17x128xf32>
    %370 = arith.addf %369, %368 : vector<17x128xf32>
    %cst_110 = arith.constant 1.000000e+00 : f32
    %371 = vector.broadcast %cst_110 : f32 to vector<17x128xf32>
    %372 = arith.divf %371, %370 : vector<17x128xf32>
    %cst_111 = arith.constant 1.06140542 : f32
    %373 = vector.broadcast %cst_111 : f32 to vector<17x128xf32>
    %374 = arith.mulf %373, %372 : vector<17x128xf32>
    %cst_112 = arith.constant -1.45315206 : f32
    %375 = vector.broadcast %cst_112 : f32 to vector<17x128xf32>
    %376 = arith.addf %374, %375 : vector<17x128xf32>
    %377 = arith.mulf %376, %372 : vector<17x128xf32>
    %cst_113 = arith.constant 1.42141378 : f32
    %378 = vector.broadcast %cst_113 : f32 to vector<17x128xf32>
    %379 = arith.addf %377, %378 : vector<17x128xf32>
    %380 = arith.mulf %379, %372 : vector<17x128xf32>
    %cst_114 = arith.constant -0.284496725 : f32
    %381 = vector.broadcast %cst_114 : f32 to vector<17x128xf32>
    %382 = arith.addf %380, %381 : vector<17x128xf32>
    %383 = arith.mulf %382, %372 : vector<17x128xf32>
    %cst_115 = arith.constant 0.254829586 : f32
    %384 = vector.broadcast %cst_115 : f32 to vector<17x128xf32>
    %385 = arith.addf %383, %384 : vector<17x128xf32>
    %386 = arith.mulf %385, %372 : vector<17x128xf32>
    %cst_116 = arith.constant 0.000000e+00 : f32
    %387 = vector.broadcast %cst_116 : f32 to vector<17x128xf32>
    %388 = arith.subf %387, %366 : vector<17x128xf32>
    %389 = arith.mulf %388, %366 : vector<17x128xf32>
    %390 = math.exp %389 : vector<17x128xf32>
    %391 = arith.mulf %386, %390 : vector<17x128xf32>
    %cst_117 = arith.constant 1.000000e+00 : f32
    %392 = vector.broadcast %cst_117 : f32 to vector<17x128xf32>
    %393 = arith.subf %392, %391 : vector<17x128xf32>
    %394 = arith.mulf %365, %393 : vector<17x128xf32>
    %cst_118 = arith.constant 1.000000e+00 : f32
    %395 = vector.broadcast %cst_118 : f32 to vector<17x128xf32>
    %396 = arith.addf %395, %394 : vector<17x128xf32>
    %397 = arith.mulf %358, %396 : vector<17x128xf32>
    %398 = arith.truncf %397 : vector<17x128xf32> to vector<17x128xbf16>
    %c1_119 = arith.constant 1 : index
    %c0_120 = arith.constant 0 : index
    %c0_121 = arith.constant 0 : index
    %399 = vector.load %arg5[%c1_119, %c0_120, %c0_121] : memref<2x128x32xbf16, #tpu.memory_space<vmem>>, vector<1x128x32xbf16>
    %400 = vector.shape_cast %399 : vector<1x128x32xbf16> to vector<128x32xbf16>
    %cst_122 = arith.constant dense<0.000000e+00> : vector<17x32xf32>
    %401 = tpu.matmul %398, %400, %cst_122 {dimension_numbers = #tpu.dot_dimension_numbers<[1], [0], [0], [1], [0, 0, 1, 1], [], []>} : vector<17x128xbf16>, vector<128x32xbf16>, vector<17x32xf32> -> vector<17x32xf32>
    %402 = vector.broadcast %215 : vector<1x32xf32> to vector<17x32xf32>
    %403 = arith.addf %401, %402 : vector<17x32xf32>
    %404 = arith.addf %330, %403 : vector<17x32xf32>
    %405 = vector.extract_strided_slice %404 {offsets = [0, 0], sizes = [1, 32], strides = [1, 1]} : vector<17x32xf32> to vector<1x32xf32>
    %406 = arith.truncf %405 : vector<1x32xf32> to vector<1x32xbf16>
    %c0_123 = arith.constant 0 : index
    %c0_124 = arith.constant 0 : index
    %407 = vector.load %arg7[%c0_123, %c0_124] : memref<32x128xbf16, #tpu.memory_space<vmem>>, vector<32x128xbf16>
    %cst_125 = arith.constant dense<0.000000e+00> : vector<1x128xf32>
    %408 = tpu.matmul %406, %407, %cst_125 {dimension_numbers = #tpu.dot_dimension_numbers<[1], [0], [0], [1], [0, 0, 1, 1], [], []>} : vector<1x32xbf16>, vector<32x128xbf16>, vector<1x128xf32> -> vector<1x128xf32>
    %c0_126 = arith.constant 0 : index
    %c0_127 = arith.constant 0 : index
    %409 = vector.load %arg8[%c0_126, %c0_127] : memref<1x128xf32, #tpu.memory_space<vmem>>, vector<1x128xf32>
    %410 = arith.addf %408, %409 : vector<1x128xf32>
    %c0_128 = arith.constant 0 : index
    %c0_129 = arith.constant 0 : index
    %c0_130 = arith.constant 0 : index
    %411 = vector.load %arg9[%c0_128, %c0_129, %c0_130] : memref<1x1x128xf32, #tpu.memory_space<vmem>>, vector<1x1x128xf32>
    %412 = vector.shape_cast %411 : vector<1x1x128xf32> to vector<1x128xf32>
    %413 = vector.shape_cast %410 : vector<1x128xf32> to vector<1x1x128xf32>
    tpu.vector_store %arg9[%c0_128, %c0_129, %c0_130], %413 {strides = array<i32>} : memref<1x1x128xf32, #tpu.memory_space<vmem>>, vector<1x1x128xf32>,
    return
  }
  func.func @transform_0(%arg0: i32) -> (i32, i32, i32) {
    %c0_i32 = arith.constant 0 : i32
    %c0_i32_0 = arith.constant 0 : i32
    %c0_i32_1 = arith.constant 0 : i32
    return %arg0, %c0_i32, %c0_i32_0 : i32, i32, i32
  }
  func.func @transform_1(%arg0: i32) -> (i32, i32) {
    %c0_i32 = arith.constant 0 : i32
    %c0_i32_0 = arith.constant 0 : i32
    %c0_i32_1 = arith.constant 0 : i32
    return %c0_i32, %c0_i32_0 : i32, i32
  }
  func.func @transform_2(%arg0: i32) -> (i32, i32) {
    %c0_i32 = arith.constant 0 : i32
    %c0_i32_0 = arith.constant 0 : i32
    %c0_i32_1 = arith.constant 0 : i32
    return %c0_i32, %c0_i32_0 : i32, i32
  }
  func.func @transform_3(%arg0: i32) -> (i32, i32, i32) {
    %c0_i32 = arith.constant 0 : i32
    %c0_i32_0 = arith.constant 0 : i32
    %c0_i32_1 = arith.constant 0 : i32
    %c0_i32_2 = arith.constant 0 : i32
    return %c0_i32, %c0_i32_0, %c0_i32_1 : i32, i32, i32
  }
  func.func @transform_4(%arg0: i32) -> (i32, i32, i32) {
    %c0_i32 = arith.constant 0 : i32
    %c0_i32_0 = arith.constant 0 : i32
    %c0_i32_1 = arith.constant 0 : i32
    %c0_i32_2 = arith.constant 0 : i32
    return %c0_i32, %c0_i32_0, %c0_i32_1 : i32, i32, i32
  }
  func.func @transform_5(%arg0: i32) -> (i32, i32, i32) {
    %c0_i32 = arith.constant 0 : i32
    %c0_i32_0 = arith.constant 0 : i32
    %c0_i32_1 = arith.constant 0 : i32
    %c0_i32_2 = arith.constant 0 : i32
    return %c0_i32, %c0_i32_0, %c0_i32_1 : i32, i32, i32
  }
  func.func @transform_6(%arg0: i32) -> (i32, i32) {
    %c0_i32 = arith.constant 0 : i32
    %c0_i32_0 = arith.constant 0 : i32
    %c0_i32_1 = arith.constant 0 : i32
    return %c0_i32, %c0_i32_0 : i32, i32
  }
  func.func @transform_7(%arg0: i32) -> (i32, i32) {
    %c0_i32 = arith.constant 0 : i32
    %c0_i32_0 = arith.constant 0 : i32
    %c0_i32_1 = arith.constant 0 : i32
    return %c0_i32, %c0_i32_0 : i32, i32
  }
  func.func @transform_8(%arg0: i32) -> (i32, i32, i32) {
    %c0_i32 = arith.constant 0 : i32
    %c0_i32_0 = arith.constant 0 : i32
    %c0_i32_1 = arith.constant 0 : i32
    return %arg0, %c0_i32, %c0_i32_0 : i32, i32, i32
  }
}

</mosaic_0001>

<bundles_post_ra>
// kernel: vit_forward.1
= control target key start
LH: loop header
LB: loop body
LE: loop exit
PB: predicated region body
PF: predicated region fallthrough
CT: control target
= control target key end

     0   :  { %13 = vsyncpa [#allocation3], 0  ;;  %s4656_s0 = inlined_call_operand.vmem [shape: f32[2,17,64], index: 0, kind: input, shape index: {}]   ;;  %s4657_s1 = inlined_call_operand.vmem [shape: f32[17,32], index: 1, kind: input, shape index: {}]   ;;  %s4658_s2 = inlined_call_operand.vmem [shape: bf16[64,32], index: 2, kind: input, shape index: {}]   ;;  %s4659_s3 = inlined_call_operand.vmem [shape: bf16[2,32,384], index: 3, kind: input, shape index: {}]   ;;  %s4660_s4 = inlined_call_operand.vmem [shape: bf16[2,128,32], index: 4, kind: input, shape index: {}]   ;;  %s4661_s5 = inlined_call_operand.vmem [shape: f32[2,8,128], index: 5, kind: input, shape index: {}]   ;;  %s4662_s6 = inlined_call_operand.vmem [shape: bf16[32,128], index: 6, kind: input, shape index: {}]   ;;  %s4663_s7 = inlined_call_operand.vmem [shape: f32[1,128], index: 7, kind: input, shape index: {}]   ;;  %s4664_s8 = inlined_call_operand.hbm [shape: f32[2,1,128], index: 8, kind: output, shape index: {}]  }
   0x1   :  { %15 = vsyncpa [#allocation3 + $0x1], 0  ;;  %s3920_s27 = smov 0   ;;  %s3922_s28 = smov 0  }
   0x2   :  { %s3924_s29 = smov 0   ;;  %s3926_s30 = smov 0  }
   0x3 LB: > { %s3941_s9 = sadd.s32 4294967295, %s3854_s30   ;;  %s3037_s10 = sadd.s32 4294967294, %s3854_s30   ;;  %s3854_s30 = sphi %s3926_s30, %s4697_s30   ;;  %s3850_s29 = sphi %s3924_s29, %s4696_s29   ;;  %s3846_s28 = sphi %s3922_s28, %s4695_s28   ;;  %s3842_s27 = sphi %s3920_s27, %s4694_s27  }
   0x4   : > { %s3945_s11 = sadd.s32 1, %s3854_s30   ;;  %s201_s12 = sadd.s32 1, %s3850_s29 }
   0x5   : > { %s198_s13 = ssub.s32 %s3854_s30, %s3945_s11  ;;  %p211_p0 = scmp.ne.s32.totalorder %s3850_s29, %s3846_s28 }
   0x6   : > { %p199_p1 = scmp.eq.s32.totalorder %s198_s13, 0  ;;  %p212_p2 = scmp.eq.s32.totalorder %s3941_s9, 1 }
   0x7   : > { %p217_p3 = scmp.ne.s32.totalorder %s3846_s28, %s3842_s27  ;;  %p218_p4 = scmp.eq.s32.totalorder %s3037_s10, 1 }
   0x8   : > { %s3956_s14 = scalar_select %p199_p1, %s3850_s29, %s201_s12  }
   0x9   : > { %p3958_p5 = por %p212_p2, %p211_p0  ;;  %p3962_p6 = por %p218_p4, %p217_p3 }
   0xa   : > { %p3040_p7 = scmp.ge.s32.totalorder %s3854_s30, 1  ;;  %p265_p8 = scmp.lt.s32.totalorder %s3854_s30, 3 }
   0xc   : > { %p266_p9 = pnand %p3040_p7, %p265_p8 }
   0xd   : > { %v3608_v0 = vld [vmem:[%s4658_s2] sm:$0xff] (!%p266_p9)   ;;  %p298_p10 = scmp.lt.s32.totalorder (!%p266_p9), %s3941_s9, 1  ;;  %v3609_v1 = vld [vmem:[%s4658_s2 + $0x8] sm:$0xff] (!%p266_p9)   ;;  %v3610_v2 = vld [vmem:[%s4658_s2 + $0x10] sm:$0xff] (!%p266_p9)   ;;  %vm344_vm0 = vcmask (!%p266_p9), 523264   ;;  %vm415_vm1 = vcmask (!%p266_p9), 253952   ;;  %v450_v46 = vlaneseq (!%p266_p9) }
   0xe   : > { %269 = sbr.rel (%p266_p9) target bundleno = 8452 (0x2104), region = 52  ;;  %3268 = vmatprep.subr.bf16.mxu1 (!%p266_p9), %v3608_v0  ;;  %v3611_v3 = vld [vmem:[%s4658_s2 + $0x18] sm:$0xff] (!%p266_p9)   ;;  %v319_v9 = vld [vmem:[%s4657_s1 + $0x10] sm:$0x1] (!%p266_p9)  ;;  %v317_v10 = vld [vmem:[%s4657_s1] sm:$0xff] (!%p266_p9)  ;;  %vm408_vm2 = vcmask (!%p266_p9), 261120  }
   0xf   : > { %3269 = vmatpush3.bf16.msra.mxu1 (!%p266_p9), %v3608_v0  ;;  %v318_v14 = vld [vmem:[%s4657_s1 + $0x8] sm:$0xff] (!%p266_p9)  ;;  %v3614_v38 = vld [vmem:[%s4659_s3 + $0x18] ss:$12 sps:$4 sm:$0xff] (!%p266_p9)   ;;  %v4018_v49 = vshrl.u32 (!%p266_p9), %v450_v46, 7  ;;  %s3856_s13 = smov (!%p266_p9), 96   ;;  %vm544_vm3 = vcmask (!%p266_p9), 64512  }
  0x10   : > { %3270 = vmatprep.subr.bf16.mxu1 (!%p266_p9), %v3609_v1  ;;  %v3612_v37 = vld [vmem:[%s4659_s3] ss:$12 sps:$4 sm:$0xff] (!%p266_p9)   ;;  %vm608_vm4 = vcmask (!%p266_p9), 138240   ;;  %vm615_vm5 = vcmask (!%p266_p9), 131072   ;;  %s3857_s17 = smov (!%p266_p9), 64   ;;  %s3858_s18 = smov (!%p266_p9), 120  }
  0x11   : > { %v452_v50 = vsub.s32 (!%p266_p9), 0, %v4018_v49  ;;  %v4024_v51 = vld [vmem:[%s4661_s5] sm:$0xff] (!%p266_p9)  ;;  %v459_v55 = vsub.s32 (!%p266_p9), 1, %v4018_v49  ;;  %s3859_s19 = smov (!%p266_p9), 88   ;;  %vm656_vm6 = vcmask (!%p266_p9), 1040384   ;;  %s3861_s20 = smov (!%p266_p9), 56  }
  0x12   : > { %s4679_s22 = smov (!%p266_p9), 112   ;;  %s4677_s23 = smov (!%p266_p9), 48   ;;  %vm1253_vm7 = vcmask (!%p266_p9), 130048   ;;  %vm1257_vm8 = vcmask (!%p266_p9), 195584   ;;  %vm3873_vm15 = vmmov (!%p266_p9), 0  }
  0x13   : > { %3271 = vmatpush3.bf16.msra.mxu1 (!%p266_p9), %v3609_v1  ;;  %v453_v54 = vrot.slane (!%p266_p9), %v4024_v51, %v452_v50  ;;  %v460_v61 = vrot.slane (!%p266_p9), %v4024_v51, %v459_v55  ;;  %s4671_s25 = smov (!%p266_p9), 104   ;;  %s4669_s26 = smov (!%p266_p9), 40  }
  0x14   : > { %3272 = vmatprep.subr.bf16.mxu1 (!%p266_p9), %v3610_v2  ;;  %s4665_s12 = smov (!%p266_p9), 16  }
  0x15   : > { %s299_s21 = scalar_select %p298_p10, %s3941_s9, 1 }
  0x17   : > { %s3520_s24 = smul.u32 24, %s299_s21  ;;  %3273 = vmatpush3.bf16.msra.mxu1 %v3610_v2  ;;  %s4681_s21 = smov 80  }
  0x18   : > { %3274 = vmatprep.subr.bf16.mxu1 %v3611_v3 }
  0x19   : > { %s302_s10 = scalar_lea.vmem %s4656_s0, %s3520_s24  ;;  %s4673_s24 = smov 72  }
  0x1a   : > { %v304_v4 = vld [vmem:[%s302_s10] sm:$0xff]  ;;  %v305_v5 = vld [vmem:[%s302_s10 + $0x8] sm:$0xff]  ;;  %v306_v7 = vld [vmem:[%s302_s10 + $0x10] sm:$0x1]  ;;  %s4667_s10 = smov 8  }
  0x1b   : > { %v307_v6 = vpack.c.bf16 %v305_v5, %v304_v4  ;;  %v308_v8 = vpack.c.bf16 %v306_v7, %v306_v7  ;;  %3275 = vmatpush3.bf16.msra.mxu1 %v3611_v3  ;;  %v468_v5 = vsub.s32 4, %v4018_v49 }
  0x1c   : > { %3280 = vmatprep.subr.bf16.mxu1 %v3612_v37 }
  0x1d   : > { %3276 = vmatprep.mubr.msk.bf16.mxu1 %vm344_vm0, %v307_v6  ;;  %v469_v6 = vrot.slane %v4024_v51, %v468_v5 }
  0x1e   : > { %3277 = vmatmul.mubr.msk.bf16.vlgmr.msra.gmra.mrb[0].mxu1 %vm344_vm0, %v308_v8 }
  0x1f   : > { %3281 = vmatpush3.bf16.msra.mxu1 %v3612_v37 }
  0x20   : > { %3282 = vmatprep.subr.bf16.mxu1 %v3614_v38 }
  0x23   : > { %3283 = vmatpush3.bf16.msra.mxu1 %v3614_v38 }
  0xf1   : > { %v3278_v11 = vpop.f32.mrb[0].mxu1 }
  0xf2   : > { %v3991_v12 = vadd.f32 %v3278_v11, %v319_v9  ;;  %v385_v13 = vpop.f32.mrb[1].mxu1 }
  0xf3   : > { %v3996_v15 = vadd.f32 %v385_v13, %v317_v10  ;;  %v3279_v16 = vpop.f32.mrb[2].mxu1 }
  0xf4   : > { %v388_v17 = vpop.f32.mrb[3].mxu1  ;;  %v416_v18 = vsel %vm415_vm1, %v3991_v12, 0.0 }
  0xf5   : > { %v4000_v19 = vadd.f32 %v388_v17, %v318_v14  ;;  %417 = vadd.xlane.f32.xlu1 %v416_v18  ;;  %v409_v20 = vsel %vm408_vm2, %v3996_v15, 0.0 }
  0xf6   : > { %410 = vadd.xlane.f32.xlu0 %v409_v20 }
  0xf7   : > { %v412_v21 = vsel %vm408_vm2, %v4000_v19, 0.0 }
  0xfa   : > { %413 = vadd.xlane.f32.xlu0 %v412_v21 }
 0x182   : > { %v418_v22 = vpop.xlane.xlu1 %417 }
 0x183   : > { %v422_v23 = vmul.f32 0.03125, %v418_v22  ;;  %v411_v24 = vpop.xlane.xlu0 %410 }
 0x184   : > { %v420_v25 = vmul.f32 0.03125, %v411_v24 }
 0x185   : > { %v425_v26 = vsub.f32 %v3991_v12, %v422_v23 }
 0x186   : > { %v423_v27 = vsub.f32 %v3996_v15, %v420_v25 }
 0x187   : > { %v414_v28 = vpop.xlane.xlu0 %413  ;;  %v428_v33 = vmul.f32 %v425_v26, %v425_v26 }
 0x188   : > { %v421_v29 = vmul.f32 0.03125, %v414_v28  ;;  %v426_v30 = vmul.f32 %v423_v27, %v423_v27 }
 0x189   : > { %v435_v35 = vsel %vm415_vm1, %v428_v33, 0.0 }
 0x18a   : > { %v424_v31 = vsub.f32 %v4000_v19, %v421_v29  ;;  %v429_v32 = vsel %vm408_vm2, %v426_v30, 0.0 }
 0x18b   : > { %430 = vadd.xlane.f32.xlu1 %v429_v32 }
 0x18c   : > { %v427_v34 = vmul.f32 %v424_v31, %v424_v31 }
 0x18e   : > { %v432_v36 = vsel %vm408_vm2, %v427_v34, 0.0 }
 0x18f   : > { %436 = vadd.xlane.f32.xlu1 %v435_v35  ;;  %433 = vadd.xlane.f32.xlu0 %v432_v36 }
 0x218   : > { %v431_v39 = vpop.xlane.xlu1 %430 }
 0x219   : > { %v438_v40 = vmul.f32 0.03125, %v431_v39 }
 0x21b   : > { %v441_v41 = vadd.f32 1e-05, %v438_v40 }
 0x21c   : > { %v437_v42 = vpop.xlane.xlu1 %436  ;;  %v434_v43 = vpop.xlane.xlu0 %433 }
 0x21d   : > { %3646 = vrsqrt.f32 %v441_v41  ;;  %v440_v44 = vmul.f32 0.03125, %v437_v42  ;;  %v439_v45 = vmul.f32 0.03125, %v434_v43 }
 0x21f   : > { %v443_v47 = vadd.f32 1e-05, %v440_v44  ;;  %v442_v48 = vadd.f32 1e-05, %v439_v45 }
 0x221   : > { %3648 = vrsqrt.f32 %v443_v47 }
 0x222   : > { %3650 = vrsqrt.f32 %v442_v48 }
 0x227   : > { %v3647_v52 = vpop.eup %3646 }
 0x228   : > { %v447_v53 = vmul.f32 %v3647_v52, %v423_v27 }
 0x22a   : > { %v454_v60 = vmul.f32 %v453_v54, %v447_v53 }
 0x22b   : > { %v3649_v56 = vpop.eup %3648 }
 0x22c   : > { %v3651_v57 = vpop.eup %3650  ;;  %v449_v58 = vmul.f32 %v3649_v56, %v425_v26  ;;  %v461_v1 = vadd.f32 %v460_v61, %v454_v60  ;;  %v3860_v56 = vmov 0  }
 0x22d   : > { %v448_v59 = vmul.f32 %v3651_v57, %v424_v31  ;;  %v4073_v57 = vsel %vm656_vm6, 65535, %v3860_v56 }
 0x22e   : > { %v456_v62 = vmul.f32 %v453_v54, %v449_v58 }
 0x22f   : > { %v455_v63 = vmul.f32 %v453_v54, %v448_v59 }
 0x230   : > { %v463_v0 = vadd.f32 %v460_v61, %v456_v62 }
 0x231   : > { %v462_v2 = vadd.f32 %v460_v61, %v455_v63 }
 0x232   : > { %v465_v3 = vpack.c.bf16 %v463_v0, %v463_v0 }
 0x233   : > { %v464_v4 = vpack.c.bf16 %v462_v2, %v461_v1 }
 0x235   : > { %3284 = vmatprep.mubr.msk.bf16.mxu1 %vm408_vm2, %v464_v4 }
 0x236   : > { %3285 = vmatmul.mubr.msk.bf16.vlgmr.msra.gmra.mrb[4].mxu1 %vm408_vm2, %v465_v3 }
 0x309   : > { %v3286_v7 = vpop.f32.mrb[4].mxu1 }
 0x30a   : > { %v531_v8 = vadd.f32 %v3286_v7, %v469_v6  ;;  %v522_v9 = vpop.f32.mrb[5].mxu1 }
 0x30b   : > { %v3287_v10 = vpop.f32.mrb[6].mxu1  ;;  %v523_v14 = vadd.f32 %v522_v9, %v469_v6 }
 0x30c   : > { %v4039_v11 = vpack.c.bf16 %v531_v8, %v531_v8  ;;  %v525_v13 = vpop.f32.mrb[7].mxu1 }
 0x30d   : > { %v526_v16 = vadd.f32 %v525_v13, %v469_v6 }
 0x30e   : > { %542 = vrot.lane.b32.xlu1 %v4039_v11, %s3856_s13 }
 0x30f   : > { %v4043_v17 = vpack.c.bf16 %v526_v16, %v523_v14 }
 0x311   : > { %540 = vrot.lane.b32.xlu0 %v4043_v17, %s3856_s13  ;;  %3292 = vmatprep.mubr.msk.bf16.mxu1 %vm544_vm3, %v4043_v17 }
 0x380   : > { %v543_v21 = vpop.permute.xlu1 %542 }
 0x381   : > { %v555_v22 = vsel %vm544_vm3, %v543_v21, 0 }
 0x383   : > { %v541_v18 = vpop.permute.xlu0 %540 }
 0x384   : > { %3504 = vmatprep.subr.msk.bf16.mxu1 %vm544_vm3, %v541_v18  ;;  %v552_v20 = vsel %vm544_vm3, %v541_v18, 0 }
 0x385   : > { %3289 = vmatpush3.bf16.xpose.msra.mxu1 %v552_v20 }
 0x386   : > { %3505 = vmatprep.subr.msk.bf16.mxu1 %vm544_vm3, %v543_v21 }
 0x38d   : > { %3291 = vmatpush3.bf16.xpose.msra.mxu1 %v555_v22 }
 0x394   : > { %3293 = vmatmul.mubr.msk.bf16.vlgmr.msra.gmra.mrb[8].mxu1 %vm544_vm3, %v4039_v11 }
 0x467   : > { %v3294_v23 = vpop.f32.mrb[8].mxu1 }
 0x468   : > { %v591_v24 = vpop.f32.mrb[9].mxu1  ;;  %v607_v30 = vmul.f32 0.35355338, %v3294_v23 }
 0x469   : > { %v605_v25 = vmul.f32 0.35355338, %v591_v24  ;;  %v3295_v26 = vpop.f32.mrb[10].mxu1 }
 0x46a   : > { %v594_v27 = vpop.f32.mrb[11].mxu1  ;;  %v616_v32 = vsel %vm615_vm5, %v607_v30, -inf }
 0x46b   : > { %v606_v28 = vmul.f32 0.35355338, %v594_v27  ;;  %v609_v29 = vsel %vm608_vm4, %v605_v25, -inf }
 0x46c   : > { %610 = vmax.xlane.f32.xlu1 %v609_v29 }
 0x46d   : > { %v612_v31 = vsel %vm608_vm4, %v606_v28, -inf }
 0x46e   : > { %613 = vmax.xlane.f32.xlu0 %v612_v31 }
 0x472   : > { %617 = vmax.xlane.f32.xlu0 %v616_v32 }
 0x4f9   : > { %v611_v33 = vpop.xlane.xlu1 %610 }
 0x4fa   : > { %v619_v36 = vsub.f32 %v605_v25, %v611_v33 }
 0x4fb   : > { %v614_v34 = vpop.xlane.xlu0 %613 }
 0x4fc   : > { %v620_v35 = vsub.f32 %v606_v28, %v614_v34  ;;  %v622_v40 = vmul.f32 1.442695, %v619_v36 }
 0x4fe   : > { %v624_v37 = vmul.f32 1.442695, %v620_v35 }
 0x4ff   : > { %v618_v38 = vpop.xlane.xlu0 %617 }
 0x500   : > { %3652 = vpow2.f32 %v624_v37  ;;  %v621_v39 = vsub.f32 %v607_v30, %v618_v38 }
 0x502   : > { %v626_v41 = vmul.f32 1.442695, %v621_v39 }
 0x504   : > { %3654 = vpow2.f32 %v626_v41 }
 0x505   : > { %3656 = vpow2.f32 %v622_v40 }
 0x50a   : > { %v3653_v42 = vpop.eup %3652 }
 0x50b   : > { %v631_v43 = vsel %vm608_vm4, %v3653_v42, 0.0 }
 0x50c   : > { %632 = vadd.xlane.f32.xlu0 %v631_v43 }
 0x50e   : > { %v3655_v44 = vpop.eup %3654 }
 0x50f   : > { %v634_v45 = vsel %vm615_vm5, %v3655_v44, 0.0  ;;  %v3657_v46 = vpop.eup %3656 }
 0x510   : > { %635 = vadd.xlane.f32.xlu1 %v634_v45  ;;  %v628_v47 = vsel %vm608_vm4, %v3657_v46, 0.0 }
 0x514   : > { %629 = vadd.xlane.f32.xlu1 %v628_v47 }
 0x522   : > { %645 = vrot.lane.b32.xlu0 %v4043_v17, %s3857_s17 }
 0x525   : > { %647 = vrot.lane.b32.xlu1 %v4039_v11, %s3857_s17 }
 0x526   : > { %710 = vrot.lane.b32.xlu0 %v4043_v17, %s3858_s18 }
 0x529   : > { %714 = vrot.lane.b32.xlu1 %v4043_v17, %s3859_s19 }
 0x52d   : > { %716 = vrot.lane.b32.xlu1 %v4039_v11, %s3859_s19 }
 0x531   : > { %712 = vrot.lane.b32.xlu1 %v4039_v11, %s3858_s18 }
 0x599   : > { %v633_v48 = vpop.xlane.xlu0 %632 }
 0x59d   : > { %v636_v52 = vpop.xlane.xlu1 %635  ;;  %v646_v53 = vpop.permute.xlu0 %645 }
 0x59e   : > { %3296 = vmatprep.subr.bf16.mxu0 %v646_v53  ;;  %3658 = vrcp.f32 %v636_v52 }
 0x59f   : > { %3297 = vmatpush3.bf16.msra.mxu0 %v646_v53  ;;  %3660 = vrcp.f32 %v633_v48 }
 0x5a1   : > { %v630_v54 = vpop.xlane.xlu1 %629  ;;  %v711_v6 = vpop.permute.xlu0 %710 }
 0x5a2   : > { %3662 = vrcp.f32 %v630_v54 }
 0x5a5   : > { %v648_v58 = vpop.permute.xlu1 %647 }
 0x5a6   : > { %v660_v59 = vand.u32 %v4073_v57, %v648_v58 }
 0x5a8   : > { %3298 = vmatprep.subr.bf16.mxu0 %v660_v59  ;;  %v3659_v60 = vpop.eup %3658 }
 0x5a9   : > { %v715_v61 = vpop.permute.xlu1 %714  ;;  %3299 = vmatpush3.bf16.msra.mxu0 %v660_v59  ;;  %v3661_v62 = vpop.eup %3660  ;;  %v642_v0 = vmul.f32 %v3659_v60, %v3655_v44 }
 0x5aa   : > { %3506 = vmatprep.subr.msk.bf16.mxu0 %vm544_vm3, %v715_v61  ;;  %v641_v2 = vmul.f32 %v3661_v62, %v3653_v42  ;;  %v725_v7 = vsel %vm544_vm3, %v715_v61, 0 }
 0x5ab   : > { %v644_v4 = vpack.c.bf16 %v642_v0, %v642_v0 }
 0x5ac   : > { %v3663_v63 = vpop.eup %3662 }
 0x5ad   : > { %v640_v1 = vmul.f32 %v3663_v63, %v3657_v46  ;;  %v717_v8 = vpop.permute.xlu1 %716 }
 0x5ae   : > { %v728_v9 = vsel %vm544_vm3, %v717_v8, 0 }
 0x5af   : > { %v643_v3 = vpack.c.bf16 %v641_v2, %v640_v1 }
 0x5b1   : > { %3300 = vmatprep.mubr.msk.bf16.mxu0 %vm608_vm4, %v643_v3  ;;  %v713_v10 = vpop.permute.xlu1 %712 }
 0x5b2   : > { %3301 = vmatmul.mubr.msk.bf16.vlgmr.msra.gmra.mrb[0].mxu0 %vm608_vm4, %v644_v4 }
 0x5b3   : > { %3305 = vmatpush3.bf16.xpose.msra.mxu0 %v725_v7  ;;  %3308 = vmatprep.mubr.msk.bf16.mxu0 %vm544_vm3, %v711_v6 }
 0x5b4   : > { %3507 = vmatprep.subr.msk.bf16.mxu0 %vm544_vm3, %v717_v8 }
 0x5bb   : > { %3307 = vmatpush3.bf16.xpose.msra.mxu0 %v728_v9 }
 0x5c2   : > { %3309 = vmatmul.mubr.msk.bf16.vlgmr.msra.gmra.mrb[4].mxu0 %vm544_vm3, %v713_v10 }
 0x685   : > { %v4084_v13 = vpop.f32.mrb[0].mxu0 }
 0x686   : > { %v4086_v14 = vpop.f32.mrb[1].mxu0 }
 0x687   : > { %v3303_v16 = vpop.f32.mrb[2].mxu0 }
 0x688   : > { %v4088_v18 = vpop.f32.mrb[3].mxu0 }
 0x695   : > { %v3310_v20 = vpop.f32.mrb[4].mxu0 }
 0x696   : > { %v764_v21 = vpop.f32.mrb[5].mxu0  ;;  %v780_v25 = vmul.f32 0.35355338, %v3310_v20 }
 0x697   : > { %v778_v22 = vmul.f32 0.35355338, %v764_v21  ;;  %v3311_v23 = vpop.f32.mrb[6].mxu0 }
 0x698   : > { %v767_v24 = vpop.f32.mrb[7].mxu0  ;;  %v787_v29 = vsel %vm615_vm5, %v780_v25, -inf }
 0x699   : > { %v779_v26 = vmul.f32 0.35355338, %v767_v24  ;;  %v781_v27 = vsel %vm608_vm4, %v778_v22, -inf }
 0x69a   : > { %782 = vmax.xlane.f32.xlu0 %v781_v27 }
 0x69b   : > { %v784_v28 = vsel %vm608_vm4, %v779_v26, -inf }
 0x69c   : > { %785 = vmax.xlane.f32.xlu1 %v784_v28 }
 0x69e   : > { %788 = vmax.xlane.f32.xlu0 %v787_v29 }
 0x727   : > { %v783_v30 = vpop.xlane.xlu0 %782 }
 0x728   : > { %v790_v31 = vsub.f32 %v778_v22, %v783_v30 }
 0x729   : > { %v786_v32 = vpop.xlane.xlu1 %785 }
 0x72a   : > { %v793_v33 = vmul.f32 1.442695, %v790_v31  ;;  %v791_v34 = vsub.f32 %v779_v26, %v786_v32 }
 0x72b   : > { %v789_v35 = vpop.xlane.xlu0 %788 }
 0x72c   : > { %3664 = vpow2.f32 %v793_v33  ;;  %v795_v36 = vmul.f32 1.442695, %v791_v34  ;;  %v792_v37 = vsub.f32 %v780_v25, %v789_v35 }
 0x72e   : > { %3666 = vpow2.f32 %v795_v36  ;;  %v797_v38 = vmul.f32 1.442695, %v792_v37 }
 0x730   : > { %3668 = vpow2.f32 %v797_v38 }
 0x736   : > { %v3665_v39 = vpop.eup %3664 }
 0x737   : > { %v799_v40 = vsel %vm608_vm4, %v3665_v39, 0.0 }
 0x738   : > { %v3667_v41 = vpop.eup %3666  ;;  %800 = vadd.xlane.f32.xlu0 %v799_v40 }
 0x739   : > { %v802_v44 = vsel %vm608_vm4, %v3667_v41, 0.0 }
 0x73a   : > { %v3669_v42 = vpop.eup %3668 }
 0x73b   : > { %v805_v43 = vsel %vm615_vm5, %v3669_v42, 0.0 }
 0x73c   : > { %806 = vadd.xlane.f32.xlu1 %v805_v43  ;;  %803 = vadd.xlane.f32.xlu0 %v802_v44 }
 0x74d   : > { %818 = vrot.lane.b32.xlu1 %v4039_v11, %s3861_s20 }
 0x751   : > { %882 = vrot.lane.b32.xlu1 %v4043_v17, %s4681_s21 }
 0x752   : > { %816 = vrot.lane.b32.xlu0 %v4043_v17, %s3861_s20 }
 0x755   : > { %884 = vrot.lane.b32.xlu1 %v4039_v11, %s4681_s21 }
 0x756   : > { %878 = vrot.lane.b32.xlu0 %v4043_v17, %s4679_s22 }
 0x759   : > { %880 = vrot.lane.b32.xlu1 %v4039_v11, %s4679_s22  ;;  %s4693_s22 = smov 24  }
 0x7c5   : > { %v801_v45 = vpop.xlane.xlu0 %800 }
 0x7c6   : > { %3670 = vrcp.f32 %v801_v45 }
 0x7c9   : > { %v804_v46 = vpop.xlane.xlu0 %803  ;;  %v807_v47 = vpop.xlane.xlu1 %806 }
 0x7ca   : > { %3672 = vrcp.f32 %v804_v46 }
 0x7cb   : > { %3674 = vrcp.f32 %v807_v47 }
 0x7cd   : > { %v817_v48 = vpop.permute.xlu0 %816  ;;  %v819_v52 = vpop.permute.xlu1 %818 }
 0x7ce   : > { %v828_v53 = vand.u32 %v819_v52, %v4073_v57  ;;  %3312 = vmatprep.subr.bf16.mxu1 %v817_v48 }
 0x7cf   : > { %3313 = vmatpush3.bf16.msra.mxu1 %v817_v48 }
 0x7d0   : > { %3314 = vmatprep.subr.bf16.mxu1 %v828_v53  ;;  %v3671_v54 = vpop.eup %3670 }
 0x7d1   : > { %v883_v56 = vpop.permute.xlu1 %882  ;;  %v811_v60 = vmul.f32 %v3671_v54, %v3665_v39  ;;  %v879_v1 = vpop.permute.xlu0 %878 }
 0x7d2   : > { %v893_v2 = vsel %vm544_vm3, %v883_v56, 0 }
 0x7d3   : > { %3315 = vmatpush3.bf16.msra.mxu1 %v828_v53 }
 0x7d4   : > { %v3673_v58 = vpop.eup %3672  ;;  %3508 = vmatprep.subr.msk.bf16.mxu1 %vm544_vm3, %v883_v56 }
 0x7d5   : > { %v3675_v59 = vpop.eup %3674  ;;  %v812_v61 = vmul.f32 %v3673_v58, %v3667_v41  ;;  %v885_v3 = vpop.permute.xlu1 %884 }
 0x7d6   : > { %v813_v62 = vmul.f32 %v3675_v59, %v3669_v42  ;;  %v896_v4 = vsel %vm544_vm3, %v885_v3, 0 }
 0x7d7   : > { %v814_v63 = vpack.c.bf16 %v812_v61, %v811_v60 }
 0x7d8   : > { %v815_v0 = vpack.c.bf16 %v813_v62, %v813_v62 }
 0x7d9   : > { %3316 = vmatprep.mubr.msk.bf16.mxu1 %vm608_vm4, %v814_v63  ;;  %v881_v6 = vpop.permute.xlu1 %880 }
 0x7da   : > { %3317 = vmatmul.mubr.msk.bf16.vlgmr.msra.gmra.mrb[12].mxu1 %vm608_vm4, %v815_v0 }
 0x7db   : > { %3324 = vmatprep.mubr.msk.bf16.mxu1 %vm544_vm3, %v879_v1 }
 0x7dc   : > { %3321 = vmatpush3.bf16.xpose.msra.mxu1 %v893_v2 }
 0x7dd   : > { %3509 = vmatprep.subr.msk.bf16.mxu1 %vm544_vm3, %v885_v3 }
 0x7e4   : > { %3323 = vmatpush3.bf16.xpose.msra.mxu1 %v896_v4 }
 0x7eb   : > { %3325 = vmatmul.mubr.msk.bf16.vlgmr.msra.gmra.mrb[16].mxu1 %vm544_vm3, %v881_v6 }
 0x8ad   : > { %v4117_v7 = vpop.f32.mrb[12].mxu1 }
 0x8ae   : > { %v4119_v8 = vpop.f32.mrb[13].mxu1 }
 0x8af   : > { %v3319_v9 = vpop.f32.mrb[14].mxu1 }
 0x8b0   : > { %v4121_v10 = vpop.f32.mrb[15].mxu1 }
 0x8b1   : > { %v3578_v16 = vpack.i.bf16 %v4121_v10, %v4119_v8 }
 0x8be   : > { %v3326_v20 = vpop.f32.mrb[16].mxu1 }
 0x8bf   : > { %v932_v21 = vpop.f32.mrb[17].mxu1  ;;  %v948_v25 = vmul.f32 0.35355338, %v3326_v20 }
 0x8c0   : > { %v946_v22 = vmul.f32 0.35355338, %v932_v21  ;;  %v3327_v23 = vpop.f32.mrb[18].mxu1 }
 0x8c1   : > { %v935_v24 = vpop.f32.mrb[19].mxu1  ;;  %v955_v29 = vsel %vm615_vm5, %v948_v25, -inf }
 0x8c2   : > { %v947_v26 = vmul.f32 0.35355338, %v935_v24  ;;  %v949_v27 = vsel %vm608_vm4, %v946_v22, -inf }
 0x8c3   : > { %950 = vmax.xlane.f32.xlu0 %v949_v27 }
 0x8c4   : > { %v952_v28 = vsel %vm608_vm4, %v947_v26, -inf }
 0x8c5   : > { %953 = vmax.xlane.f32.xlu1 %v952_v28 }
 0x8c7   : > { %956 = vmax.xlane.f32.xlu0 %v955_v29 }
 0x950   : > { %v951_v30 = vpop.xlane.xlu0 %950 }
 0x951   : > { %v958_v31 = vsub.f32 %v946_v22, %v951_v30 }
 0x952   : > { %v954_v32 = vpop.xlane.xlu1 %953 }
 0x953   : > { %v961_v33 = vmul.f32 1.442695, %v958_v31  ;;  %v959_v34 = vsub.f32 %v947_v26, %v954_v32 }
 0x954   : > { %v957_v35 = vpop.xlane.xlu0 %956 }
 0x955   : > { %3676 = vpow2.f32 %v961_v33  ;;  %v963_v36 = vmul.f32 1.442695, %v959_v34  ;;  %v960_v37 = vsub.f32 %v948_v25, %v957_v35 }
 0x957   : > { %3678 = vpow2.f32 %v963_v36  ;;  %v965_v38 = vmul.f32 1.442695, %v960_v37 }
 0x959   : > { %3680 = vpow2.f32 %v965_v38 }
 0x95f   : > { %v3677_v39 = vpop.eup %3676 }
 0x960   : > { %v967_v40 = vsel %vm608_vm4, %v3677_v39, 0.0 }
 0x961   : > { %v3679_v41 = vpop.eup %3678  ;;  %968 = vadd.xlane.f32.xlu0 %v967_v40 }
 0x962   : > { %v970_v44 = vsel %vm608_vm4, %v3679_v41, 0.0 }
 0x963   : > { %v3681_v42 = vpop.eup %3680 }
 0x964   : > { %v973_v43 = vsel %vm615_vm5, %v3681_v42, 0.0 }
 0x965   : > { %974 = vadd.xlane.f32.xlu1 %v973_v43  ;;  %971 = vadd.xlane.f32.xlu0 %v970_v44 }
 0x976   : > { %986 = vrot.lane.b32.xlu1 %v4039_v11, %s4677_s23 }
 0x97a   : > { %1050 = vrot.lane.b32.xlu1 %v4043_v17, %s4673_s24 }
 0x97b   : > { %984 = vrot.lane.b32.xlu0 %v4043_v17, %s4677_s23 }
 0x97e   : > { %1052 = vrot.lane.b32.xlu1 %v4039_v11, %s4673_s24  ;;  %s4675_s24 = smov 24  }
 0x97f   : > { %1046 = vrot.lane.b32.xlu0 %v4043_v17, %s4671_s25 }
 0x982   : > { %1048 = vrot.lane.b32.xlu1 %v4039_v11, %s4671_s25  ;;  %s4690_s25 = smov 40  }
 0x9ee   : > { %v969_v45 = vpop.xlane.xlu0 %968 }
 0x9ef   : > { %3682 = vrcp.f32 %v969_v45 }
 0x9f2   : > { %v972_v46 = vpop.xlane.xlu0 %971  ;;  %v975_v47 = vpop.xlane.xlu1 %974 }
 0x9f3   : > { %3684 = vrcp.f32 %v972_v46 }
 0x9f4   : > { %3686 = vrcp.f32 %v975_v47 }
 0x9f6   : > { %v985_v48 = vpop.permute.xlu0 %984  ;;  %v987_v52 = vpop.permute.xlu1 %986 }
 0x9f7   : > { %v996_v53 = vand.u32 %v987_v52, %v4073_v57  ;;  %3328 = vmatprep.subr.bf16.mxu0 %v985_v48 }
 0x9f8   : > { %3329 = vmatpush3.bf16.msra.mxu0 %v985_v48 }
 0x9f9   : > { %3330 = vmatprep.subr.bf16.mxu0 %v996_v53  ;;  %v3683_v54 = vpop.eup %3682 }
 0x9fa   : > { %v1051_v56 = vpop.permute.xlu1 %1050  ;;  %v979_v60 = vmul.f32 %v3683_v54, %v3677_v39  ;;  %v1047_v1 = vpop.permute.xlu0 %1046 }
 0x9fb   : > { %v1061_v2 = vsel %vm544_vm3, %v1051_v56, 0 }
 0x9fc   : > { %3331 = vmatpush3.bf16.msra.mxu0 %v996_v53 }
 0x9fd   : > { %v3685_v58 = vpop.eup %3684  ;;  %3510 = vmatprep.subr.msk.bf16.mxu0 %vm544_vm3, %v1051_v56 }
 0x9fe   : > { %v3687_v59 = vpop.eup %3686  ;;  %v980_v61 = vmul.f32 %v3685_v58, %v3679_v41  ;;  %v1053_v3 = vpop.permute.xlu1 %1052 }
 0x9ff   : > { %v981_v62 = vmul.f32 %v3687_v59, %v3681_v42  ;;  %v1064_v4 = vsel %vm544_vm3, %v1053_v3, 0 }
 0xa00   : > { %v982_v63 = vpack.c.bf16 %v980_v61, %v979_v60 }
 0xa01   : > { %v983_v0 = vpack.c.bf16 %v981_v62, %v981_v62  ;;  %v3616_v62 = vld [vmem:[%s4659_s3 + $0x4] ss:$12 sps:$4 sm:$0xff]  }
 0xa02   : > { %3332 = vmatprep.mubr.msk.bf16.mxu0 %vm608_vm4, %v982_v63  ;;  %v1049_v6 = vpop.permute.xlu1 %1048  ;;  %v3617_v63 = vld [vmem:[%s4659_s3 + $0x1c] ss:$12 sps:$4 sm:$0xff]  }
 0xa03   : > { %3333 = vmatmul.mubr.msk.bf16.vlgmr.msra.gmra.mrb[8].mxu0 %vm608_vm4, %v983_v0 }
 0xa04   : > { %3340 = vmatprep.mubr.msk.bf16.mxu0 %vm544_vm3, %v1047_v1 }
 0xa05   : > { %3337 = vmatpush3.bf16.xpose.msra.mxu0 %v1061_v2 }
 0xa06   : > { %3511 = vmatprep.subr.msk.bf16.mxu0 %vm544_vm3, %v1053_v3 }
 0xa0d   : > { %3339 = vmatpush3.bf16.xpose.msra.mxu0 %v1064_v4 }
 0xa14   : > { %3341 = vmatmul.mubr.msk.bf16.vlgmr.msra.gmra.mrb[12].mxu0 %vm544_vm3, %v1049_v6 }
 0xad6   : > { %v3334_v9 = vpop.f32.mrb[8].mxu0 }
 0xad7   : > { %v1032_v20 = vpop.f32.mrb[9].mxu0 }
 0xad8   : > { %v3335_v21 = vpop.f32.mrb[10].mxu0 }
 0xad9   : > { %v1035_v22 = vpop.f32.mrb[11].mxu0 }
 0xada   : > { %v3583_v23 = vpack.i.bf16 %v1035_v22, %v1032_v20 }
 0xae7   : > { %v3342_v24 = vpop.f32.mrb[12].mxu0 }
 0xae8   : > { %v1100_v25 = vpop.f32.mrb[13].mxu0  ;;  %v1116_v29 = vmul.f32 0.35355338, %v3342_v24 }
 0xae9   : > { %v1114_v26 = vmul.f32 0.35355338, %v1100_v25  ;;  %v3343_v27 = vpop.f32.mrb[14].mxu0 }
 0xaea   : > { %v1103_v28 = vpop.f32.mrb[15].mxu0  ;;  %v1123_v33 = vsel %vm615_vm5, %v1116_v29, -inf }
 0xaeb   : > { %v1115_v30 = vmul.f32 0.35355338, %v1103_v28  ;;  %v1117_v31 = vsel %vm608_vm4, %v1114_v26, -inf }
 0xaec   : > { %1118 = vmax.xlane.f32.xlu0 %v1117_v31 }
 0xaed   : > { %v1120_v32 = vsel %vm608_vm4, %v1115_v30, -inf }
 0xaee   : > { %1121 = vmax.xlane.f32.xlu1 %v1120_v32 }
 0xaf0   : > { %1124 = vmax.xlane.f32.xlu0 %v1123_v33 }
 0xb79   : > { %v1119_v34 = vpop.xlane.xlu0 %1118 }
 0xb7a   : > { %v1126_v35 = vsub.f32 %v1114_v26, %v1119_v34 }
 0xb7b   : > { %v1122_v36 = vpop.xlane.xlu1 %1121 }
 0xb7c   : > { %v1129_v37 = vmul.f32 1.442695, %v1126_v35  ;;  %v1127_v38 = vsub.f32 %v1115_v30, %v1122_v36 }
 0xb7d   : > { %v1125_v39 = vpop.xlane.xlu0 %1124 }
 0xb7e   : > { %3688 = vpow2.f32 %v1129_v37  ;;  %v1131_v40 = vmul.f32 1.442695, %v1127_v38  ;;  %v1128_v41 = vsub.f32 %v1116_v29, %v1125_v39 }
 0xb80   : > { %3690 = vpow2.f32 %v1131_v40  ;;  %v1133_v42 = vmul.f32 1.442695, %v1128_v41 }
 0xb82   : > { %3692 = vpow2.f32 %v1133_v42 }
 0xb88   : > { %v3689_v43 = vpop.eup %3688 }
 0xb89   : > { %v1135_v44 = vsel %vm608_vm4, %v3689_v43, 0.0 }
 0xb8a   : > { %v3691_v45 = vpop.eup %3690  ;;  %1136 = vadd.xlane.f32.xlu0 %v1135_v44 }
 0xb8b   : > { %v1138_v48 = vsel %vm608_vm4, %v3691_v45, 0.0 }
 0xb8c   : > { %v3693_v46 = vpop.eup %3692 }
 0xb8d   : > { %v1141_v47 = vsel %vm615_vm5, %v3693_v46, 0.0 }
 0xb8e   : > { %1142 = vadd.xlane.f32.xlu1 %v1141_v47  ;;  %1139 = vadd.xlane.f32.xlu0 %v1138_v48 }
 0xb9f   : > { %1154 = vrot.lane.b32.xlu1 %v4039_v11, %s4669_s26 }
 0xba3   : > { %3579 = vrot.lane.b32.xlu1 %v3578_v16, %s4667_s10 }
 0xba4   : > { %1152 = vrot.lane.b32.xlu0 %v4043_v17, %s4669_s26  ;;  %s4691_s26 = smov 8  }
 0xba7   : > { %1221 = vrot.lane.b32.xlu1 %v4117_v7, %s4667_s10  ;;  %s4692_s10 = smov 16  }
 0xba8   : > { %3584 = vrot.lane.b32.xlu0 %v3583_v23, %s4665_s12 }
 0xbab   : > { %1233 = vrot.lane.b32.xlu1 %v3334_v9, %s4665_s12 }
 0xc17   : > { %v1137_v52 = vpop.xlane.xlu0 %1136 }
 0xc18   : > { %3694 = vrcp.f32 %v1137_v52 }
 0xc1b   : > { %v1140_v11 = vpop.xlane.xlu0 %1139  ;;  %v1143_v53 = vpop.xlane.xlu1 %1142 }
 0xc1c   : > { %3696 = vrcp.f32 %v1140_v11 }
 0xc1d   : > { %3698 = vrcp.f32 %v1143_v53 }
 0xc1f   : > { %v1153_v54 = vpop.permute.xlu0 %1152  ;;  %v1155_v8 = vpop.permute.xlu1 %1154 }
 0xc20   : > { %v1164_v10 = vand.u32 %v1155_v8, %v4073_v57  ;;  %3344 = vmatprep.subr.bf16.mxu1 %v1153_v54 }
 0xc21   : > { %3345 = vmatpush3.bf16.msra.mxu1 %v1153_v54 }
 0xc22   : > { %3346 = vmatprep.subr.bf16.mxu1 %v1164_v10  ;;  %v3695_v17 = vpop.eup %3694 }
 0xc23   : > { %v1147_v56 = vmul.f32 %v3695_v17, %v3689_v43  ;;  %v3580_v6 = vpop.permute.xlu1 %3579  ;;  %v3585_v20 = vpop.permute.xlu0 %3584 }
 0xc24   : > { %v3582_v21 = vunpack.i.h.bf16 %v3580_v6  ;;  %v3581_v22 = vunpack.i.l.bf16 %v3580_v6  ;;  %v3587_v24 = vunpack.i.h.bf16 %v3585_v20  ;;  %v3586_v25 = vunpack.i.l.bf16 %v3585_v20 }
 0xc25   : > { %3347 = vmatpush3.bf16.msra.mxu1 %v1164_v10 }
 0xc26   : > { %v3697_v7 = vpop.eup %3696  ;;  %3352 = vmatprep.subr.bf16.mxu1 %v3616_v62  ;;  %v1251_v26 = vsel %vm544_vm3, %v4088_v18, %v3582_v21  ;;  %v1250_v27 = vsel %vm544_vm3, %v4086_v14, %v3581_v22 }
 0xc27   : > { %v3699_v16 = vpop.eup %3698  ;;  %v1148_v58 = vmul.f32 %v3697_v7, %v3691_v45  ;;  %v1222_v9 = vpop.permute.xlu1 %1221  ;;  %v1254_v35 = vsel %vm1253_vm7, %v1250_v27, %v3586_v25  ;;  %v1255_v18 = vsel %vm1253_vm7, %v1251_v26, %v3587_v24  ;;  %v1373_v24 = vsub.s32 2, %v4018_v49 }
 0xc28   : > { %v1149_v59 = vmul.f32 %v3699_v16, %v3693_v46  ;;  %v1252_v29 = vsel %vm544_vm3, %v4084_v13, %v1222_v9  ;;  %v1265_v13 = vsub.s32 5, %v4018_v49 }
 0xc29   : > { %v1150_v60 = vpack.c.bf16 %v1148_v58, %v1147_v56  ;;  %v1374_v27 = vrot.slane %v4024_v51, %v1373_v24 }
 0xc2a   : > { %v1151_v61 = vpack.c.bf16 %v1149_v59, %v1149_v59  ;;  %v1266_v39 = vrot.slane %v4024_v51, %v1265_v13 }
 0xc2b   : > { %3348 = vmatprep.mubr.msk.bf16.mxu1 %vm608_vm4, %v1150_v60  ;;  %v1234_v23 = vpop.permute.xlu1 %1233 }
 0xc2c   : > { %3349 = vmatmul.mubr.msk.bf16.vlgmr.msra.gmra.mrb[20].mxu1 %vm608_vm4, %v1151_v61  ;;  %v1256_v31 = vsel %vm1253_vm7, %v1252_v29, %v1234_v23 }
 0xc2d   : > { %3353 = vmatpush3.bf16.msra.mxu1 %v3616_v62 }
 0xc2e   : > { %3354 = vmatprep.subr.bf16.mxu1 %v3617_v63 }
 0xc31   : > { %3355 = vmatpush3.bf16.msra.mxu1 %v3617_v63 }
 0xcff   : > { %v3350_v0 = vpop.f32.mrb[20].mxu1 }
 0xd00   : > { %1245 = vrot.lane.b32.xlu1 %v3350_v0, %s4675_s24  ;;  %v1200_v1 = vpop.f32.mrb[21].mxu1  ;;  %v3618_v0 = vld [vmem:[%s4659_s3 + $0x8] ss:$12 sps:$4 sm:$0xff]  }
 0xd01   : > { %v3351_v2 = vpop.f32.mrb[22].mxu1  ;;  %3360 = vmatprep.subr.bf16.mxu0 %v3618_v0 }
 0xd02   : > { %v1203_v3 = vpop.f32.mrb[23].mxu1  ;;  %3361 = vmatpush3.bf16.msra.mxu0 %v3618_v0 }
 0xd03   : > { %v3588_v4 = vpack.i.bf16 %v1203_v3, %v1200_v1  ;;  %v3619_v1 = vld [vmem:[%s4659_s3 + $0x20] ss:$12 sps:$4 sm:$0xff]  }
 0xd04   : > { %3362 = vmatprep.subr.bf16.mxu0 %v3619_v1 }
 0xd05   : > { %3589 = vrot.lane.b32.xlu0 %v3588_v4, %s4675_s24  ;;  %s3874_s24 = smov [#allocation2]  }
 0xd06   : > { %3363 = vmatpush3.bf16.msra.mxu0 %v3619_v1  ;;  %s3796_s21 = sshll.u32 %s3874_s24, 4  ;;  %s3797_s21 = int_to_ptr.vmem [resolvable:$false] %s3796_s21 }
 0xd72   : > { %v1246_v28 = vpop.permute.xlu1 %1245 }
 0xd73   : > { %v1260_v34 = vsel %vm1257_vm8, %v1256_v31, %v1246_v28  ;;  %v1380_v28 = vsub.s32 3, %v4018_v49 }
 0xd74   : > { %v1262_v38 = vpack.c.bf16 %v1260_v34, %v1260_v34 }
 0xd75   : > { %v1381_v34 = vrot.slane %v4024_v51, %v1380_v28 }
 0xd77   : > { %v3590_v30 = vpop.permute.xlu0 %3589 }
 0xd78   : > { %v3592_v32 = vunpack.i.h.bf16 %v3590_v30  ;;  %v3591_v33 = vunpack.i.l.bf16 %v3590_v30 }
 0xd7a   : > { %v1258_v36 = vsel %vm1257_vm8, %v1254_v35, %v3591_v33  ;;  %v1259_v14 = vsel %vm1257_vm8, %v1255_v18, %v3592_v32 }
 0xd7b   : > { %v1261_v37 = vpack.c.bf16 %v1259_v14, %v1258_v36 }
 0xd7d   : > { %3356 = vmatprep.mubr.msk.bf16.mxu1 %vm408_vm2, %v1261_v37 }
 0xd7e   : > { %3357 = vmatmul.mubr.msk.bf16.vlgmr.msra.gmra.mrb[24].mxu1 %vm408_vm2, %v1262_v38 }
 0xe51   : > { %v3358_v40 = vpop.f32.mrb[24].mxu1 }
 0xe52   : > { %v1315_v41 = vpop.f32.mrb[25].mxu1  ;;  %v1324_v42 = vadd.f32 %v3358_v40, %v1266_v39  ;;  %v3620_v40 = vld [vmem:[%s4660_s4] sm:$0xff]  }
 0xe53   : > { %v1316_v43 = vadd.f32 %v1315_v41, %v1266_v39  ;;  %v3359_v44 = vpop.f32.mrb[26].mxu1  ;;  %3368 = vmatprep.subr.bf16.mxu1 %v3620_v40  ;;  %v3621_v41 = vld [vmem:[%s4660_s4 + $0x8] sm:$0xff]  }
 0xe54   : > { %v1318_v45 = vpop.f32.mrb[27].mxu1  ;;  %v4203_v48 = vadd.f32 %v1324_v42, %v3991_v12  ;;  %3369 = vmatpush3.bf16.msra.mxu1 %v3620_v40  ;;  %v3622_v42 = vld [vmem:[%s4660_s4 + $0x10] sm:$0xff]   ;;  %v3624_v44 = vld [vmem:[%s4660_s4 + $0x20] sm:$0xff]  }
 0xe55   : > { %v4200_v46 = vadd.f32 %v1316_v43, %v3996_v15  ;;  %v1319_v47 = vadd.f32 %v1318_v45, %v1266_v39  ;;  %3370 = vmatprep.subr.bf16.mxu1 %v3621_v41  ;;  %v3623_v43 = vld [vmem:[%s4660_s4 + $0x18] sm:$0xff]   ;;  %v3625_v45 = vld [vmem:[%s4660_s4 + $0x28] sm:$0xff]  }
 0xe56   : > { %v1338_v54 = vsel %vm415_vm1, %v4203_v48, 0.0 }
 0xe57   : > { %v4206_v52 = vadd.f32 %v1319_v47, %v4000_v19  ;;  %v1332_v11 = vsel %vm408_vm2, %v4200_v46, 0.0  ;;  %v3626_v47 = vld [vmem:[%s4660_s4 + $0x30] sm:$0xff]  }
 0xe58   : > { %1333 = vadd.xlane.f32.xlu0 %v1332_v11  ;;  %3371 = vmatpush3.bf16.msra.mxu1 %v3621_v41  ;;  %v3627_v11 = vld [vmem:[%s4660_s4 + $0x38] sm:$0xff]  }
 0xe59   : > { %v1335_v53 = vsel %vm408_vm2, %v4206_v52, 0.0  ;;  %3372 = vmatprep.subr.bf16.mxu1 %v3622_v42 }
 0xe5a   : > { %1336 = vadd.xlane.f32.xlu1 %v1335_v53  ;;  %v1389_v53 = vsub.s32 6, %v4018_v49 }
 0xe5c   : > { %1339 = vadd.xlane.f32.xlu0 %v1338_v54  ;;  %3373 = vmatpush3.bf16.msra.mxu1 %v3622_v42  ;;  %v1390_v54 = vrot.slane %v4024_v51, %v1389_v53 }
 0xe5d   : > { %3374 = vmatprep.subr.bf16.mxu1 %v3623_v43 }
 0xe60   : > { %3375 = vmatpush3.bf16.msra.mxu1 %v3623_v43 }
 0xe61   : > { %3376 = vmatprep.subr.bf16.mxu1 %v3624_v44 }
 0xe64   : > { %3377 = vmatpush3.bf16.msra.mxu1 %v3624_v44 }
 0xe65   : > { %3378 = vmatprep.subr.bf16.mxu1 %v3625_v45 }
 0xe68   : > { %3379 = vmatpush3.bf16.msra.mxu1 %v3625_v45 }
 0xe69   : > { %3380 = vmatprep.subr.bf16.mxu1 %v3626_v47 }
 0xe6c   : > { %3381 = vmatpush3.bf16.msra.mxu1 %v3626_v47 }
 0xe6d   : > { %3382 = vmatprep.subr.bf16.mxu1 %v3627_v11 }
 0xe70   : > { %3383 = vmatpush3.bf16.msra.mxu1 %v3627_v11 }
 0xee5   : > { %v1334_v15 = vpop.xlane.xlu0 %1333 }
 0xee6   : > { %v1341_v8 = vmul.f32 0.03125, %v1334_v15 }
 0xee7   : > { %v1337_v10 = vpop.xlane.xlu1 %1336 }
 0xee8   : > { %v1344_v12 = vsub.f32 %v4200_v46, %v1341_v8  ;;  %v1342_v17 = vmul.f32 0.03125, %v1337_v10 }
 0xee9   : > { %v1340_v19 = vpop.xlane.xlu0 %1339 }
 0xeea   : > { %v1345_v7 = vsub.f32 %v4206_v52, %v1342_v17  ;;  %v1343_v16 = vmul.f32 0.03125, %v1340_v19  ;;  %v1347_v56 = vmul.f32 %v1344_v12, %v1344_v12 }
 0xeec   : > { %v1346_v58 = vsub.f32 %v4203_v48, %v1343_v16  ;;  %v1350_v59 = vsel %vm408_vm2, %v1347_v56, 0.0  ;;  %v1348_v60 = vmul.f32 %v1345_v7, %v1345_v7 }
 0xeed   : > { %1351 = vadd.xlane.f32.xlu0 %v1350_v59 }
 0xeee   : > { %v1349_v61 = vmul.f32 %v1346_v58, %v1346_v58  ;;  %v1353_v62 = vsel %vm408_vm2, %v1348_v60, 0.0 }
 0xef0   : > { %v1356_v63 = vsel %vm415_vm1, %v1349_v61, 0.0 }
 0xef1   : > { %1354 = vadd.xlane.f32.xlu0 %v1353_v62  ;;  %1357 = vadd.xlane.f32.xlu1 %v1356_v63 }
 0xf7a   : > { %v1352_v2 = vpop.xlane.xlu0 %1351 }
 0xf7b   : > { %v1359_v3 = vmul.f32 0.03125, %v1352_v2 }
 0xf7d   : > { %v1362_v4 = vadd.f32 1e-05, %v1359_v3 }
 0xf7e   : > { %v1358_v6 = vpop.xlane.xlu1 %1357  ;;  %v1355_v9 = vpop.xlane.xlu0 %1354 }
 0xf7f   : > { %3700 = vrsqrt.f32 %v1362_v4  ;;  %v1361_v20 = vmul.f32 0.03125, %v1358_v6  ;;  %v1360_v21 = vmul.f32 0.03125, %v1355_v9 }
 0xf81   : > { %v1364_v22 = vadd.f32 1e-05, %v1361_v20  ;;  %v1363_v23 = vadd.f32 1e-05, %v1360_v21 }
 0xf83   : > { %3702 = vrsqrt.f32 %v1364_v22 }
 0xf84   : > { %3704 = vrsqrt.f32 %v1363_v23 }
 0xf89   : > { %v3701_v25 = vpop.eup %3700 }
 0xf8a   : > { %v1368_v26 = vmul.f32 %v3701_v25, %v1344_v12 }
 0xf8c   : > { %v1375_v33 = vmul.f32 %v1374_v27, %v1368_v26 }
 0xf8d   : > { %v3703_v29 = vpop.eup %3702 }
 0xf8e   : > { %v3705_v30 = vpop.eup %3704  ;;  %v1370_v31 = vmul.f32 %v3703_v29, %v1346_v58  ;;  %v1382_v14 = vadd.f32 %v1381_v34, %v1375_v33 }
 0xf8f   : > { %v1369_v32 = vmul.f32 %v3705_v30, %v1345_v7 }
 0xf90   : > { %v1377_v35 = vmul.f32 %v1374_v27, %v1370_v31 }
 0xf91   : > { %v1376_v18 = vmul.f32 %v1374_v27, %v1369_v32 }
 0xf92   : > { %v1384_v36 = vadd.f32 %v1381_v34, %v1377_v35 }
 0xf93   : > { %v1383_v37 = vadd.f32 %v1381_v34, %v1376_v18 }
 0xf94   : > { %v1386_v38 = vpack.c.bf16 %v1384_v36, %v1384_v36 }
 0xf95   : > { %v1385_v39 = vpack.c.bf16 %v1383_v37, %v1382_v14 }
 0xf97   : > { %3364 = vmatprep.mubr.msk.bf16.mxu0 %vm408_vm2, %v1385_v39 }
 0xf98   : > { %3365 = vmatmul.mubr.msk.bf16.vlgmr.msra.gmra.mrb[16].mxu0 %vm408_vm2, %v1386_v38 }
0x106b   : > { %v3366_v15 = vpop.f32.mrb[16].mxu0 }
0x106c   : > { %v4264_v8 = vadd.f32 %v3366_v15, %v1390_v54  ;;  %v1443_v10 = vpop.f32.mrb[17].mxu0 }
0x106d   : > { %v4266_v12 = vadd.f32 %v1443_v10, %v1390_v54  ;;  %v3367_v17 = vpop.f32.mrb[18].mxu0 }
0x106e   : > { %v4269_v19 = vmul.f32 0.70710677, %v4264_v8  ;;  %v1446_v7 = vpop.f32.mrb[19].mxu0 }
0x106f   : > { %v4272_v16 = vmul.f32 0.70710677, %v4266_v12  ;;  %v4274_v56 = vadd.f32 %v1446_v7, %v1390_v54 }
0x1070   : > { %v1471_v58 = vand.u32 2147483647, %v4269_v19  ;;  %vm1465_vm9 = vcmp.lt.f32.partialorder %v4269_v19, 0.0 }
0x1071   : > { %v1469_v51 = vand.u32 2147483647, %v4272_v16  ;;  %v4279_v60 = vmul.f32 0.70710677, %v4274_v56  ;;  %vm1463_vm10 = vcmp.lt.f32.partialorder %v4272_v16, 0.0 }
0x1072   : > { %v1474_v59 = vmul.f32 0.3275911, %v1471_v58  ;;  %v1513_v3 = vsub.f32 0.0, %v1471_v58 }
0x1073   : > { %v1472_v61 = vmul.f32 0.3275911, %v1469_v51  ;;  %v1470_v63 = vand.u32 2147483647, %v4279_v60  ;;  %v1511_v4 = vsub.f32 0.0, %v1469_v51  ;;  %vm1464_vm11 = vcmp.lt.f32.partialorder %v4279_v60, 0.0 }
0x1074   : > { %v1477_v62 = vadd.f32 1.0, %v1474_v59  ;;  %v1516_v9 = vmul.f32 %v1513_v3, %v1471_v58 }
0x1075   : > { %v1475_v0 = vadd.f32 1.0, %v1472_v61  ;;  %v1473_v1 = vmul.f32 0.3275911, %v1470_v63  ;;  %v1512_v20 = vsub.f32 0.0, %v1470_v63  ;;  %v1514_v23 = vmul.f32 %v1511_v4, %v1469_v51 }
0x1076   : > { %3706 = vrcp.f32 %v1477_v62  ;;  %v1521_v29 = vmul.f32 1.442695, %v1516_v9 }
0x1077   : > { %3708 = vrcp.f32 %v1475_v0  ;;  %v1476_v2 = vadd.f32 1.0, %v1473_v1  ;;  %v1515_v31 = vmul.f32 %v1512_v20, %v1470_v63  ;;  %v1517_v33 = vmul.f32 1.442695, %v1514_v23 }
0x1079   : > { %3710 = vrcp.f32 %v1476_v2  ;;  %v1519_v37 = vmul.f32 1.442695, %v1515_v31  ;;  %v3871_v2 = vmov 1.0  }
0x107a   : > { %3712 = vpow2.f32 %v1521_v29  ;;  %v1468_v3 = vsel %vm1465_vm9, -1.0, %v3871_v2  ;;  %v1467_v23 = vsel %vm1464_vm11, -1.0, %v3871_v2  ;;  %v1458_v29 = vmul.f32 0.5, %v4274_v56 }
0x107b   : > { %3714 = vpow2.f32 %v1517_v33 }
0x107c   : > { %3716 = vpow2.f32 %v1519_v37 }
0x1080   : > { %v3707_v6 = vpop.eup %3706 }
0x1081   : > { %v3709_v21 = vpop.eup %3708  ;;  %v1486_v22 = vmul.f32 1.0614054, %v3707_v6 }
0x1082   : > { %v1484_v25 = vmul.f32 1.0614054, %v3709_v21 }
0x1083   : > { %v1489_v26 = vadd.f32 -1.4531521, %v1486_v22  ;;  %v3711_v27 = vpop.eup %3710 }
0x1084   : > { %v1487_v30 = vadd.f32 -1.4531521, %v1484_v25  ;;  %v1485_v34 = vmul.f32 1.0614054, %v3711_v27  ;;  %v3713_v7 = vpop.eup %3712 }
0x1085   : > { %v1492_v32 = vmul.f32 %v3707_v6, %v1489_v26  ;;  %v3715_v51 = vpop.eup %3714  ;;  %v1459_v26 = vmul.f32 0.5, %v4264_v8 }
0x1086   : > { %v1490_v35 = vmul.f32 %v3709_v21, %v1487_v30  ;;  %v1488_v36 = vadd.f32 -1.4531521, %v1485_v34  ;;  %v3717_v1 = vpop.eup %3716 }
0x1087   : > { %v1495_v18 = vadd.f32 1.4214138, %v1492_v32 }
0x1088   : > { %v1493_v14 = vadd.f32 1.4214138, %v1490_v35  ;;  %v1491_v39 = vmul.f32 %v3711_v27, %v1488_v36  ;;  %v1558_v35 = vsub.s32 7, %v4018_v49 }
0x1089   : > { %v1498_v38 = vmul.f32 %v3707_v6, %v1495_v18  ;;  %v3790_v18 = vld [vmem:[%s4661_s5] sm:$0xff] }
0x108a   : > { %v1496_v40 = vmul.f32 %v3709_v21, %v1493_v14  ;;  %v1494_v42 = vadd.f32 1.4214138, %v1491_v39  ;;  %v1559_v8 = vrot.slane %v3790_v18, %v1558_v35 }
0x108b   : > { %v1501_v41 = vadd.f32 -0.28449672, %v1498_v38 }
0x108c   : > { %v1499_v43 = vadd.f32 -0.28449672, %v1496_v40  ;;  %v1497_v45 = vmul.f32 %v3711_v27, %v1494_v42 }
0x108d   : > { %v1504_v44 = vmul.f32 %v3707_v6, %v1501_v41 }
0x108e   : > { %v1502_v47 = vmul.f32 %v3709_v21, %v1499_v43  ;;  %v1500_v54 = vadd.f32 -0.28449672, %v1497_v45 }
0x108f   : > { %v1507_v11 = vadd.f32 0.2548296, %v1504_v44 }
0x1090   : > { %v1505_v15 = vadd.f32 0.2548296, %v1502_v47  ;;  %v1503_v17 = vmul.f32 %v3711_v27, %v1500_v54 }
0x1091   : > { %v1510_v10 = vmul.f32 %v3707_v6, %v1507_v11  ;;  %v1466_v6 = vsel %vm1463_vm10, -1.0, %v3871_v2 }
0x1092   : > { %v1508_v58 = vmul.f32 %v3709_v21, %v1505_v15  ;;  %v1506_v61 = vadd.f32 0.2548296, %v1503_v17 }
0x1093   : > { %v1525_v59 = vmul.f32 %v3713_v7, %v1510_v10 }
0x1094   : > { %v1523_v62 = vmul.f32 %v3715_v51, %v1508_v58  ;;  %v1509_v0 = vmul.f32 %v3711_v27, %v1506_v61  ;;  %v1457_v27 = vmul.f32 0.5, %v4266_v12 }
0x1095   : > { %v1528_v63 = vsub.f32 1.0, %v1525_v59 }
0x1096   : > { %v1526_v4 = vsub.f32 1.0, %v1523_v62  ;;  %v1524_v20 = vmul.f32 %v3717_v1, %v1509_v0  ;;  %v3630_v0 = vld [vmem:[%s4659_s3 + $0x48] ss:$12 sps:$4 sm:$0xff]  }
0x1097   : > { %v1531_v9 = vmul.f32 %v1528_v63, %v1468_v3  ;;  %v3628_v63 = vld [vmem:[%s4659_s3 + $0x30] ss:$12 sps:$4 sm:$0xff]  }
0x1098   : > { %v1529_v21 = vmul.f32 %v1526_v4, %v1466_v6  ;;  %v1527_v19 = vsub.f32 1.0, %v1524_v20  ;;  %3388 = vmatprep.subr.bf16.mxu0 %v3628_v63 }
0x1099   : > { %v1534_v22 = vadd.f32 1.0, %v1531_v9  ;;  %3389 = vmatpush3.bf16.msra.mxu0 %v3628_v63 }
0x109a   : > { %v1532_v16 = vadd.f32 1.0, %v1529_v21  ;;  %v1530_v25 = vmul.f32 %v1527_v19, %v1467_v23  ;;  %3390 = vmatprep.subr.bf16.mxu0 %v3630_v0  ;;  %v4327_v23 = vld [vmem:[%s4661_s5 + $0x8] sm:$0xff] }
0x109b   : > { %v1537_v31 = vmul.f32 %v1534_v22, %v1459_v26 }
0x109c   : > { %v1533_v30 = vadd.f32 1.0, %v1530_v25  ;;  %v1535_v32 = vmul.f32 %v1532_v16, %v1457_v27  ;;  %v1712_v16 = vrot.slane %v4327_v23, %v452_v50 }
0x109d   : > { %v1539_v60 = vpack.c.bf16 %v1537_v31, %v1537_v31  ;;  %3391 = vmatpush3.bf16.msra.mxu0 %v3630_v0  ;;  %v1719_v31 = vrot.slane %v4327_v23, %v459_v55 }
0x109e   : > { %v1536_v33 = vmul.f32 %v1533_v30, %v1458_v29 }
0x10a0   : > { %v1538_v34 = vpack.c.bf16 %v1536_v33, %v1535_v32 }
0x10a2   : > { %3384 = vmatprep.mubr.bf16.mxu1 %v1538_v34 }
0x10a3   : > { %3385 = vmatmul.mubr.bf16.vlgmr.msra.gmra.mrb[28].mxu1 %v1539_v60 }
0x1176   : > { %v3386_v12 = vpop.f32.mrb[28].mxu1 }
0x1177   : > { %v1642_v36 = vpop.f32.mrb[29].mxu1  ;;  %v1651_v56 = vadd.f32 %v3386_v12, %v1559_v8 }
0x1178   : > { %v1643_v14 = vadd.f32 %v1642_v36, %v1559_v8  ;;  %v3387_v37 = vpop.f32.mrb[30].mxu1 }
0x1179   : > { %v1645_v38 = vpop.f32.mrb[31].mxu1  ;;  %v4301_v41 = vadd.f32 %v1651_v56, %v4203_v48  ;;  %v1728_v56 = vrot.slane %v4327_v23, %v468_v5 }
0x117a   : > { %v4298_v39 = vadd.f32 %v1643_v14, %v4200_v46  ;;  %v1646_v40 = vadd.f32 %v1645_v38, %v1559_v8 }
0x117b   : > { %v1676_v45 = vsel %vm415_vm1, %v4301_v41, 0.0 }
0x117c   : > { %v4304_v42 = vadd.f32 %v1646_v40, %v4206_v52  ;;  %v1670_v43 = vsel %vm408_vm2, %v4298_v39, 0.0 }
0x117d   : > { %1671 = vadd.xlane.f32.xlu0 %v1670_v43 }
0x117e   : > { %v1673_v44 = vsel %vm408_vm2, %v4304_v42, 0.0 }
0x117f   : > { %1674 = vadd.xlane.f32.xlu1 %v1673_v44 }
0x1181   : > { %1677 = vadd.xlane.f32.xlu0 %v1676_v45 }
0x120a   : > { %v1672_v46 = vpop.xlane.xlu0 %1671 }
0x120b   : > { %v1679_v47 = vmul.f32 0.03125, %v1672_v46 }
0x120c   : > { %v1675_v11 = vpop.xlane.xlu1 %1674 }
0x120d   : > { %v1682_v48 = vsub.f32 %v4298_v39, %v1679_v47  ;;  %v1680_v54 = vmul.f32 0.03125, %v1675_v11 }
0x120e   : > { %v1678_v52 = vpop.xlane.xlu0 %1677 }
0x120f   : > { %v1683_v15 = vsub.f32 %v4304_v42, %v1680_v54  ;;  %v1681_v10 = vmul.f32 0.03125, %v1678_v52  ;;  %v1685_v17 = vmul.f32 %v1682_v48, %v1682_v48 }
0x1211   : > { %v1684_v7 = vsub.f32 %v4301_v41, %v1681_v10  ;;  %v1688_v58 = vsel %vm408_vm2, %v1685_v17, 0.0  ;;  %v1686_v51 = vmul.f32 %v1683_v15, %v1683_v15 }
0x1212   : > { %1689 = vadd.xlane.f32.xlu1 %v1688_v58 }
0x1213   : > { %v1691_v59 = vsel %vm408_vm2, %v1686_v51, 0.0  ;;  %v1687_v61 = vmul.f32 %v1684_v7, %v1684_v7 }
0x1214   : > { %1692 = vadd.xlane.f32.xlu0 %v1691_v59 }
0x1215   : > { %v1694_v62 = vsel %vm415_vm1, %v1687_v61, 0.0 }
0x1216   : > { %1695 = vadd.xlane.f32.xlu1 %v1694_v62 }
0x129f   : > { %v1690_v1 = vpop.xlane.xlu1 %1689 }
0x12a0   : > { %v1697_v3 = vmul.f32 0.03125, %v1690_v1 }
0x12a1   : > { %v1693_v4 = vpop.xlane.xlu0 %1692 }
0x12a2   : > { %v1700_v9 = vadd.f32 1e-05, %v1697_v3  ;;  %v1698_v6 = vmul.f32 0.03125, %v1693_v4 }
0x12a3   : > { %v1696_v20 = vpop.xlane.xlu1 %1695 }
0x12a4   : > { %3718 = vrsqrt.f32 %v1700_v9  ;;  %v1701_v21 = vadd.f32 1e-05, %v1698_v6  ;;  %v1699_v19 = vmul.f32 0.03125, %v1696_v20 }
0x12a6   : > { %3720 = vrsqrt.f32 %v1701_v21  ;;  %v1702_v22 = vadd.f32 1e-05, %v1699_v19 }
0x12a8   : > { %3722 = vrsqrt.f32 %v1702_v22 }
0x12ae   : > { %v3719_v25 = vpop.eup %3718 }
0x12af   : > { %v1706_v26 = vmul.f32 %v3719_v25, %v1682_v48 }
0x12b0   : > { %v3721_v27 = vpop.eup %3720 }
0x12b1   : > { %v1707_v29 = vmul.f32 %v3721_v27, %v1683_v15  ;;  %v1713_v30 = vmul.f32 %v1712_v16, %v1706_v26 }
0x12b2   : > { %v3723_v32 = vpop.eup %3722 }
0x12b3   : > { %v1708_v33 = vmul.f32 %v3723_v32, %v1684_v7  ;;  %v1714_v34 = vmul.f32 %v1712_v16, %v1707_v29  ;;  %v1720_v60 = vadd.f32 %v1719_v31, %v1713_v30 }
0x12b5   : > { %v1721_v18 = vadd.f32 %v1719_v31, %v1714_v34  ;;  %v1715_v8 = vmul.f32 %v1712_v16, %v1708_v33 }
0x12b7   : > { %v1723_v12 = vpack.c.bf16 %v1721_v18, %v1720_v60  ;;  %v1722_v36 = vadd.f32 %v1719_v31, %v1715_v8 }
0x12b9   : > { %3392 = vmatprep.mubr.msk.bf16.mxu0 %vm408_vm2, %v1723_v12  ;;  %v1724_v50 = vpack.c.bf16 %v1722_v36, %v1722_v36 }
0x12bb   : > { %3393 = vmatmul.mubr.msk.bf16.vlgmr.msra.gmra.mrb[20].mxu0 %vm408_vm2, %v1724_v50 }
0x138e   : > { %v3394_v14 = vpop.f32.mrb[20].mxu0 }
0x138f   : > { %v1790_v37 = vadd.f32 %v3394_v14, %v1728_v56  ;;  %v1781_v55 = vpop.f32.mrb[21].mxu0 }
0x1390   : > { %v3395_v38 = vpop.f32.mrb[22].mxu0  ;;  %v1782_v44 = vadd.f32 %v1781_v55, %v1728_v56 }
0x1391   : > { %v4340_v40 = vpack.c.bf16 %v1790_v37, %v1790_v37  ;;  %v1784_v43 = vpop.f32.mrb[23].mxu0 }
0x1392   : > { %v1785_v45 = vadd.f32 %v1784_v43, %v1728_v56 }
0x1393   : > { %1801 = vrot.lane.b32.xlu1 %v4340_v40, %s3856_s13 }
0x1394   : > { %v4344_v46 = vpack.c.bf16 %v1785_v45, %v1782_v44 }
0x1396   : > { %1799 = vrot.lane.b32.xlu0 %v4344_v46, %s3856_s13  ;;  %3400 = vmatprep.mubr.msk.bf16.mxu0 %vm544_vm3, %v4344_v46  ;;  %s4685_s13 = smov 80  }
0x1397   : > { %1967 = vrot.lane.b32.xlu1 %v4344_v46, %s3859_s19 }
0x139a   : > { %1963 = vrot.lane.b32.xlu0 %v4344_v46, %s3858_s18 }
0x139b   : > { %1969 = vrot.lane.b32.xlu1 %v4340_v40, %s3859_s19  ;;  %s4688_s19 = smov 72  }
0x139f   : > { %1965 = vrot.lane.b32.xlu1 %v4340_v40, %s3858_s18  ;;  %s4687_s18 = smov 48  }
0x1405   : > { %v1802_v5 = vpop.permute.xlu1 %1801 }
0x1406   : > { %v1813_v10 = vsel %vm544_vm3, %v1802_v5, 0 }
0x1408   : > { %v1800_v47 = vpop.permute.xlu0 %1799 }
0x1409   : > { %v1810_v11 = vsel %vm544_vm3, %v1800_v47, 0  ;;  %v1968_v48 = vpop.permute.xlu1 %1967  ;;  %3512 = vmatprep.subr.msk.bf16.mxu0 %vm544_vm3, %v1800_v47 }
0x140a   : > { %v1978_v54 = vsel %vm544_vm3, %v1968_v48, 0  ;;  %3397 = vmatpush3.bf16.xpose.msra.mxu0 %v1810_v11  ;;  %3514 = vmatprep.subr.msk.bf16.mxu1 %vm544_vm3, %v1968_v48 }
0x140b   : > { %3513 = vmatprep.subr.msk.bf16.mxu0 %vm544_vm3, %v1802_v5  ;;  %3413 = vmatpush3.bf16.xpose.msra.mxu1 %v1978_v54 }
0x140c   : > { %v1964_v52 = vpop.permute.xlu0 %1963 }
0x140d   : > { %v1970_v15 = vpop.permute.xlu1 %1969  ;;  %3416 = vmatprep.mubr.msk.bf16.mxu1 %vm544_vm3, %v1964_v52 }
0x140e   : > { %3515 = vmatprep.subr.msk.bf16.mxu1 %vm544_vm3, %v1970_v15  ;;  %v1981_v17 = vsel %vm544_vm3, %v1970_v15, 0 }
0x1411   : > { %v1966_v7 = vpop.permute.xlu1 %1965 }
0x1412   : > { %3399 = vmatpush3.bf16.xpose.msra.mxu0 %v1813_v10 }
0x1413   : > { %3415 = vmatpush3.bf16.xpose.msra.mxu1 %v1981_v17 }
0x1419   : > { %3401 = vmatmul.mubr.msk.bf16.vlgmr.msra.gmra.mrb[24].mxu0 %vm544_vm3, %v4340_v40 }
0x141a   : > { %3417 = vmatmul.mubr.msk.bf16.vlgmr.msra.gmra.mrb[32].mxu1 %vm544_vm3, %v1966_v7 }
0x14ec   : > { %v3402_v58 = vpop.f32.mrb[24].mxu0 }
0x14ed   : > { %v1849_v51 = vpop.f32.mrb[25].mxu0  ;;  %v3418_v59 = vpop.f32.mrb[32].mxu1  ;;  %v1865_v3 = vmul.f32 0.35355338, %v3402_v58 }
0x14ee   : > { %v1863_v61 = vmul.f32 0.35355338, %v1849_v51  ;;  %v3403_v62 = vpop.f32.mrb[26].mxu0  ;;  %v2017_v63 = vpop.f32.mrb[33].mxu1  ;;  %v2033_v20 = vmul.f32 0.35355338, %v3418_v59 }
0x14ef   : > { %v1852_v0 = vpop.f32.mrb[27].mxu0  ;;  %v3419_v1 = vpop.f32.mrb[34].mxu1  ;;  %v2031_v19 = vmul.f32 0.35355338, %v2017_v63  ;;  %v1872_v22 = vsel %vm615_vm5, %v1865_v3, -inf }
0x14f0   : > { %v1864_v4 = vmul.f32 0.35355338, %v1852_v0  ;;  %v2020_v9 = vpop.f32.mrb[35].mxu1  ;;  %v1866_v6 = vsel %vm608_vm4, %v1863_v61, -inf  ;;  %v2040_v16 = vsel %vm615_vm5, %v2033_v20, -inf }
0x14f1   : > { %1867 = vmax.xlane.f32.xlu0 %v1866_v6  ;;  %v2032_v25 = vmul.f32 0.35355338, %v2020_v9  ;;  %v2034_v26 = vsel %vm608_vm4, %v2031_v19, -inf }
0x14f2   : > { %v1869_v21 = vsel %vm608_vm4, %v1864_v4, -inf }
0x14f3   : > { %1870 = vmax.xlane.f32.xlu1 %v1869_v21  ;;  %v2037_v27 = vsel %vm608_vm4, %v2032_v25, -inf }
0x14f5   : > { %1873 = vmax.xlane.f32.xlu0 %v1872_v22 }
0x14f7   : > { %2041 = vmax.xlane.f32.xlu1 %v2040_v16 }
0x14f9   : > { %2035 = vmax.xlane.f32.xlu0 %v2034_v26 }
0x14fd   : > { %2038 = vmax.xlane.f32.xlu0 %v2037_v27 }
0x157e   : > { %v1868_v29 = vpop.xlane.xlu0 %1867 }
0x157f   : > { %v1875_v30 = vsub.f32 %v1863_v61, %v1868_v29 }
0x1580   : > { %v1871_v31 = vpop.xlane.xlu1 %1870 }
0x1581   : > { %v1878_v34 = vmul.f32 1.442695, %v1875_v30  ;;  %v1876_v47 = vsub.f32 %v1864_v4, %v1871_v31 }
0x1582   : > { %v1874_v32 = vpop.xlane.xlu0 %1873 }
0x1583   : > { %v1877_v33 = vsub.f32 %v1865_v3, %v1874_v32  ;;  %v1880_v48 = vmul.f32 1.442695, %v1876_v47 }
0x1584   : > { %v2042_v60 = vpop.xlane.xlu1 %2041 }
0x1585   : > { %v1882_v18 = vmul.f32 1.442695, %v1877_v33  ;;  %v2045_v8 = vsub.f32 %v2033_v20, %v2042_v60 }
0x1586   : > { %v2036_v38 = vpop.xlane.xlu0 %2035 }
0x1587   : > { %3724 = vpow2.f32 %v1882_v18  ;;  %v2050_v12 = vmul.f32 1.442695, %v2045_v8  ;;  %v2043_v45 = vsub.f32 %v2031_v19, %v2036_v38 }
0x1588   : > { %3726 = vpow2.f32 %v1878_v34 }
0x1589   : > { %3728 = vpow2.f32 %v2050_v12  ;;  %v2046_v11 = vmul.f32 1.442695, %v2043_v45 }
0x158a   : > { %v2039_v43 = vpop.xlane.xlu0 %2038 }
0x158b   : > { %v2044_v44 = vsub.f32 %v2032_v25, %v2039_v43 }
0x158d   : > { %v2048_v5 = vmul.f32 1.442695, %v2044_v44 }
0x158f   : > { %3730 = vpow2.f32 %v2048_v5 }
0x1590   : > { %3732 = vpow2.f32 %v2046_v11 }
0x1591   : > { %v4376_v36 = vpop.eup %3724  ;;  %3734 = vpow2.f32 %v1880_v48 }
0x1592   : > { %v4378_v50 = vpop.eup %3726  ;;  %v1890_v56 = vsel %vm615_vm5, %v4376_v36, 0.0 }
0x1593   : > { %v4382_v14 = vpop.eup %3728  ;;  %1891 = vadd.xlane.f32.xlu0 %v1890_v56  ;;  %v1884_v55 = vsel %vm608_vm4, %v4378_v50, 0.0 }
0x1594   : > { %v2058_v37 = vsel %vm615_vm5, %v4382_v14, 0.0 }
0x1595   : > { %2059 = vadd.xlane.f32.xlu1 %v2058_v37 }
0x1597   : > { %1885 = vadd.xlane.f32.xlu0 %v1884_v55 }
0x1599   : > { %v3731_v54 = vpop.eup %3730 }
0x159a   : > { %v3733_v52 = vpop.eup %3732  ;;  %v2055_v15 = vsel %vm608_vm4, %v3731_v54, 0.0 }
0x159b   : > { %v2052_v10 = vsel %vm608_vm4, %v3733_v52, 0.0  ;;  %v3735_v17 = vpop.eup %3734 }
0x159c   : > { %v1887_v7 = vsel %vm608_vm4, %v3735_v17, 0.0 }
0x15a6   : > { %1903 = vrot.lane.b32.xlu1 %v4340_v40, %s3857_s17 }
0x15aa   : > { %2069 = vrot.lane.b32.xlu1 %v4344_v46, %s3861_s20 }
0x15ad   : > { %1901 = vrot.lane.b32.xlu0 %v4344_v46, %s3857_s17  ;;  %s4686_s17 = smov 112  }
0x15cc   : > { %2056 = vadd.xlane.f32.xlu0 %v2055_v15 }
0x15ce   : > { %2053 = vadd.xlane.f32.xlu1 %v2052_v10 }
0x15d2   : > { %1888 = vadd.xlane.f32.xlu1 %v1887_v7 }
0x15e2   : > { %2135 = vrot.lane.b32.xlu0 %v4344_v46, %s4685_s13 }
0x15e3   : > { %2071 = vrot.lane.b32.xlu1 %v4340_v40, %s3861_s20  ;;  %s4689_s20 = smov 104  }
0x15e6   : > { %2131 = vrot.lane.b32.xlu0 %v4344_v46, %s4686_s17 }
0x15e7   : > { %2137 = vrot.lane.b32.xlu1 %v4340_v40, %s4685_s13  ;;  %s296_s13 = sand.u32 1, %s3846_s28  }
0x15e8   : > { %s2970_s23 = scalar_lea.sflag [#allocation3], %s296_s13 }
0x15eb   : > { %2133 = vrot.lane.b32.xlu1 %v4340_v40, %s4686_s17 }
0x1620   : > { %v1892_v58 = vpop.xlane.xlu0 %1891 }
0x1621   : > { %3736 = vrcp.f32 %v1892_v58 }
0x1622   : > { %v2060_v51 = vpop.xlane.xlu1 %2059 }
0x1624   : > { %v1886_v59 = vpop.xlane.xlu0 %1885 }
0x1625   : > { %3738 = vrcp.f32 %v1886_v59 }
0x1626   : > { %v1904_v61 = vpop.permute.xlu1 %1903 }
0x1627   : > { %v1913_v63 = vand.u32 %v1904_v61, %v4073_v57 }
0x1628   : > { %v1902_v62 = vpop.permute.xlu0 %1901 }
0x1629   : > { %3404 = vmatprep.subr.bf16.mxu0 %v1902_v62 }
0x162a   : > { %3405 = vmatpush3.bf16.msra.mxu0 %v1902_v62  ;;  %v2070_v0 = vpop.permute.xlu1 %2069 }
0x162b   : > { %3406 = vmatprep.subr.bf16.mxu0 %v1913_v63  ;;  %v3737_v9 = vpop.eup %3736 }
0x162c   : > { %v1898_v22 = vmul.f32 %v3737_v9, %v4376_v36 }
0x162e   : > { %3407 = vmatpush3.bf16.msra.mxu0 %v1913_v63  ;;  %v1900_v31 = vpack.c.bf16 %v1898_v22, %v1898_v22 }
0x162f   : > { %3420 = vmatprep.subr.bf16.mxu0 %v2070_v0  ;;  %v3739_v6 = vpop.eup %3738 }
0x1630   : > { %v1896_v16 = vmul.f32 %v3739_v6, %v4378_v50 }
0x1659   : > { %v2057_v3 = vpop.xlane.xlu0 %2056 }
0x165b   : > { %v2054_v1 = vpop.xlane.xlu1 %2053 }
0x165c   : > { %3740 = vrcp.f32 %v2054_v1 }
0x165d   : > { %3742 = vrcp.f32 %v2057_v3  ;;  %v2136_v18 = vpop.permute.xlu0 %2135 }
0x165e   : > { %v2146_v36 = vsel %vm544_vm3, %v2136_v18, 0 }
0x165f   : > { %v1889_v4 = vpop.xlane.xlu1 %1888 }
0x1660   : > { %3744 = vrcp.f32 %v1889_v4 }
0x1661   : > { %3746 = vrcp.f32 %v2060_v51  ;;  %v2132_v12 = vpop.permute.xlu0 %2131 }
0x1663   : > { %v2072_v27 = vpop.permute.xlu1 %2071 }
0x1664   : > { %v2081_v34 = vand.u32 %v2072_v27, %v4073_v57 }
0x1666   : > { %v3741_v20 = vpop.eup %3740 }
0x1667   : > { %v3743_v21 = vpop.eup %3742  ;;  %v2064_v26 = vmul.f32 %v3741_v20, %v3733_v52  ;;  %v2138_v50 = vpop.permute.xlu1 %2137 }
0x1668   : > { %v2065_v30 = vmul.f32 %v3743_v21, %v3731_v54  ;;  %v2149_v56 = vsel %vm544_vm3, %v2138_v50, 0 }
0x166a   : > { %v3745_v19 = vpop.eup %3744  ;;  %v2067_v33 = vpack.c.bf16 %v2065_v30, %v2064_v26 }
0x166b   : > { %v1897_v25 = vmul.f32 %v3745_v19, %v3735_v17  ;;  %v3747_v32 = vpop.eup %3746 }
0x166c   : > { %v2066_v60 = vmul.f32 %v3747_v32, %v4382_v14  ;;  %v2134_v14 = vpop.permute.xlu1 %2133 }
0x166d   : > { %v1899_v29 = vpack.c.bf16 %v1897_v25, %v1896_v16 }
0x166e   : > { %v2068_v8 = vpack.c.bf16 %v2066_v60, %v2066_v60 }
0x166f   : > { %3408 = vmatprep.mubr.msk.bf16.mxu0 %vm608_vm4, %v1899_v29 }
0x1670   : > { %3409 = vmatmul.mubr.msk.bf16.vlgmr.msra.gmra.mrb[28].mxu0 %vm608_vm4, %v1900_v31 }
0x1671   : > { %3421 = vmatpush3.bf16.msra.mxu0 %v2070_v0  ;;  %3424 = vmatprep.mubr.msk.bf16.mxu0 %vm608_vm4, %v2067_v33 }
0x1672   : > { %3422 = vmatprep.subr.bf16.mxu0 %v2081_v34 }
0x1675   : > { %3423 = vmatpush3.bf16.msra.mxu0 %v2081_v34 }
0x1676   : > { %3516 = vmatprep.subr.msk.bf16.mxu0 %vm544_vm3, %v2136_v18 }
0x1678   : > { %3425 = vmatmul.mubr.msk.bf16.vlgmr.msra.gmra.mrb[32].mxu0 %vm608_vm4, %v2068_v8 }
0x1679   : > { %3432 = vmatprep.mubr.msk.bf16.mxu0 %vm544_vm3, %v2132_v12 }
0x167e   : > { %3429 = vmatpush3.bf16.xpose.msra.mxu0 %v2146_v36 }
0x167f   : > { %3517 = vmatprep.subr.msk.bf16.mxu0 %vm544_vm3, %v2138_v50 }
0x1686   : > { %3431 = vmatpush3.bf16.xpose.msra.mxu0 %v2149_v56 }
0x168d   : > { %3433 = vmatmul.mubr.msk.bf16.vlgmr.msra.gmra.mrb[36].mxu0 %vm544_vm3, %v2134_v14 }
0x1743   : > { %v4422_v37 = vpop.f32.mrb[28].mxu0 }
0x1744   : > { %v4424_v55 = vpop.f32.mrb[29].mxu0 }
0x1745   : > { %v3411_v38 = vpop.f32.mrb[30].mxu0 }
0x1746   : > { %v4426_v43 = vpop.f32.mrb[31].mxu0 }
0x174b   : > { %v4428_v44 = vpop.f32.mrb[32].mxu0 }
0x174c   : > { %v4430_v45 = vpop.f32.mrb[33].mxu0 }
0x174d   : > { %v3427_v5 = vpop.f32.mrb[34].mxu0 }
0x174e   : > { %v4432_v47 = vpop.f32.mrb[35].mxu0 }
0x174f   : > { %v3593_v11 = vpack.i.bf16 %v4432_v47, %v4430_v45 }
0x1760   : > { %v3434_v48 = vpop.f32.mrb[36].mxu0 }
0x1761   : > { %v2185_v54 = vpop.f32.mrb[37].mxu0  ;;  %v2201_v17 = vmul.f32 0.35355338, %v3434_v48 }
0x1762   : > { %v2199_v52 = vmul.f32 0.35355338, %v2185_v54  ;;  %v3435_v15 = vpop.f32.mrb[38].mxu0 }
0x1763   : > { %v2188_v10 = vpop.f32.mrb[39].mxu0  ;;  %v2208_v59 = vsel %vm615_vm5, %v2201_v17, -inf }
0x1764   : > { %v2200_v7 = vmul.f32 0.35355338, %v2188_v10  ;;  %v2202_v58 = vsel %vm608_vm4, %v2199_v52, -inf }
0x1765   : > { %2203 = vmax.xlane.f32.xlu0 %v2202_v58 }
0x1766   : > { %v2205_v51 = vsel %vm608_vm4, %v2200_v7, -inf }
0x1767   : > { %2206 = vmax.xlane.f32.xlu1 %v2205_v51 }
0x1769   : > { %2209 = vmax.xlane.f32.xlu0 %v2208_v59 }
0x17f2   : > { %v2204_v61 = vpop.xlane.xlu0 %2203 }
0x17f3   : > { %v2211_v62 = vsub.f32 %v2199_v52, %v2204_v61 }
0x17f4   : > { %v2207_v63 = vpop.xlane.xlu1 %2206 }
0x17f5   : > { %v2214_v0 = vmul.f32 1.442695, %v2211_v62  ;;  %v2212_v1 = vsub.f32 %v2200_v7, %v2207_v63 }
0x17f6   : > { %v2210_v3 = vpop.xlane.xlu0 %2209 }
0x17f7   : > { %3748 = vpow2.f32 %v2214_v0  ;;  %v2216_v4 = vmul.f32 1.442695, %v2212_v1  ;;  %v2213_v9 = vsub.f32 %v2201_v17, %v2210_v3 }
0x17f9   : > { %3750 = vpow2.f32 %v2216_v4  ;;  %v2218_v6 = vmul.f32 1.442695, %v2213_v9 }
0x17fb   : > { %3752 = vpow2.f32 %v2218_v6 }
0x1801   : > { %v3749_v20 = vpop.eup %3748 }
0x1802   : > { %v2220_v21 = vsel %vm608_vm4, %v3749_v20, 0.0 }
0x1803   : > { %v3751_v19 = vpop.eup %3750  ;;  %2221 = vadd.xlane.f32.xlu0 %v2220_v21 }
0x1804   : > { %v2223_v25 = vsel %vm608_vm4, %v3751_v19, 0.0 }
0x1805   : > { %v3753_v22 = vpop.eup %3752 }
0x1806   : > { %v2226_v16 = vsel %vm615_vm5, %v3753_v22, 0.0 }
0x1807   : > { %2227 = vadd.xlane.f32.xlu1 %v2226_v16  ;;  %2224 = vadd.xlane.f32.xlu0 %v2223_v25 }
0x1818   : > { %2239 = vrot.lane.b32.xlu1 %v4340_v40, %s4687_s18 }
0x181c   : > { %2303 = vrot.lane.b32.xlu1 %v4344_v46, %s4688_s19 }
0x181d   : > { %2237 = vrot.lane.b32.xlu0 %v4344_v46, %s4687_s18 }
0x1820   : > { %2305 = vrot.lane.b32.xlu1 %v4340_v40, %s4688_s19  ;;  %s3148_s19 = sshll.u32 %s3941_s9, 4 }
0x1821   : > { %2299 = vrot.lane.b32.xlu0 %v4344_v46, %s4689_s20  ;;  %s4614_s12 = scalar_lea.hbm %s4664_s8, %s3148_s19 }
0x1824   : > { %2301 = vrot.lane.b32.xlu1 %v4340_v40, %s4689_s20  ;;  %s297_s20 = scalar_lea.vmem [#allocation2], %s296_s13 }
0x1890   : > { %v2222_v26 = vpop.xlane.xlu0 %2221 }
0x1891   : > { %3754 = vrcp.f32 %v2222_v26 }
0x1894   : > { %v2225_v27 = vpop.xlane.xlu0 %2224  ;;  %v2228_v29 = vpop.xlane.xlu1 %2227 }
0x1895   : > { %3756 = vrcp.f32 %v2225_v27 }
0x1896   : > { %3758 = vrcp.f32 %v2228_v29 }
0x1898   : > { %v2238_v30 = vpop.permute.xlu0 %2237  ;;  %v2240_v31 = vpop.permute.xlu1 %2239 }
0x1899   : > { %v2249_v32 = vand.u32 %v2240_v31, %v4073_v57  ;;  %3436 = vmatprep.subr.bf16.mxu1 %v2238_v30 }
0x189a   : > { %3437 = vmatpush3.bf16.msra.mxu1 %v2238_v30 }
0x189b   : > { %3438 = vmatprep.subr.bf16.mxu1 %v2249_v32  ;;  %v3755_v33 = vpop.eup %3754 }
0x189c   : > { %v2304_v34 = vpop.permute.xlu1 %2303  ;;  %v2232_v8 = vmul.f32 %v3755_v33, %v3749_v20  ;;  %v2300_v14 = vpop.permute.xlu0 %2299 }
0x189d   : > { %v2314_v38 = vsel %vm544_vm3, %v2304_v34, 0 }
0x189e   : > { %3439 = vmatpush3.bf16.msra.mxu1 %v2249_v32 }
0x189f   : > { %v3757_v60 = vpop.eup %3756  ;;  %3518 = vmatprep.subr.msk.bf16.mxu1 %vm544_vm3, %v2304_v34 }
0x18a0   : > { %v3759_v18 = vpop.eup %3758  ;;  %v2233_v12 = vmul.f32 %v3757_v60, %v3751_v19  ;;  %v2306_v5 = vpop.permute.xlu1 %2305 }
0x18a1   : > { %v2234_v36 = vmul.f32 %v3759_v18, %v3753_v22  ;;  %v2317_v48 = vsel %vm544_vm3, %v2306_v5, 0 }
0x18a2   : > { %v2235_v50 = vpack.c.bf16 %v2233_v12, %v2232_v8 }
0x18a3   : > { %v2236_v56 = vpack.c.bf16 %v2234_v36, %v2234_v36 }
0x18a4   : > { %3440 = vmatprep.mubr.msk.bf16.mxu1 %vm608_vm4, %v2235_v50  ;;  %v2302_v54 = vpop.permute.xlu1 %2301 }
0x18a5   : > { %3441 = vmatmul.mubr.msk.bf16.vlgmr.msra.gmra.mrb[36].mxu1 %vm608_vm4, %v2236_v56 }
0x18a6   : > { %3448 = vmatprep.mubr.msk.bf16.mxu1 %vm544_vm3, %v2300_v14  ;;  %v3633_v14 = vld [vmem:[%s4659_s3 + $0x4c] ss:$12 sps:$4 sm:$0xff]  }
0x18a7   : > { %3445 = vmatpush3.bf16.xpose.msra.mxu1 %v2314_v38 }
0x18a8   : > { %3519 = vmatprep.subr.msk.bf16.mxu1 %vm544_vm3, %v2306_v5 }
0x18af   : > { %3447 = vmatpush3.bf16.xpose.msra.mxu1 %v2317_v48 }
0x18b6   : > { %3449 = vmatmul.mubr.msk.bf16.vlgmr.msra.gmra.mrb[40].mxu1 %vm544_vm3, %v2302_v54 }
0x1978   : > { %v3442_v52 = vpop.f32.mrb[36].mxu1 }
0x1979   : > { %v2285_v15 = vpop.f32.mrb[37].mxu1 }
0x197a   : > { %v3443_v10 = vpop.f32.mrb[38].mxu1 }
0x197b   : > { %v2288_v17 = vpop.f32.mrb[39].mxu1 }
0x197c   : > { %v3598_v7 = vpack.i.bf16 %v2288_v17, %v2285_v15 }
0x1989   : > { %v3450_v58 = vpop.f32.mrb[40].mxu1 }
0x198a   : > { %v2353_v51 = vpop.f32.mrb[41].mxu1  ;;  %v2369_v63 = vmul.f32 0.35355338, %v3450_v58 }
0x198b   : > { %v2367_v59 = vmul.f32 0.35355338, %v2353_v51  ;;  %v3451_v61 = vpop.f32.mrb[42].mxu1 }
0x198c   : > { %v2356_v62 = vpop.f32.mrb[43].mxu1  ;;  %v2376_v4 = vsel %vm615_vm5, %v2369_v63, -inf }
0x198d   : > { %v2368_v0 = vmul.f32 0.35355338, %v2356_v62  ;;  %v2370_v1 = vsel %vm608_vm4, %v2367_v59, -inf }
0x198e   : > { %2371 = vmax.xlane.f32.xlu0 %v2370_v1 }
0x198f   : > { %v2373_v3 = vsel %vm608_vm4, %v2368_v0, -inf }
0x1990   : > { %2374 = vmax.xlane.f32.xlu1 %v2373_v3 }
0x1992   : > { %2377 = vmax.xlane.f32.xlu0 %v2376_v4 }
0x1a1b   : > { %v2372_v9 = vpop.xlane.xlu0 %2371 }
0x1a1c   : > { %v2379_v6 = vsub.f32 %v2367_v59, %v2372_v9 }
0x1a1d   : > { %v2375_v20 = vpop.xlane.xlu1 %2374 }
0x1a1e   : > { %v2382_v21 = vmul.f32 1.442695, %v2379_v6  ;;  %v2380_v19 = vsub.f32 %v2368_v0, %v2375_v20 }
0x1a1f   : > { %v2378_v22 = vpop.xlane.xlu0 %2377 }
0x1a20   : > { %3760 = vpow2.f32 %v2382_v21  ;;  %v2384_v16 = vmul.f32 1.442695, %v2380_v19  ;;  %v2381_v25 = vsub.f32 %v2369_v63, %v2378_v22 }
0x1a22   : > { %3762 = vpow2.f32 %v2384_v16  ;;  %v2386_v26 = vmul.f32 1.442695, %v2381_v25 }
0x1a24   : > { %3764 = vpow2.f32 %v2386_v26 }
0x1a2a   : > { %v3761_v27 = vpop.eup %3760 }
0x1a2b   : > { %v2388_v29 = vsel %vm608_vm4, %v3761_v27, 0.0 }
0x1a2c   : > { %v3763_v30 = vpop.eup %3762  ;;  %2389 = vadd.xlane.f32.xlu0 %v2388_v29 }
0x1a2d   : > { %v2391_v33 = vsel %vm608_vm4, %v3763_v30, 0.0 }
0x1a2e   : > { %v3765_v31 = vpop.eup %3764 }
0x1a2f   : > { %v2394_v32 = vsel %vm615_vm5, %v3765_v31, 0.0 }
0x1a30   : > { %2395 = vadd.xlane.f32.xlu1 %v2394_v32  ;;  %2392 = vadd.xlane.f32.xlu0 %v2391_v33 }
0x1a41   : > { %2407 = vrot.lane.b32.xlu1 %v4340_v40, %s4690_s25 }
0x1a45   : > { %3594 = vrot.lane.b32.xlu1 %v3593_v11, %s4691_s26 }
0x1a46   : > { %2405 = vrot.lane.b32.xlu0 %v4344_v46, %s4690_s25  ;;  %s2982_s25 = sshll.u32 %s297_s20, 4  ;;  %s4616_s25 = int_to_ptr.vmem [resolvable:$true] %s2982_s25 }
0x1a47   : > { %s3792_s9 = scalar_lea.vmem %s4616_s25, 16  ;;  %p3799_p0 = scmp.lt.s32.totalorder %s4616_s25, %s3797_s21 }
0x1a48   : > { %p3793_p11 = scmp.ne.s32.totalorder %s4616_s25, %s3792_s9 }
0x1a49   : > { %2474 = vrot.lane.b32.xlu1 %v4428_v44, %s4691_s26 }
0x1a4a   : > { %3599 = vrot.lane.b32.xlu0 %v3598_v7, %s4692_s10  ;;  %p3794_p12 = pnand %p3793_p11, %p3958_p5 }
0x1a4c   : > { %p3795_p13 = pneg %p3794_p12 }
0x1a4d   : > { %2486 = vrot.lane.b32.xlu1 %v3442_v52, %s4692_s10 }
0x1ab9   : > { %v2390_v34 = vpop.xlane.xlu0 %2389 }
0x1aba   : > { %3766 = vrcp.f32 %v2390_v34 }
0x1abd   : > { %v2393_v60 = vpop.xlane.xlu0 %2392  ;;  %v2396_v18 = vpop.xlane.xlu1 %2395 }
0x1abe   : > { %3768 = vrcp.f32 %v2393_v60 }
0x1abf   : > { %3770 = vrcp.f32 %v2396_v18 }
0x1ac1   : > { %v2406_v40 = vpop.permute.xlu0 %2405  ;;  %v2408_v8 = vpop.permute.xlu1 %2407 }
0x1ac2   : > { %v2417_v45 = vand.u32 %v2408_v8, %v4073_v57  ;;  %3452 = vmatprep.subr.bf16.mxu0 %v2406_v40  ;;  %v3632_v57 = vld [vmem:[%s4659_s3 + $0x34] ss:$12 sps:$4 sm:$0xff]  }
0x1ac3   : > { %3453 = vmatpush3.bf16.msra.mxu0 %v2406_v40 }
0x1ac4   : > { %3454 = vmatprep.subr.bf16.mxu0 %v2417_v45  ;;  %v3767_v46 = vpop.eup %3766 }
0x1ac5   : > { %v2400_v11 = vmul.f32 %v3767_v46, %v3761_v27  ;;  %v3595_v15 = vpop.permute.xlu1 %3594  ;;  %v3600_v17 = vpop.permute.xlu0 %3599 }
0x1ac6   : > { %v3597_v7 = vunpack.i.h.bf16 %v3595_v15  ;;  %v3596_v58 = vunpack.i.l.bf16 %v3595_v15  ;;  %v3602_v59 = vunpack.i.h.bf16 %v3600_v17  ;;  %v3601_v61 = vunpack.i.l.bf16 %v3600_v17 }
0x1ac7   : > { %3455 = vmatpush3.bf16.msra.mxu0 %v2417_v45 }
0x1ac8   : > { %v3769_v44 = vpop.eup %3768  ;;  %3460 = vmatprep.subr.bf16.mxu0 %v3632_v57  ;;  %v2504_v62 = vsel %vm544_vm3, %v4426_v43, %v3597_v7  ;;  %v2503_v63 = vsel %vm544_vm3, %v4424_v55, %v3596_v58 }
0x1ac9   : > { %v3771_v47 = vpop.eup %3770  ;;  %v2401_v12 = vmul.f32 %v3769_v44, %v3763_v30  ;;  %v2475_v10 = vpop.permute.xlu1 %2474  ;;  %v2506_v21 = vsel %vm1253_vm7, %v2503_v63, %v3601_v61  ;;  %v2507_v19 = vsel %vm1253_vm7, %v2504_v62, %v3602_v59  ;;  %v2625_v62 = vrot.slane %v4327_v23, %v1373_v24  ;;  %v3636_v24 = vld [vmem:[%s4660_s4 + $0x40] sm:$0xff]  }
0x1aca   : > { %v2402_v36 = vmul.f32 %v3771_v47, %v3765_v31  ;;  %v2505_v1 = vsel %vm544_vm3, %v4422_v37, %v2475_v10  ;;  %v2517_v37 = vrot.slane %v4327_v23, %v1265_v13 }
0x1acb   : > { %v2403_v50 = vpack.c.bf16 %v2401_v12, %v2400_v11 }
0x1acc   : > { %v2404_v56 = vpack.c.bf16 %v2402_v36, %v2402_v36 }
0x1acd   : > { %3456 = vmatprep.mubr.msk.bf16.mxu0 %vm608_vm4, %v2403_v50  ;;  %v2487_v51 = vpop.permute.xlu1 %2486 }
0x1ace   : > { %3457 = vmatmul.mubr.msk.bf16.vlgmr.msra.gmra.mrb[40].mxu0 %vm608_vm4, %v2404_v56  ;;  %v2508_v4 = vsel %vm1253_vm7, %v2505_v1, %v2487_v51 }
0x1acf   : > { %3461 = vmatpush3.bf16.msra.mxu0 %v3632_v57 }
0x1ad0   : > { %3462 = vmatprep.subr.bf16.mxu0 %v3633_v14 }
0x1ad3   : > { %3463 = vmatpush3.bf16.msra.mxu0 %v3633_v14 }
0x1ad4   : > { %3476 = vmatprep.subr.bf16.mxu0 %v3636_v24 }
0x1ba1   : > { %v3458_v38 = vpop.f32.mrb[40].mxu0 }
0x1ba2   : > { %2498 = vrot.lane.b32.xlu1 %v3458_v38, %s4693_s22  ;;  %v2453_v5 = vpop.f32.mrb[41].mxu0  ;;  %v3634_v38 = vld [vmem:[%s4659_s3 + $0x38] ss:$12 sps:$4 sm:$0xff]  }
0x1ba3   : > { %v3459_v48 = vpop.f32.mrb[42].mxu0  ;;  %3468 = vmatprep.subr.bf16.mxu1 %v3634_v38 }
0x1ba4   : > { %v2456_v54 = vpop.f32.mrb[43].mxu0  ;;  %3469 = vmatpush3.bf16.msra.mxu1 %v3634_v38 }
0x1ba5   : > { %v3603_v52 = vpack.i.bf16 %v2456_v54, %v2453_v5  ;;  %v3635_v5 = vld [vmem:[%s4659_s3 + $0x50] ss:$12 sps:$4 sm:$0xff]  }
0x1ba6   : > { %3470 = vmatprep.subr.bf16.mxu1 %v3635_v5 }
0x1ba7   : > { %3604 = vrot.lane.b32.xlu0 %v3603_v52, %s4693_s22  ;;  %s3798_s22 = scalar_lea.vmem %s3797_s21, 32 }
0x1ba8   : > { %3471 = vmatpush3.bf16.msra.mxu1 %v3635_v5  ;;  %p3800_p1 = scmp.lt.s32.totalorder %s3798_s22, %s3792_s9 }
0x1baa   : > { %p3801_p2 = por %p3800_p1, %p3799_p0 }
0x1bac   : > { %p3802_p3 = pnand %p3801_p2, %p3795_p13 }
0x1c14   : > { %v2499_v0 = vpop.permute.xlu1 %2498 }
0x1c15   : > { %v2511_v20 = vsel %vm1257_vm8, %v2508_v4, %v2499_v0 }
0x1c16   : > { %v2513_v16 = vpack.c.bf16 %v2511_v20, %v2511_v20 }
0x1c19   : > { %v3605_v3 = vpop.permute.xlu0 %3604 }
0x1c1a   : > { %v3607_v9 = vunpack.i.h.bf16 %v3605_v3  ;;  %v3606_v6 = vunpack.i.l.bf16 %v3605_v3 }
0x1c1c   : > { %v2509_v43 = vsel %vm1257_vm8, %v2506_v21, %v3606_v6  ;;  %v2510_v22 = vsel %vm1257_vm8, %v2507_v19, %v3607_v9  ;;  %v2632_v9 = vrot.slane %v4327_v23, %v1380_v28  ;;  %v3637_v28 = vld [vmem:[%s4660_s4 + $0x48] sm:$0xff]  }
0x1c1d   : > { %v2512_v55 = vpack.c.bf16 %v2510_v22, %v2509_v43 }
0x1c1f   : > { %3464 = vmatprep.mubr.msk.bf16.mxu0 %vm408_vm2, %v2512_v55 }
0x1c20   : > { %3465 = vmatmul.mubr.msk.bf16.vlgmr.msra.gmra.mrb[44].mxu0 %vm408_vm2, %v2513_v16  ;;  %v3638_v16 = vld [vmem:[%s4660_s4 + $0x50] sm:$0xff]  }
0x1c21   : > { %3477 = vmatpush3.bf16.msra.mxu0 %v3636_v24 }
0x1c22   : > { %3478 = vmatprep.subr.bf16.mxu0 %v3637_v28 }
0x1c25   : > { %3479 = vmatpush3.bf16.msra.mxu0 %v3637_v28 }
0x1c26   : > { %3480 = vmatprep.subr.bf16.mxu0 %v3638_v16 }
0x1c29   : > { %3481 = vmatpush3.bf16.msra.mxu0 %v3638_v16 }
0x1cf3   : > { %v3466_v25 = vpop.f32.mrb[44].mxu0 }
0x1cf4   : > { %v2566_v26 = vpop.f32.mrb[45].mxu0  ;;  %v2575_v27 = vadd.f32 %v3466_v25, %v2517_v37  ;;  %v3640_v25 = vld [vmem:[%s4660_s4 + $0x60] sm:$0xff]  }
0x1cf5   : > { %v2567_v29 = vadd.f32 %v2566_v26, %v2517_v37  ;;  %v3467_v30 = vpop.f32.mrb[46].mxu0  ;;  %v3641_v26 = vld [vmem:[%s4660_s4 + $0x68] sm:$0xff]  }
0x1cf6   : > { %v2569_v31 = vpop.f32.mrb[47].mxu0  ;;  %v2582_v34 = vadd.f32 %v2575_v27, %v4301_v41  ;;  %v3642_v27 = vld [vmem:[%s4660_s4 + $0x70] sm:$0xff]   ;;  %v3872_v30 = vmov 0.0  }
0x1cf7   : > { %v4510_v32 = vadd.f32 %v2567_v29, %v4298_v39  ;;  %v2570_v33 = vadd.f32 %v2569_v31, %v2517_v37  ;;  %v3639_v37 = vld [vmem:[%s4660_s4 + $0x58] sm:$0xff]   ;;  %3496 = vmatprep.subr.bf16.mxu1 %v3872_v30  ;;  %v2641_v31 = vrot.slane %v4327_v23, %v1389_v53 }
0x1cf8   : > { %v2589_v40 = vsel %vm415_vm1, %v2582_v34, 0.0  ;;  %3482 = vmatprep.subr.bf16.mxu0 %v3639_v37  ;;  %v3643_v29 = vld [vmem:[%s4660_s4 + $0x78] sm:$0xff]  }
0x1cf9   : > { %v2581_v60 = vadd.f32 %v2570_v33, %v4304_v42  ;;  %v2583_v18 = vsel %vm408_vm2, %v4510_v32, 0.0  ;;  %3483 = vmatpush3.bf16.msra.mxu0 %v3639_v37 }
0x1cfa   : > { %2584 = vadd.xlane.f32.xlu0 %v2583_v18  ;;  %3484 = vmatprep.subr.bf16.mxu0 %v3640_v25 }
0x1cfb   : > { %v2586_v13 = vsel %vm408_vm2, %v2581_v60, 0.0 }
0x1cfc   : > { %2587 = vadd.xlane.f32.xlu1 %v2586_v13 }
0x1cfd   : > { %3485 = vmatpush3.bf16.msra.mxu0 %v3640_v25 }
0x1cfe   : > { %2590 = vadd.xlane.f32.xlu0 %v2589_v40  ;;  %3486 = vmatprep.subr.bf16.mxu0 %v3641_v26 }
0x1d01   : > { %3487 = vmatpush3.bf16.msra.mxu0 %v3641_v26 }
0x1d02   : > { %3488 = vmatprep.subr.bf16.mxu0 %v3642_v27 }
0x1d05   : > { %3489 = vmatpush3.bf16.msra.mxu0 %v3642_v27 }
0x1d06   : > { %3490 = vmatprep.subr.bf16.mxu0 %v3643_v29 }
0x1d09   : > { %3491 = vmatpush3.bf16.msra.mxu0 %v3643_v29 }
0x1d87   : > { %v2585_v8 = vpop.xlane.xlu0 %2584 }
0x1d88   : > { %v2592_v45 = vmul.f32 0.03125, %v2585_v8 }
0x1d89   : > { %v2588_v46 = vpop.xlane.xlu1 %2587 }
0x1d8a   : > { %v2595_v39 = vsub.f32 %v4510_v32, %v2592_v45  ;;  %v2593_v44 = vmul.f32 0.03125, %v2588_v46 }
0x1d8b   : > { %v2591_v47 = vpop.xlane.xlu0 %2590 }
0x1d8c   : > { %v2596_v41 = vsub.f32 %v2581_v60, %v2593_v44  ;;  %v2594_v11 = vmul.f32 0.03125, %v2591_v47  ;;  %v2598_v42 = vmul.f32 %v2595_v39, %v2595_v39 }
0x1d8e   : > { %v2597_v12 = vsub.f32 %v2582_v34, %v2594_v11  ;;  %v2601_v36 = vsel %vm408_vm2, %v2598_v42, 0.0  ;;  %v2599_v50 = vmul.f32 %v2596_v41, %v2596_v41 }
0x1d8f   : > { %2602 = vadd.xlane.f32.xlu0 %v2601_v36 }
0x1d90   : > { %v2600_v56 = vmul.f32 %v2597_v12, %v2597_v12  ;;  %v2604_v57 = vsel %vm408_vm2, %v2599_v50, 0.0 }
0x1d92   : > { %v2607_v14 = vsel %vm415_vm1, %v2600_v56, 0.0 }
0x1d93   : > { %2605 = vadd.xlane.f32.xlu0 %v2604_v57  ;;  %2608 = vadd.xlane.f32.xlu1 %v2607_v14 }
0x1e1c   : > { %v2603_v48 = vpop.xlane.xlu0 %2602 }
0x1e1d   : > { %v2610_v54 = vmul.f32 0.03125, %v2603_v48 }
0x1e1f   : > { %v2613_v52 = vadd.f32 1e-05, %v2610_v54 }
0x1e20   : > { %v2609_v15 = vpop.xlane.xlu1 %2608  ;;  %v2606_v10 = vpop.xlane.xlu0 %2605 }
0x1e21   : > { %3772 = vrsqrt.f32 %v2613_v52  ;;  %v2612_v17 = vmul.f32 0.03125, %v2609_v15  ;;  %v2611_v7 = vmul.f32 0.03125, %v2606_v10 }
0x1e23   : > { %v2615_v58 = vadd.f32 1e-05, %v2612_v17  ;;  %v2614_v51 = vadd.f32 1e-05, %v2611_v7 }
0x1e25   : > { %3774 = vrsqrt.f32 %v2615_v58 }
0x1e26   : > { %3776 = vrsqrt.f32 %v2614_v51 }
0x1e2b   : > { %v3773_v59 = vpop.eup %3772 }
0x1e2c   : > { %v2619_v61 = vmul.f32 %v3773_v59, %v2595_v39 }
0x1e2e   : > { %v2626_v4 = vmul.f32 %v2625_v62, %v2619_v61 }
0x1e2f   : > { %v3775_v63 = vpop.eup %3774 }
0x1e30   : > { %v3777_v0 = vpop.eup %3776  ;;  %v2621_v1 = vmul.f32 %v3775_v63, %v2597_v12  ;;  %v2633_v19 = vadd.f32 %v2632_v9, %v2626_v4 }
0x1e31   : > { %v2620_v3 = vmul.f32 %v3777_v0, %v2596_v41 }
0x1e32   : > { %v2628_v6 = vmul.f32 %v2625_v62, %v2621_v1 }
0x1e33   : > { %v2627_v20 = vmul.f32 %v2625_v62, %v2620_v3 }
0x1e34   : > { %v2635_v21 = vadd.f32 %v2632_v9, %v2628_v6 }
0x1e35   : > { %v2634_v43 = vadd.f32 %v2632_v9, %v2627_v20 }
0x1e36   : > { %v2637_v22 = vpack.c.bf16 %v2635_v21, %v2635_v21 }
0x1e37   : > { %v2636_v55 = vpack.c.bf16 %v2634_v43, %v2633_v19 }
0x1e39   : > { %3472 = vmatprep.mubr.msk.bf16.mxu1 %vm408_vm2, %v2636_v55 }
0x1e3a   : > { %3473 = vmatmul.mubr.msk.bf16.vlgmr.msra.gmra.mrb[44].mxu1 %vm408_vm2, %v2637_v22 }
0x1e3b   : > { %3500 = vmatprep.mubr.msk.bf16.mxu1 %vm3873_vm15, %v3872_v30 }
0x1f0d   : > { %v3474_v33 = vpop.f32.mrb[44].mxu1 }
0x1f0e   : > { %v4564_v34 = vadd.f32 %v3474_v33, %v2641_v31  ;;  %v2694_v60 = vpop.f32.mrb[45].mxu1 }
0x1f0f   : > { %v4566_v18 = vadd.f32 %v2694_v60, %v2641_v31  ;;  %v3475_v13 = vpop.f32.mrb[46].mxu1 }
0x1f10   : > { %v4569_v40 = vmul.f32 0.70710677, %v4564_v34  ;;  %v2697_v8 = vpop.f32.mrb[47].mxu1 }
0x1f11   : > { %v4572_v45 = vmul.f32 0.70710677, %v4566_v18  ;;  %v4574_v46 = vadd.f32 %v2697_v8, %v2641_v31 }
0x1f12   : > { %v2722_v39 = vand.u32 2147483647, %v4569_v40  ;;  %vm2716_vm12 = vcmp.lt.f32.partialorder %v4569_v40, 0.0 }
0x1f13   : > { %v2720_v53 = vand.u32 2147483647, %v4572_v45  ;;  %v4579_v44 = vmul.f32 0.70710677, %v4574_v46  ;;  %vm2714_vm13 = vcmp.lt.f32.partialorder %v4572_v45, 0.0 }
0x1f14   : > { %v2725_v23 = vmul.f32 0.3275911, %v2722_v39  ;;  %v2764_v50 = vsub.f32 0.0, %v2722_v39 }
0x1f15   : > { %v2723_v47 = vmul.f32 0.3275911, %v2720_v53  ;;  %v2721_v11 = vand.u32 2147483647, %v4579_v44  ;;  %v2762_v56 = vsub.f32 0.0, %v2720_v53  ;;  %vm2715_vm14 = vcmp.lt.f32.partialorder %v4579_v44, 0.0 }
0x1f16   : > { %v2728_v41 = vadd.f32 1.0, %v2725_v23  ;;  %v2767_v14 = vmul.f32 %v2764_v50, %v2722_v39 }
0x1f17   : > { %v2726_v42 = vadd.f32 1.0, %v2723_v47  ;;  %v2724_v12 = vmul.f32 0.3275911, %v2721_v11  ;;  %v2763_v38 = vsub.f32 0.0, %v2721_v11  ;;  %v2765_v54 = vmul.f32 %v2762_v56, %v2720_v53 }
0x1f18   : > { %3778 = vrcp.f32 %v2728_v41  ;;  %v2772_v17 = vmul.f32 1.442695, %v2767_v14  ;;  %v2719_v53 = vsel %vm2716_vm12, -1.0, %v3871_v2  ;;  %v2717_v41 = vsel %vm2714_vm13, -1.0, %v3871_v2 }
0x1f19   : > { %3780 = vrcp.f32 %v2726_v42  ;;  %v2727_v36 = vadd.f32 1.0, %v2724_v12  ;;  %v2766_v58 = vmul.f32 %v2763_v38, %v2721_v11  ;;  %v2768_v59 = vmul.f32 1.442695, %v2765_v54 }
0x1f1a   : > { %v2710_v56 = vmul.f32 0.5, %v4564_v34  ;;  %v2709_v14 = vmul.f32 0.5, %v4574_v46  ;;  %v3645_v34 = vld [vmem:[%s4662_s6 + $0x8] sm:$0xff]  }
0x1f1b   : > { %3782 = vrcp.f32 %v2727_v36  ;;  %v2770_v3 = vmul.f32 1.442695, %v2766_v58  ;;  %v2718_v36 = vsel %vm2715_vm14, -1.0, %v3871_v2  ;;  %v3644_v2 = vld [vmem:[%s4662_s6] sm:$0xff]  }
0x1f1c   : > { %3784 = vpow2.f32 %v2772_v17  ;;  %3497 = vmatpush3.bf16.msra.mxu1 %v3644_v2 }
0x1f1d   : > { %3786 = vpow2.f32 %v2768_v59  ;;  %3498 = vmatprep.subr.bf16.mxu1 %v3872_v30  ;;  %v2912_v30 = vld [vmem:[%s4663_s7] sm:$0x1] }
0x1f1e   : > { %3788 = vpow2.f32 %v2770_v3 }
0x1f20   : > { %3499 = vmatpush3.bf16.msra.mxu1 %v3645_v34 }
0x1f22   : > { %v3779_v57 = vpop.eup %3778 }
0x1f23   : > { %v3781_v5 = vpop.eup %3780  ;;  %v2737_v48 = vmul.f32 1.0614054, %v3779_v57 }
0x1f24   : > { %v2735_v52 = vmul.f32 1.0614054, %v3781_v5 }
0x1f25   : > { %v2740_v15 = vadd.f32 -1.4531521, %v2737_v48  ;;  %v3783_v10 = vpop.eup %3782 }
0x1f26   : > { %v2738_v7 = vadd.f32 -1.4531521, %v2735_v52  ;;  %v2736_v61 = vmul.f32 1.0614054, %v3783_v10  ;;  %v3785_v26 = vpop.eup %3784 }
0x1f27   : > { %v2743_v51 = vmul.f32 %v3779_v57, %v2740_v15  ;;  %v3787_v29 = vpop.eup %3786 }
0x1f28   : > { %v2741_v62 = vmul.f32 %v3781_v5, %v2738_v7  ;;  %v2739_v0 = vadd.f32 -1.4531521, %v2736_v61  ;;  %v3789_v39 = vpop.eup %3788 }
0x1f29   : > { %v2746_v63 = vadd.f32 1.4214138, %v2743_v51 }
0x1f2a   : > { %v2744_v1 = vadd.f32 1.4214138, %v2741_v62  ;;  %v2742_v9 = vmul.f32 %v3783_v10, %v2739_v0 }
0x1f2b   : > { %v2749_v4 = vmul.f32 %v3779_v57, %v2746_v63 }
0x1f2c   : > { %v2747_v6 = vmul.f32 %v3781_v5, %v2744_v1  ;;  %v2745_v21 = vadd.f32 1.4214138, %v2742_v9 }
0x1f2d   : > { %v2752_v20 = vadd.f32 -0.28449672, %v2749_v4 }
0x1f2e   : > { %v2750_v19 = vadd.f32 -0.28449672, %v2747_v6  ;;  %v2748_v22 = vmul.f32 %v3783_v10, %v2745_v21 }
0x1f2f   : > { %v2755_v43 = vmul.f32 %v3779_v57, %v2752_v20 }
0x1f30   : > { %v2753_v55 = vmul.f32 %v3781_v5, %v2750_v19  ;;  %v2751_v28 = vadd.f32 -0.28449672, %v2748_v22 }
0x1f31   : > { %v2758_v24 = vadd.f32 0.2548296, %v2755_v43 }
0x1f32   : > { %v2756_v16 = vadd.f32 0.2548296, %v2753_v55  ;;  %v2754_v25 = vmul.f32 %v3783_v10, %v2751_v28 }
0x1f33   : > { %v2761_v37 = vmul.f32 %v3779_v57, %v2758_v24  ;;  %v2708_v57 = vmul.f32 0.5, %v4566_v18  ;;  %v3791_v18 = vld [vmem:[%s4661_s5 + $0x8] sm:$0xff] }
0x1f34   : > { %v2759_v27 = vmul.f32 %v3781_v5, %v2756_v16  ;;  %v2757_v33 = vadd.f32 0.2548296, %v2754_v25  ;;  %v2811_v46 = vrot.slane %v3791_v18, %v1558_v35 }
0x1f35   : > { %v2776_v31 = vmul.f32 %v3785_v26, %v2761_v37 }
0x1f36   : > { %v2774_v60 = vmul.f32 %v3787_v29, %v2759_v27  ;;  %v2760_v8 = vmul.f32 %v3783_v10, %v2757_v33 }
0x1f37   : > { %v2779_v13 = vsub.f32 1.0, %v2776_v31 }
0x1f38   : > { %v2777_v23 = vsub.f32 1.0, %v2774_v60  ;;  %v2775_v11 = vmul.f32 %v3789_v39, %v2760_v8 }
0x1f39   : > { %v2782_v47 = vmul.f32 %v2779_v13, %v2719_v53 }
0x1f3a   : > { %v2780_v42 = vmul.f32 %v2777_v23, %v2717_v41  ;;  %v2778_v12 = vsub.f32 1.0, %v2775_v11 }
0x1f3b   : > { %v2785_v40 = vadd.f32 1.0, %v2782_v47 }
0x1f3c   : > { %v2783_v50 = vadd.f32 1.0, %v2780_v42  ;;  %v2781_v45 = vmul.f32 %v2778_v12, %v2718_v36 }
0x1f3d   : > { %v2788_v5 = vmul.f32 %v2785_v40, %v2710_v56 }
0x1f3e   : > { %v2784_v38 = vadd.f32 1.0, %v2781_v45  ;;  %v2786_v48 = vmul.f32 %v2783_v50, %v2708_v57 }
0x1f3f   : > { %v2790_v44 = vpack.c.bf16 %v2788_v5, %v2788_v5 }
0x1f40   : > { %v2787_v54 = vmul.f32 %v2784_v38, %v2709_v14 }
0x1f42   : > { %v2789_v52 = vpack.c.bf16 %v2787_v54, %v2786_v48 }
0x1f44   : > { %3492 = vmatprep.mubr.bf16.mxu0 %v2789_v52 }
0x1f45   : > { %3493 = vmatmul.mubr.bf16.vlgmr.msra.gmra.mrb[48].mxu0 %v2790_v44 }
0x2018   : > { %v3494_v15 = vpop.f32.mrb[48].mxu0 }
0x2019   : > { %v2894_v10 = vpop.f32.mrb[49].mxu0 }
0x201a   : > { %v2895_v17 = vadd.f32 %v2894_v10, %v2811_v46  ;;  %v3495_v7 = vpop.f32.mrb[50].mxu0 }
0x201b   : > { %v2897_v58 = vpop.f32.mrb[51].mxu0 }
0x201c   : > { %v2906_v51 = vadd.f32 %v2895_v17, %v4510_v32 }
0x201e   : > { %v2907_v59 = vpack.c.bf16 %v2906_v51, %v2906_v51 }
0x2020   : > { %3501 = vmatmul.mubr.msk.bf16.vlgmr.msra.gmra.mrb[48].mxu1 %vm408_vm2, %v2907_v59 }
0x20f3   : > { %v2962_v49 = vpop.f32.mrb[48].mxu1 }
0x20f4   : > { %v2963_v35 = vadd.f32 %v2962_v49, %v2912_v30  ;;  %v3502_v61 = vpop.f32.mrb[49].mxu1 }
0x20f5   : > { %v2965_v32 = vpop.f32.mrb[50].mxu1 }
0x20f6   : > { %2968 = vst [vmem:[%s297_s20] sm:$0x1] %v2963_v35  ;;  %v3503_v62 = vpop.f32.mrb[51].mxu1 }
0x20f7   : > { %3805 = shalt.err (!%p3802_p3)
}
0x20f8   : > { %s3806_s13 = scalar_lea.hbm %s4614_s12, 16  ;;  %s3810_s19 = scalar_lea.hbm %s4664_s8, 32 }
0x20f9   : > { %p3807_p4 = scmp.ne.s32.totalorder %s4614_s12, %s3806_s13  ;;  %p3811_p9 = scmp.lt.u32.totalorder %s4614_s12, %s4664_s8 }
0x20fa   : > { %p3812_p10 = scmp.lt.u32.totalorder %s3810_s19, %s3806_s13  ;;  %p3814_p12 = scmp.lt.u32.totalorder %s3806_s13, %s4614_s12 }
0x20fb   : > { %p3808_p7 = pnand %p3807_p4, %p3958_p5 }
0x20fc   : > { %p3813_p11 = por %p3812_p10, %p3811_p9 }
0x20fd   : > { %p3809_p8 = pneg %p3808_p7 }
0x20fe   : > { %p3815_p13 = por %p3814_p12, %p3813_p11 }
0x2100   : > { %p3816_p0 = pnand %p3815_p13, %p3809_p8 }
0x2102   : > { %3819 = shalt.err (!%p3816_p0)
}
0x2103   : > { %3521 = dma.vmem_to_hbm [thread:$0]  (%p3958_p5), %s4616_s25, 16, %s4614_s12, %s2970_s23  }
0x2104 PF: > { %p3527_p1 = scmp.ge.s32.totalorder %s3854_s30, 2  ;;  %s2994_s10 = sand.u32 1, %s3842_s27  }
0x2105   : > { %s2995_s9 = scalar_lea.sflag [#allocation3], %s2994_s10 }
0x2106   : > { %p3524_p2 = pnand %p3527_p1, %p3962_p6 }
0x2108   : > { %3837 = dma.done.wait (!%p3524_p2), %s2995_s9, 16  }
0x2109   : > { %3839 = vsyncadd (!%p3524_p2), %s2995_s9, 4294967280  ;;  %p18_p3 = scmp.ge.s32.totalorder %s3945_s11, 4   ;;  %s4694_s27 = smov %s3846_s28 }
0x210a   : > { %s4695_s28 = smov %s3850_s29  ;;  %s4696_s29 = smov %s3956_s14 }
0x210b   : > { %s4697_s30 = smov %s3945_s11  ;;  %20 = sbr.rel (!%p18_p3) target bundleno = 3 (0x3), region = 90 }
0x2112   :  { %2999 = vsyncpa [#allocation3], 1 }
0x2113   :  { %3001 = vsyncpa [#allocation3 + $0x1], 1 }

</bundles_post_ra>
